<compile_context>
chip_gen: v6e
topology: v6e:2x2x1
jax: 0.10.0
libtpu: 0.0.40
codegen_flags: <defaults>
</compile_context>

<pallas_src>
import functools
import math

import jax
import jax.numpy as jnp
from jax.experimental import pallas as pl
from jax.experimental.pallas import tpu as pltpu

SELU_ALPHA = 1.6732632423543772
SELU_SCALE = 1.0507009873554805


# ---------------------------------------------------------------- helpers (traced in-kernel)
def _selu(y):
    return SELU_SCALE * jnp.where(y > 0, y, SELU_ALPHA * (jnp.exp(y) - 1.0))


def _mxdot(a, b):
    """MXU matmul: bf16 operands, f32 accumulation."""
    return jnp.dot(a.astype(jnp.bfloat16), b.astype(jnp.bfloat16),
                   preferred_element_type=jnp.float32)


def _mxdot_nt(a, b):
    """a(m,d) x b(n,d) -> (m,n): contract the last dim of both (bf16 in, f32 out)."""
    return jax.lax.dot_general(a.astype(jnp.bfloat16), b.astype(jnp.bfloat16),
                               (((1,), (1,)), ((), ())),
                               preferred_element_type=jnp.float32)


def _mha(q, k, v, key_bias, wo, bo, n_head, sm_scale):
    """Multi-head attention core for one batch element.

    q (Lq,F), k/v (Lk,F), key_bias (1,Lk) additive (-1e30 on padded keys).
    Heads are handled with lane masks + full-width matmuls (no transposes / no sub-8 slicing).
    NOTE: rows whose keys are all padded get a uniform softmax instead of PyTorch's NaN.
    """
    Lq, F = q.shape
    Dh = F // n_head
    lane = jax.lax.broadcasted_iota(jnp.int32, (1, F), 1)
    attn = jnp.zeros((Lq, F), jnp.float32)
    for h in range(n_head):
        hmask = ((lane >= h * Dh) & (lane < (h + 1) * Dh)).astype(jnp.float32)
        s = _mxdot_nt(q * hmask, k) * sm_scale + key_bias          # (Lq, Lk)
        s = s - jnp.max(s, axis=-1, keepdims=True)
        p = jnp.exp(s)
        p = p * pl.reciprocal(jnp.sum(p, axis=-1, keepdims=True), approx=True)
        attn = attn + _mxdot(p, v) * hmask                         # keep only this head's lanes
    return _mxdot(attn, wo) + bo


# ---------------------------------------------------------------- encoder kernel (per batch)
def _encoder_kernel(ex_ref, maskb_ref,
                    wc_ref, bc_ref, wex_ref, bex_ref,
                    wih_ref, whh_ref, blstm_ref,
                    wqkv_ref, bqkv_ref, wo_ref, bo_ref,
                    out_ref, *, n_head):
    S, Din = ex_ref.shape
    F = wex_ref.shape[1]
    num_layers = wih_ref.shape[0]
    sm_scale = 1.0 / math.sqrt(F // n_head)

    # coeff_block (Linear+ReLU) fused with ex_dimtrans (Linear+SELU)
    h0 = jnp.maximum(_mxdot(ex_ref[...], wc_ref[...]) + bc_ref[...], 0.0)
    x = _selu(_mxdot(h0, wex_ref[...]) + bex_ref[...])             # (S, F)

    # stacked LSTM (PyTorch gate order i,f,g,o); input projection hoisted out of the time loop
    row = jax.lax.broadcasted_iota(jnp.int32, (S, 1), 0)           # row ids, for output scatter
    sel = jax.lax.broadcasted_iota(jnp.int32, (1, S), 1)           # one-hot row gather
    for l in range(num_layers):
        gx = _mxdot(x, wih_ref[l]) + blstm_ref[l]                  # (S, 4F): all X@Wih at once
        whh_l = whh_ref[l].astype(jnp.bfloat16)                    # hoisted recurrent weight
        h = jnp.zeros((1, F), jnp.float32)
        c = jnp.zeros((1, F), jnp.float32)                         # cell state kept in f32
        ys = jnp.zeros((S, F), jnp.float32)
        # TODO(synk): switch to lax.fori_loop(unroll=chunks) if S grows enough to spill vregs.
        for t in range(S):
            pick = (sel == t).astype(jnp.float32)                  # (1, S) one-hot row select
            gates = (jnp.dot(pick, gx, preferred_element_type=jnp.float32)
                     + jnp.dot(h.astype(jnp.bfloat16), whh_l,
                               preferred_element_type=jnp.float32))  # (1, 4F)
            i_g = jax.nn.sigmoid(gates[:, 0:F])
            f_g = jax.nn.sigmoid(gates[:, F:2 * F])
            g_g = jnp.tanh(gates[:, 2 * F:3 * F])
            o_g = jax.nn.sigmoid(gates[:, 3 * F:4 * F])
            c = f_g * c + i_g * g_g
            h = o_g * jnp.tanh(c)
            ys = ys + jnp.where(row == t, h, 0.0)                  # scatter h into row t
        x = ys

    # SELU then coeff self-attention: one packed QKV matmul, per-head handled in _mha
    x = _selu(x)
    qkv = _mxdot(x, wqkv_ref[...]) + bqkv_ref[...]                 # (S, 3F)
    q, k, v = qkv[:, 0:F], qkv[:, F:2 * F], qkv[:, 2 * F:3 * F]
    out_ref[...] = _mha(q, k, v, maskb_ref[...], wo_ref[...], bo_ref[...], n_head, sm_scale)


# ---------------------------------------------------------------- blend + decoder kernel (per batch)
def _blend_kernel(spec_ref, xic_ref, feat_ref, ppm_ref, kv_ref, maskb_ref,
                  wpep_ref, bpep_ref, wxic_ref, bxic_ref, wfeat_ref, bfeat_ref,
                  wppm_ref, pscale_ref, pbias_ref,
                  wq_ref, bq_ref, wkv_ref, bkv_ref, wo_ref, bo_ref,
                  wd1_ref, bd1_ref, wd2_ref, bd2_ref,
                  o_ref, q_scr, *, n_head):
    S, Din = ppm_ref.shape
    F = wq_ref.shape[0]
    sm_scale = 1.0 / math.sqrt(F // n_head)
    n_query = S + 3                      # spectrum + xic_corr + ppm rows + featured_ion
    Lq = q_scr.shape[0]                  # 8 + S (3 real single-token queries + 5 padding rows)

    # single-token dimtrans branches (Linear+SELU), scattered into padded tail rows 0..2
    pep = _selu(_mxdot(spec_ref[...], wpep_ref[...]) + bpep_ref[...])   # (1, F)
    xic = _selu(_mxdot(xic_ref[...], wxic_ref[...]) + bxic_ref[...])
    fio = _selu(_mxdot(feat_ref[...], wfeat_ref[...]) + bfeat_ref[...])
    row8 = jax.lax.broadcasted_iota(jnp.int32, (8, 1), 0)
    tail = (jnp.where(row8 == 0, pep, 0.0) + jnp.where(row8 == 1, xic, 0.0)
            + jnp.where(row8 == 2, fio, 0.0))                           # (8, F)
    q_scr[pl.ds(0, 8), :] = tail

    # ppm branch: Linear with eval-mode BatchNorm folded to per-row scale/bias, then SELU
    z = _mxdot(ppm_ref[...], wppm_ref[...]) * pscale_ref[...] + pbias_ref[...]
    q_scr[pl.ds(8, S), :] = _selu(z)                                    # (S, F)

    # cross attention: queries = concatenated spectrum features, keys/values = encoder output
    qin = q_scr[...]                                                    # (Lq, F)
    q = _mxdot(qin, wq_ref[...]) + bq_ref[...]
    kv = _mxdot(kv_ref[...], wkv_ref[...]) + bkv_ref[...]               # (S, 2F) packed K|V
    k, v = kv[:, 0:F], kv[:, F:2 * F]
    attn = _mha(q, k, v, maskb_ref[...], wo_ref[...], bo_ref[...], n_head, sm_scale)

    # mean over the S+3 real query rows (padding rows 3..7 excluded), fused decoder tail
    col = jax.lax.broadcasted_iota(jnp.int32, (1, Lq), 1)
    wmean = jnp.where((col < 3) | (col >= 8), 1.0 / n_query, 0.0).astype(jnp.float32)
    x = jnp.dot(wmean, attn, preferred_element_type=jnp.float32)        # (1, F)
    x = _selu(_mxdot(x, wd1_ref[...]) + bd1_ref[...])
    o_ref[...] = jax.nn.sigmoid(_mxdot(x, wd2_ref[...]) + bd2_ref[...])


# ---------------------------------------------------------------- parameter init (PyTorch-like)
def init_params(key, num_layers, d_in, feedward_dim, d_out):
    F = feedward_dim
    keys = iter(jax.random.split(key, 32))

    def lin(k, fi, fo):
        kw, kb = jax.random.split(k)
        bound = 1.0 / math.sqrt(fi)
        w = jax.random.uniform(kw, (fi, fo), jnp.float32, -bound, bound)
        b = jax.random.uniform(kb, (1, fo), jnp.float32, -bound, bound)
        return w, b

    def mha(k):
        ks = jax.random.split(k, 4)
        wq, bq = lin(ks[0], F, F)
        wk, bk = lin(ks[1], F, F)
        wv, bv = lin(ks[2], F, F)
        wo, bo = lin(ks[3], F, F)
        return dict(wq=wq, bq=bq,
                    wqkv=jnp.concatenate([wq, wk, wv], axis=1),
                    bqkv=jnp.concatenate([bq, bk, bv], axis=1),
                    wkv=jnp.concatenate([wk, wv], axis=1),
                    bkv=jnp.concatenate([bk, bv], axis=1),
                    wo=wo, bo=bo)

    p = {}
    p["coeff_block"] = lin(next(keys), d_in, d_in)
    p["pep_dimtrans"] = lin(next(keys), d_in, F)
    p["ex_dimtrans"] = lin(next(keys), d_in, F)
    p["featured_ion_dimtrans"] = lin(next(keys), d_in, F)
    p["xic_corr_dimtrans"] = lin(next(keys), d_in, F)

    # ppm_dimtrans: BatchNorm1d(d_in) (eval mode, default running stats) folded into the
    # linear as a per-sequence-row scale + bias: z = scale[s]*(x@W) + shift[s]*colsum(W) + b.
    w_ppm, b_ppm = lin(next(keys), d_in, F)
    gamma = jnp.ones((d_in,), jnp.float32)
    beta = jnp.zeros((d_in,), jnp.float32)
    r_mean = jnp.zeros((d_in,), jnp.float32)
    r_var = jnp.ones((d_in,), jnp.float32)
    scale = gamma / jnp.sqrt(r_var + 1e-5)
    shift = beta - r_mean * scale
    p["ppm_w"] = w_ppm
    p["ppm_scale"] = scale.reshape(d_in, 1)                       # rows index seq (S == d_in)
    p["ppm_bias"] = shift[:, None] * jnp.sum(w_ppm, axis=0)[None, :] + b_ppm

    p["coeff_attention"] = mha(next(keys))
    p["blend_attention"] = mha(next(keys))

    bound = 1.0 / math.sqrt(F)
    wih, whh, bl = [], [], []
    for _ in range(num_layers):
        ks = jax.random.split(next(keys), 4)
        wih.append(jax.random.uniform(ks[0], (F, 4 * F), jnp.float32, -bound, bound))
        whh.append(jax.random.uniform(ks[1], (F, 4 * F), jnp.float32, -bound, bound))
        bl.append((jax.random.uniform(ks[2], (4 * F,), jnp.float32, -bound, bound)
                   + jax.random.uniform(ks[3], (4 * F,), jnp.float32, -bound, bound)
                   ).reshape(1, 4 * F))
    p["lstm_wih"] = jnp.stack(wih)        # (L, F, 4F)
    p["lstm_whh"] = jnp.stack(whh)        # (L, F, 4F)
    p["lstm_b"] = jnp.stack(bl)           # (L, 1, 4F)

    p["decoder1"] = lin(next(keys), F, F // 2)
    p["decoder2"] = lin(next(keys), F // 2, d_out)
    return p


# ---------------------------------------------------------------- wrapper / full forward
def _wspec(shape):
    nd = len(shape)
    return pl.BlockSpec(shape, lambda b: (0,) * nd)


def model_forward(params, ex_ms2, spectrum, mask, xic_corr, ppm, featured_ion, n_head):
    B, S, Din, _ = ex_ms2.shape
    F = params["ex_dimtrans"][0].shape[1]
    d_out = params["decoder2"][0].shape[1]

    ex = ex_ms2[:, :, :, 1].astype(jnp.float32)                 # (B, S, Din)
    spec = spectrum[:, :, :, 1].astype(jnp.float32)             # (B, 1, Din)
    xic = xic_corr[:, None, :].astype(jnp.float32)              # (B, 1, Din)
    feat = featured_ion[:, None, :].astype(jnp.float32)         # (B, 1, Din)
    ppm_f = ppm.astype(jnp.float32)                             # (B, S, Din)
    maskb = jnp.where(mask, -1e30, 0.0).astype(jnp.float32)[:, None, :]   # (B, 1, S)

    # ---- fused encoder kernel: coeff_block + ex_dimtrans + LSTM stack + SELU + self-attn
    wc, bc = params["coeff_block"]
    wex, bex = params["ex_dimtrans"]
    ca = params["coeff_attention"]
    enc_w = (wc, bc, wex, bex,
             params["lstm_wih"], params["lstm_whh"], params["lstm_b"],
             ca["wqkv"], ca["bqkv"], ca["wo"], ca["bo"])
    ex_att = pl.pallas_call(
        functools.partial(_encoder_kernel, n_head=n_head),
        out_shape=jax.ShapeDtypeStruct((B, S, F), jnp.float32),
        grid=(B,),
        in_specs=[pl.BlockSpec((None, S, Din), lambda b: (b, 0, 0)),
                  pl.BlockSpec((None, 1, S), lambda b: (b, 0, 0))]
                 + [_wspec(w.shape) for w in enc_w],
        out_specs=pl.BlockSpec((None, S, F), lambda b: (b, 0, 0)),
        compiler_params=pltpu.CompilerParams(dimension_semantics=("parallel",)),
    )(ex, maskb, *enc_w)

    # ---- fused blend kernel: dimtrans branches + cross-attn + mean + decoder
    ba = params["blend_attention"]
    wpep, bpep = params["pep_dimtrans"]
    wxic, bxic = params["xic_corr_dimtrans"]
    wfeat, bfeat = params["featured_ion_dimtrans"]
    wd1, bd1 = params["decoder1"]
    wd2, bd2 = params["decoder2"]
    bl_w = (wpep, bpep, wxic, bxic, wfeat, bfeat,
            params["ppm_w"], params["ppm_scale"], params["ppm_bias"],
            ba["wq"], ba["bq"], ba["wkv"], ba["bkv"], ba["wo"], ba["bo"],
            wd1, bd1, wd2, bd2)
    out = pl.pallas_call(
        functools.partial(_blend_kernel, n_head=n_head),
        out_shape=jax.ShapeDtypeStruct((B, 1, d_out), jnp.float32),
        grid=(B,),
        in_specs=[pl.BlockSpec((None, 1, Din), lambda b: (b, 0, 0)),   # spectrum token
                  pl.BlockSpec((None, 1, Din), lambda b: (b, 0, 0)),   # xic_corr
                  pl.BlockSpec((None, 1, Din), lambda b: (b, 0, 0)),   # featured_ion
                  pl.BlockSpec((None, S, Din), lambda b: (b, 0, 0)),   # ppm
                  pl.BlockSpec((None, S, F), lambda b: (b, 0, 0)),     # encoder output (K/V)
                  pl.BlockSpec((None, 1, S), lambda b: (b, 0, 0))]     # key-padding bias
                 + [_wspec(w.shape) for w in bl_w],
        out_specs=pl.BlockSpec((None, 1, d_out), lambda b: (b, 0, 0)),
        scratch_shapes=[pltpu.VMEM((8 + S, F), jnp.float32)],
        compiler_params=pltpu.CompilerParams(dimension_semantics=("parallel",)),
    )(spec, xic, feat, ppm_f, ex_att, maskb, *bl_w)
    return out[:, 0, :]


if __name__ == "__main__":
    num_layers, d_in, feedward_dim, n_head, d_out = 2, 8, 32, 4, 2
    B = 2
    S = d_in   # the module's BatchNorm1d(d_in) on (B, S, d_in) requires S == d_in

    key = jax.random.PRNGKey(0)
    k_params, k1, k2, k3, k4, k5 = jax.random.split(key, 6)
    params = init_params(k_params, num_layers, d_in, feedward_dim, d_out)

    ex_ms2 = jax.random.normal(k1, (B, S, d_in, 2), jnp.float32)
    spectrum = jax.random.normal(k2, (B, 1, d_in, 2), jnp.float32)
    mask = jnp.zeros((B, S), jnp.bool_).at[1, -2:].set(True)   # pad last 2 keys of batch 1
    xic_corr = jax.random.normal(k3, (B, d_in), jnp.float32)
    ppm = jax.random.normal(k4, (B, S, d_in), jnp.float32)
    featured_ion = jax.random.normal(k5, (B, d_in), jnp.float32)

    fwd = jax.jit(functools.partial(model_forward, n_head=n_head))
    out = fwd(params, ex_ms2, spectrum, mask, xic_corr, ppm, featured_ion)
    out = jax.block_until_ready(out)
    assert out.shape == (B, d_out), out.shape
    assert bool(jnp.all(jnp.isfinite(out)))
    print("KERNEL_OK")
</pallas_src>

<mosaic_0001>
module attributes {stable_mosaic.version = 11 : i64} {
  func.func @_blend_kernel(%arg0: i32, %arg1: memref<1x1x8xf32, #tpu.memory_space<vmem>>, %arg2: memref<1x1x8xf32, #tpu.memory_space<vmem>>, %arg3: memref<1x1x8xf32, #tpu.memory_space<vmem>>, %arg4: memref<1x8x8xf32, #tpu.memory_space<vmem>>, %arg5: memref<1x8x32xf32, #tpu.memory_space<vmem>>, %arg6: memref<1x1x8xf32, #tpu.memory_space<vmem>>, %arg7: memref<8x32xf32, #tpu.memory_space<vmem>>, %arg8: memref<1x32xf32, #tpu.memory_space<vmem>>, %arg9: memref<8x32xf32, #tpu.memory_space<vmem>>, %arg10: memref<1x32xf32, #tpu.memory_space<vmem>>, %arg11: memref<8x32xf32, #tpu.memory_space<vmem>>, %arg12: memref<1x32xf32, #tpu.memory_space<vmem>>, %arg13: memref<8x32xf32, #tpu.memory_space<vmem>>, %arg14: memref<8x1xf32, #tpu.memory_space<vmem>>, %arg15: memref<8x32xf32, #tpu.memory_space<vmem>>, %arg16: memref<32x32xf32, #tpu.memory_space<vmem>>, %arg17: memref<1x32xf32, #tpu.memory_space<vmem>>, %arg18: memref<32x64xf32, #tpu.memory_space<vmem>>, %arg19: memref<1x64xf32, #tpu.memory_space<vmem>>, %arg20: memref<32x32xf32, #tpu.memory_space<vmem>>, %arg21: memref<1x32xf32, #tpu.memory_space<vmem>>, %arg22: memref<32x16xf32, #tpu.memory_space<vmem>>, %arg23: memref<1x16xf32, #tpu.memory_space<vmem>>, %arg24: memref<16x2xf32, #tpu.memory_space<vmem>>, %arg25: memref<1x2xf32, #tpu.memory_space<vmem>>, %arg26: memref<1x1x2xf32, #tpu.memory_space<vmem>>, %arg27: memref<16x32xf32, #tpu.memory_space<vmem>>) attributes {dimension_semantics = [#tpu.dimension_semantics<parallel>], iteration_bounds = array<i64: 2>, scalar_prefetch = 0 : i64, scratch_operands = 1 : i64, tpu.core_type = #tpu.core_type<tc>, window_params = [{transform_indices = @transform_0, window_bounds = array<i64: 1, 1, 8>}, {transform_indices = @transform_1, window_bounds = array<i64: 1, 1, 8>}, {transform_indices = @transform_2, window_bounds = array<i64: 1, 1, 8>}, {transform_indices = @transform_3, window_bounds = array<i64: 1, 8, 8>}, {transform_indices = @transform_4, window_bounds = array<i64: 1, 8, 32>}, {transform_indices = @transform_5, window_bounds = array<i64: 1, 1, 8>}, {pipeline_mode = #tpu.pipeline_mode<synchronous>, transform_indices = @transform_6, window_bounds = array<i64: 8, 32>}, {pipeline_mode = #tpu.pipeline_mode<synchronous>, transform_indices = @transform_7, window_bounds = array<i64: 1, 32>}, {pipeline_mode = #tpu.pipeline_mode<synchronous>, transform_indices = @transform_8, window_bounds = array<i64: 8, 32>}, {pipeline_mode = #tpu.pipeline_mode<synchronous>, transform_indices = @transform_9, window_bounds = array<i64: 1, 32>}, {pipeline_mode = #tpu.pipeline_mode<synchronous>, transform_indices = @transform_10, window_bounds = array<i64: 8, 32>}, {pipeline_mode = #tpu.pipeline_mode<synchronous>, transform_indices = @transform_11, window_bounds = array<i64: 1, 32>}, {pipeline_mode = #tpu.pipeline_mode<synchronous>, transform_indices = @transform_12, window_bounds = array<i64: 8, 32>}, {pipeline_mode = #tpu.pipeline_mode<synchronous>, transform_indices = @transform_13, window_bounds = array<i64: 8, 1>}, {pipeline_mode = #tpu.pipeline_mode<synchronous>, transform_indices = @transform_14, window_bounds = array<i64: 8, 32>}, {pipeline_mode = #tpu.pipeline_mode<synchronous>, transform_indices = @transform_15, window_bounds = array<i64: 32, 32>}, {pipeline_mode = #tpu.pipeline_mode<synchronous>, transform_indices = @transform_16, window_bounds = array<i64: 1, 32>}, {pipeline_mode = #tpu.pipeline_mode<synchronous>, transform_indices = @transform_17, window_bounds = array<i64: 32, 64>}, {pipeline_mode = #tpu.pipeline_mode<synchronous>, transform_indices = @transform_18, window_bounds = array<i64: 1, 64>}, {pipeline_mode = #tpu.pipeline_mode<synchronous>, transform_indices = @transform_19, window_bounds = array<i64: 32, 32>}, {pipeline_mode = #tpu.pipeline_mode<synchronous>, transform_indices = @transform_20, window_bounds = array<i64: 1, 32>}, {pipeline_mode = #tpu.pipeline_mode<synchronous>, transform_indices = @transform_21, window_bounds = array<i64: 32, 16>}, {pipeline_mode = #tpu.pipeline_mode<synchronous>, transform_indices = @transform_22, window_bounds = array<i64: 1, 16>}, {pipeline_mode = #tpu.pipeline_mode<synchronous>, transform_indices = @transform_23, window_bounds = array<i64: 16, 2>}, {pipeline_mode = #tpu.pipeline_mode<synchronous>, transform_indices = @transform_24, window_bounds = array<i64: 1, 2>}, {transform_indices = @transform_25, window_bounds = array<i64: 1, 1, 2>}]} {
    %c0 = arith.constant 0 : index
    %c0_0 = arith.constant 0 : index
    %c0_1 = arith.constant 0 : index
    %0 = vector.load %arg1[%c0, %c0_0, %c0_1] : memref<1x1x8xf32, #tpu.memory_space<vmem>>, vector<1x1x8xf32>
    %1 = vector.shape_cast %0 : vector<1x1x8xf32> to vector<1x8xf32>
    %c0_2 = arith.constant 0 : index
    %c0_3 = arith.constant 0 : index
    %2 = vector.load %arg7[%c0_2, %c0_3] : memref<8x32xf32, #tpu.memory_space<vmem>>, vector<8x32xf32>
    %3 = arith.truncf %1 : vector<1x8xf32> to vector<1x8xbf16>
    %4 = arith.truncf %2 : vector<8x32xf32> to vector<8x32xbf16>
    %cst = arith.constant dense<0.000000e+00> : vector<1x32xf32>
    %5 = tpu.matmul %3, %4, %cst {dimension_numbers = #tpu.dot_dimension_numbers<[1], [0], [0], [1], [0, 0, 1, 1], [], []>} : vector<1x8xbf16>, vector<8x32xbf16>, vector<1x32xf32> -> vector<1x32xf32>
    %c0_4 = arith.constant 0 : index
    %c0_5 = arith.constant 0 : index
    %6 = vector.load %arg8[%c0_4, %c0_5] : memref<1x32xf32, #tpu.memory_space<vmem>>, vector<1x32xf32>
    %7 = arith.addf %5, %6 : vector<1x32xf32>
    %cst_6 = arith.constant 0.000000e+00 : f32
    %8 = vector.broadcast %cst_6 : f32 to vector<1x32xf32>
    %9 = arith.cmpf ogt, %7, %8 : vector<1x32xf32>
    %10 = math.exp %7 : vector<1x32xf32>
    %cst_7 = arith.constant 1.000000e+00 : f32
    %11 = vector.broadcast %cst_7 : f32 to vector<1x32xf32>
    %12 = arith.subf %10, %11 : vector<1x32xf32>
    %cst_8 = arith.constant 1.67326319 : f32
    %13 = vector.broadcast %cst_8 : f32 to vector<1x32xf32>
    %14 = arith.mulf %13, %12 : vector<1x32xf32>
    %15 = arith.select %9, %7, %14 : vector<1x32xi1>, vector<1x32xf32>
    %cst_9 = arith.constant 1.05070102 : f32
    %16 = vector.broadcast %cst_9 : f32 to vector<1x32xf32>
    %17 = arith.mulf %16, %15 : vector<1x32xf32>
    %c0_10 = arith.constant 0 : index
    %c0_11 = arith.constant 0 : index
    %c0_12 = arith.constant 0 : index
    %18 = vector.load %arg2[%c0_10, %c0_11, %c0_12] : memref<1x1x8xf32, #tpu.memory_space<vmem>>, vector<1x1x8xf32>
    %19 = vector.shape_cast %18 : vector<1x1x8xf32> to vector<1x8xf32>
    %c0_13 = arith.constant 0 : index
    %c0_14 = arith.constant 0 : index
    %20 = vector.load %arg9[%c0_13, %c0_14] : memref<8x32xf32, #tpu.memory_space<vmem>>, vector<8x32xf32>
    %21 = arith.truncf %19 : vector<1x8xf32> to vector<1x8xbf16>
    %22 = arith.truncf %20 : vector<8x32xf32> to vector<8x32xbf16>
    %cst_15 = arith.constant dense<0.000000e+00> : vector<1x32xf32>
    %23 = tpu.matmul %21, %22, %cst_15 {dimension_numbers = #tpu.dot_dimension_numbers<[1], [0], [0], [1], [0, 0, 1, 1], [], []>} : vector<1x8xbf16>, vector<8x32xbf16>, vector<1x32xf32> -> vector<1x32xf32>
    %c0_16 = arith.constant 0 : index
    %c0_17 = arith.constant 0 : index
    %24 = vector.load %arg10[%c0_16, %c0_17] : memref<1x32xf32, #tpu.memory_space<vmem>>, vector<1x32xf32>
    %25 = arith.addf %23, %24 : vector<1x32xf32>
    %cst_18 = arith.constant 0.000000e+00 : f32
    %26 = vector.broadcast %cst_18 : f32 to vector<1x32xf32>
    %27 = arith.cmpf ogt, %25, %26 : vector<1x32xf32>
    %28 = math.exp %25 : vector<1x32xf32>
    %cst_19 = arith.constant 1.000000e+00 : f32
    %29 = vector.broadcast %cst_19 : f32 to vector<1x32xf32>
    %30 = arith.subf %28, %29 : vector<1x32xf32>
    %cst_20 = arith.constant 1.67326319 : f32
    %31 = vector.broadcast %cst_20 : f32 to vector<1x32xf32>
    %32 = arith.mulf %31, %30 : vector<1x32xf32>
    %33 = arith.select %27, %25, %32 : vector<1x32xi1>, vector<1x32xf32>
    %cst_21 = arith.constant 1.05070102 : f32
    %34 = vector.broadcast %cst_21 : f32 to vector<1x32xf32>
    %35 = arith.mulf %34, %33 : vector<1x32xf32>
    %c0_22 = arith.constant 0 : index
    %c0_23 = arith.constant 0 : index
    %c0_24 = arith.constant 0 : index
    %36 = vector.load %arg3[%c0_22, %c0_23, %c0_24] : memref<1x1x8xf32, #tpu.memory_space<vmem>>, vector<1x1x8xf32>
    %37 = vector.shape_cast %36 : vector<1x1x8xf32> to vector<1x8xf32>
    %c0_25 = arith.constant 0 : index
    %c0_26 = arith.constant 0 : index
    %38 = vector.load %arg11[%c0_25, %c0_26] : memref<8x32xf32, #tpu.memory_space<vmem>>, vector<8x32xf32>
    %39 = arith.truncf %37 : vector<1x8xf32> to vector<1x8xbf16>
    %40 = arith.truncf %38 : vector<8x32xf32> to vector<8x32xbf16>
    %cst_27 = arith.constant dense<0.000000e+00> : vector<1x32xf32>
    %41 = tpu.matmul %39, %40, %cst_27 {dimension_numbers = #tpu.dot_dimension_numbers<[1], [0], [0], [1], [0, 0, 1, 1], [], []>} : vector<1x8xbf16>, vector<8x32xbf16>, vector<1x32xf32> -> vector<1x32xf32>
    %c0_28 = arith.constant 0 : index
    %c0_29 = arith.constant 0 : index
    %42 = vector.load %arg12[%c0_28, %c0_29] : memref<1x32xf32, #tpu.memory_space<vmem>>, vector<1x32xf32>
    %43 = arith.addf %41, %42 : vector<1x32xf32>
    %cst_30 = arith.constant 0.000000e+00 : f32
    %44 = vector.broadcast %cst_30 : f32 to vector<1x32xf32>
    %45 = arith.cmpf ogt, %43, %44 : vector<1x32xf32>
    %46 = math.exp %43 : vector<1x32xf32>
    %cst_31 = arith.constant 1.000000e+00 : f32
    %47 = vector.broadcast %cst_31 : f32 to vector<1x32xf32>
    %48 = arith.subf %46, %47 : vector<1x32xf32>
    %cst_32 = arith.constant 1.67326319 : f32
    %49 = vector.broadcast %cst_32 : f32 to vector<1x32xf32>
    %50 = arith.mulf %49, %48 : vector<1x32xf32>
    %51 = arith.select %45, %43, %50 : vector<1x32xi1>, vector<1x32xf32>
    %cst_33 = arith.constant 1.05070102 : f32
    %52 = vector.broadcast %cst_33 : f32 to vector<1x32xf32>
    %53 = arith.mulf %52, %51 : vector<1x32xf32>
    %54 = tpu.iota {dimensions = array<i32: 0>} : vector<8x1xi32>
    %c0_i32 = arith.constant 0 : i32
    %55 = vector.broadcast %c0_i32 : i32 to vector<8x1xi32>
    %56 = arith.cmpi eq, %54, %55 : vector<8x1xi32>
    %cst_34 = arith.constant 0.000000e+00 : f32
    %57 = vector.shape_cast %56 : vector<8x1xi1> to vector<8x1xi1>
    %58 = vector.broadcast %57 : vector<8x1xi1> to vector<8x32xi1>
    %59 = vector.shape_cast %17 : vector<1x32xf32> to vector<1x32xf32>
    %60 = vector.broadcast %59 : vector<1x32xf32> to vector<8x32xf32>
    %61 = vector.broadcast %cst_34 : f32 to vector<8x32xf32>
    %62 = arith.select %58, %60, %61 : vector<8x32xi1>, vector<8x32xf32>
    %c1_i32 = arith.constant 1 : i32
    %63 = vector.broadcast %c1_i32 : i32 to vector<8x1xi32>
    %64 = arith.cmpi eq, %54, %63 : vector<8x1xi32>
    %cst_35 = arith.constant 0.000000e+00 : f32
    %65 = vector.shape_cast %64 : vector<8x1xi1> to vector<8x1xi1>
    %66 = vector.broadcast %65 : vector<8x1xi1> to vector<8x32xi1>
    %67 = vector.shape_cast %35 : vector<1x32xf32> to vector<1x32xf32>
    %68 = vector.broadcast %67 : vector<1x32xf32> to vector<8x32xf32>
    %69 = vector.broadcast %cst_35 : f32 to vector<8x32xf32>
    %70 = arith.select %66, %68, %69 : vector<8x32xi1>, vector<8x32xf32>
    %71 = arith.addf %62, %70 : vector<8x32xf32>
    %c2_i32 = arith.constant 2 : i32
    %72 = vector.broadcast %c2_i32 : i32 to vector<8x1xi32>
    %73 = arith.cmpi eq, %54, %72 : vector<8x1xi32>
    %cst_36 = arith.constant 0.000000e+00 : f32
    %74 = vector.shape_cast %73 : vector<8x1xi1> to vector<8x1xi1>
    %75 = vector.broadcast %74 : vector<8x1xi1> to vector<8x32xi1>
    %76 = vector.shape_cast %53 : vector<1x32xf32> to vector<1x32xf32>
    %77 = vector.broadcast %76 : vector<1x32xf32> to vector<8x32xf32>
    %78 = vector.broadcast %cst_36 : f32 to vector<8x32xf32>
    %79 = arith.select %75, %77, %78 : vector<8x32xi1>, vector<8x32xf32>
    %80 = arith.addf %71, %79 : vector<8x32xf32>
    %c0_37 = arith.constant 0 : index
    %c0_38 = arith.constant 0 : index
    %81 = vector.load %arg27[%c0_37, %c0_38] : memref<16x32xf32, #tpu.memory_space<vmem>>, vector<8x32xf32>
    tpu.vector_store %arg27[%c0_37, %c0_38], %80 {strides = array<i32>} : memref<16x32xf32, #tpu.memory_space<vmem>>, vector<8x32xf32>,
    %c0_39 = arith.constant 0 : index
    %c0_40 = arith.constant 0 : index
    %c0_41 = arith.constant 0 : index
    %82 = vector.load %arg4[%c0_39, %c0_40, %c0_41] : memref<1x8x8xf32, #tpu.memory_space<vmem>>, vector<1x8x8xf32>
    %83 = vector.shape_cast %82 : vector<1x8x8xf32> to vector<8x8xf32>
    %c0_42 = arith.constant 0 : index
    %c0_43 = arith.constant 0 : index
    %84 = vector.load %arg13[%c0_42, %c0_43] : memref<8x32xf32, #tpu.memory_space<vmem>>, vector<8x32xf32>
    %85 = arith.truncf %83 : vector<8x8xf32> to vector<8x8xbf16>
    %86 = arith.truncf %84 : vector<8x32xf32> to vector<8x32xbf16>
    %cst_44 = arith.constant dense<0.000000e+00> : vector<8x32xf32>
    %87 = tpu.matmul %85, %86, %cst_44 {dimension_numbers = #tpu.dot_dimension_numbers<[1], [0], [0], [1], [0, 0, 1, 1], [], []>} : vector<8x8xbf16>, vector<8x32xbf16>, vector<8x32xf32> -> vector<8x32xf32>
    %c0_45 = arith.constant 0 : index
    %c0_46 = arith.constant 0 : index
    %88 = vector.load %arg14[%c0_45, %c0_46] : memref<8x1xf32, #tpu.memory_space<vmem>>, vector<8x1xf32>
    %89 = vector.broadcast %88 : vector<8x1xf32> to vector<8x32xf32>
    %90 = arith.mulf %87, %89 : vector<8x32xf32>
    %c0_47 = arith.constant 0 : index
    %c0_48 = arith.constant 0 : index
    %91 = vector.load %arg15[%c0_47, %c0_48] : memref<8x32xf32, #tpu.memory_space<vmem>>, vector<8x32xf32>
    %92 = arith.addf %90, %91 : vector<8x32xf32>
    %cst_49 = arith.constant 0.000000e+00 : f32
    %93 = vector.broadcast %cst_49 : f32 to vector<8x32xf32>
    %94 = arith.cmpf ogt, %92, %93 : vector<8x32xf32>
    %95 = math.exp %92 : vector<8x32xf32>
    %cst_50 = arith.constant 1.000000e+00 : f32
    %96 = vector.broadcast %cst_50 : f32 to vector<8x32xf32>
    %97 = arith.subf %95, %96 : vector<8x32xf32>
    %cst_51 = arith.constant 1.67326319 : f32
    %98 = vector.broadcast %cst_51 : f32 to vector<8x32xf32>
    %99 = arith.mulf %98, %97 : vector<8x32xf32>
    %100 = arith.select %94, %92, %99 : vector<8x32xi1>, vector<8x32xf32>
    %cst_52 = arith.constant 1.05070102 : f32
    %101 = vector.broadcast %cst_52 : f32 to vector<8x32xf32>
    %102 = arith.mulf %101, %100 : vector<8x32xf32>
    %c8 = arith.constant 8 : index
    %c0_53 = arith.constant 0 : index
    %103 = vector.load %arg27[%c8, %c0_53] : memref<16x32xf32, #tpu.memory_space<vmem>>, vector<8x32xf32>
    tpu.vector_store %arg27[%c8, %c0_53], %102 {strides = array<i32>} : memref<16x32xf32, #tpu.memory_space<vmem>>, vector<8x32xf32>,
    %c0_54 = arith.constant 0 : index
    %c0_55 = arith.constant 0 : index
    %104 = vector.load %arg27[%c0_54, %c0_55] : memref<16x32xf32, #tpu.memory_space<vmem>>, vector<16x32xf32>
    %c0_56 = arith.constant 0 : index
    %c0_57 = arith.constant 0 : index
    %105 = vector.load %arg16[%c0_56, %c0_57] : memref<32x32xf32, #tpu.memory_space<vmem>>, vector<32x32xf32>
    %106 = arith.truncf %104 : vector<16x32xf32> to vector<16x32xbf16>
    %107 = arith.truncf %105 : vector<32x32xf32> to vector<32x32xbf16>
    %cst_58 = arith.constant dense<0.000000e+00> : vector<16x32xf32>
    %108 = tpu.matmul %106, %107, %cst_58 {dimension_numbers = #tpu.dot_dimension_numbers<[1], [0], [0], [1], [0, 0, 1, 1], [], []>} : vector<16x32xbf16>, vector<32x32xbf16>, vector<16x32xf32> -> vector<16x32xf32>
    %c0_59 = arith.constant 0 : index
    %c0_60 = arith.constant 0 : index
    %109 = vector.load %arg17[%c0_59, %c0_60] : memref<1x32xf32, #tpu.memory_space<vmem>>, vector<1x32xf32>
    %110 = vector.broadcast %109 : vector<1x32xf32> to vector<16x32xf32>
    %111 = arith.addf %108, %110 : vector<16x32xf32>
    %c0_61 = arith.constant 0 : index
    %c0_62 = arith.constant 0 : index
    %c0_63 = arith.constant 0 : index
    %112 = vector.load %arg5[%c0_61, %c0_62, %c0_63] : memref<1x8x32xf32, #tpu.memory_space<vmem>>, vector<1x8x32xf32>
    %113 = vector.shape_cast %112 : vector<1x8x32xf32> to vector<8x32xf32>
    %c0_64 = arith.constant 0 : index
    %c0_65 = arith.constant 0 : index
    %114 = vector.load %arg18[%c0_64, %c0_65] : memref<32x64xf32, #tpu.memory_space<vmem>>, vector<32x64xf32>
    %115 = arith.truncf %113 : vector<8x32xf32> to vector<8x32xbf16>
    %116 = arith.truncf %114 : vector<32x64xf32> to vector<32x64xbf16>
    %cst_66 = arith.constant dense<0.000000e+00> : vector<8x64xf32>
    %117 = tpu.matmul %115, %116, %cst_66 {dimension_numbers = #tpu.dot_dimension_numbers<[1], [0], [0], [1], [0, 0, 1, 1], [], []>} : vector<8x32xbf16>, vector<32x64xbf16>, vector<8x64xf32> -> vector<8x64xf32>
    %c0_67 = arith.constant 0 : index
    %c0_68 = arith.constant 0 : index
    %118 = vector.load %arg19[%c0_67, %c0_68] : memref<1x64xf32, #tpu.memory_space<vmem>>, vector<1x64xf32>
    %119 = vector.broadcast %118 : vector<1x64xf32> to vector<8x64xf32>
    %120 = arith.addf %117, %119 : vector<8x64xf32>
    %121 = vector.extract_strided_slice %120 {offsets = [0, 0], sizes = [8, 32], strides = [1, 1]} : vector<8x64xf32> to vector<8x32xf32>
    %122 = vector.extract_strided_slice %120 {offsets = [0, 32], sizes = [8, 32], strides = [1, 1]} : vector<8x64xf32> to vector<8x32xf32>
    %c0_69 = arith.constant 0 : index
    %c0_70 = arith.constant 0 : index
    %c0_71 = arith.constant 0 : index
    %123 = vector.load %arg6[%c0_69, %c0_70, %c0_71] : memref<1x1x8xf32, #tpu.memory_space<vmem>>, vector<1x1x8xf32>
    %124 = vector.shape_cast %123 : vector<1x1x8xf32> to vector<1x8xf32>
    %c0_72 = arith.constant 0 : index
    %c0_73 = arith.constant 0 : index
    %125 = vector.load %arg20[%c0_72, %c0_73] : memref<32x32xf32, #tpu.memory_space<vmem>>, vector<32x32xf32>
    %c0_74 = arith.constant 0 : index
    %c0_75 = arith.constant 0 : index
    %126 = vector.load %arg21[%c0_74, %c0_75] : memref<1x32xf32, #tpu.memory_space<vmem>>, vector<1x32xf32>
    %127 = tpu.iota {dimensions = array<i32: 1>} : vector<1x32xi32>
    %cst_76 = arith.constant 0.000000e+00 : f32
    %128 = vector.broadcast %cst_76 : f32 to vector<16x32xf32>
    %c0_i32_77 = arith.constant 0 : i32
    %129 = vector.broadcast %c0_i32_77 : i32 to vector<1x32xi32>
    %130 = arith.cmpi sge, %127, %129 : vector<1x32xi32>
    %c8_i32 = arith.constant 8 : i32
    %131 = vector.broadcast %c8_i32 : i32 to vector<1x32xi32>
    %132 = arith.cmpi slt, %127, %131 : vector<1x32xi32>
    %133 = arith.andi %130, %132 : vector<1x32xi1>
    %134 = arith.extui %133 : vector<1x32xi1> to vector<1x32xi32>
    %135 = arith.sitofp %134 : vector<1x32xi32> to vector<1x32xf32>
    %136 = vector.broadcast %135 : vector<1x32xf32> to vector<16x32xf32>
    %137 = arith.mulf %111, %136 : vector<16x32xf32>
    %138 = arith.truncf %137 : vector<16x32xf32> to vector<16x32xbf16>
    %139 = arith.truncf %121 : vector<8x32xf32> to vector<8x32xbf16>
    %cst_78 = arith.constant dense<0.000000e+00> : vector<16x8xf32>
    %140 = tpu.matmul %138, %139, %cst_78 {dimension_numbers = #tpu.dot_dimension_numbers<[1], [1], [0], [0], [0, 0, 1, 0], [], []>} : vector<16x32xbf16>, vector<8x32xbf16>, vector<16x8xf32> -> vector<16x8xf32>
    %cst_79 = arith.constant 0.353553385 : f32
    %141 = vector.broadcast %cst_79 : f32 to vector<16x8xf32>
    %142 = arith.mulf %140, %141 : vector<16x8xf32>
    %143 = vector.broadcast %124 : vector<1x8xf32> to vector<16x8xf32>
    %144 = arith.addf %142, %143 : vector<16x8xf32>
    %cst_80 = arith.constant dense<0xFF800000> : vector<16xf32>
    %145 = vector.multi_reduction <maximumf>, %144, %cst_80 [1] : vector<16x8xf32> to vector<16xf32>
    %146 = vector.shape_cast %145 : vector<16xf32> to vector<16x1xf32>
    %147 = vector.broadcast %146 : vector<16x1xf32> to vector<16x8xf32>
    %148 = arith.subf %144, %147 : vector<16x8xf32>
    %149 = math.exp %148 : vector<16x8xf32>
    %cst_81 = arith.constant dense<0.000000e+00> : vector<16xf32>
    %150 = vector.multi_reduction <add>, %149, %cst_81 [1] : vector<16x8xf32> to vector<16xf32>
    %151 = vector.shape_cast %150 : vector<16xf32> to vector<16x1xf32>
    %152 = tpu.reciprocal %151 {approx = true} : vector<16x1xf32> -> vector<16x1xf32>
    %153 = vector.broadcast %152 : vector<16x1xf32> to vector<16x8xf32>
    %154 = arith.mulf %149, %153 : vector<16x8xf32>
    %155 = arith.truncf %154 : vector<16x8xf32> to vector<16x8xbf16>
    %156 = arith.truncf %122 : vector<8x32xf32> to vector<8x32xbf16>
    %cst_82 = arith.constant dense<0.000000e+00> : vector<16x32xf32>
    %157 = tpu.matmul %155, %156, %cst_82 {dimension_numbers = #tpu.dot_dimension_numbers<[1], [0], [0], [1], [0, 0, 1, 1], [], []>} : vector<16x8xbf16>, vector<8x32xbf16>, vector<16x32xf32> -> vector<16x32xf32>
    %158 = vector.broadcast %135 : vector<1x32xf32> to vector<16x32xf32>
    %159 = arith.mulf %157, %158 : vector<16x32xf32>
    %160 = arith.addf %128, %159 : vector<16x32xf32>
    %c8_i32_83 = arith.constant 8 : i32
    %161 = vector.broadcast %c8_i32_83 : i32 to vector<1x32xi32>
    %162 = arith.cmpi sge, %127, %161 : vector<1x32xi32>
    %c16_i32 = arith.constant 16 : i32
    %163 = vector.broadcast %c16_i32 : i32 to vector<1x32xi32>
    %164 = arith.cmpi slt, %127, %163 : vector<1x32xi32>
    %165 = arith.andi %162, %164 : vector<1x32xi1>
    %166 = arith.extui %165 : vector<1x32xi1> to vector<1x32xi32>
    %167 = arith.sitofp %166 : vector<1x32xi32> to vector<1x32xf32>
    %168 = vector.broadcast %167 : vector<1x32xf32> to vector<16x32xf32>
    %169 = arith.mulf %111, %168 : vector<16x32xf32>
    %170 = arith.truncf %169 : vector<16x32xf32> to vector<16x32xbf16>
    %171 = arith.truncf %121 : vector<8x32xf32> to vector<8x32xbf16>
    %cst_84 = arith.constant dense<0.000000e+00> : vector<16x8xf32>
    %172 = tpu.matmul %170, %171, %cst_84 {dimension_numbers = #tpu.dot_dimension_numbers<[1], [1], [0], [0], [0, 0, 1, 0], [], []>} : vector<16x32xbf16>, vector<8x32xbf16>, vector<16x8xf32> -> vector<16x8xf32>
    %cst_85 = arith.constant 0.353553385 : f32
    %173 = vector.broadcast %cst_85 : f32 to vector<16x8xf32>
    %174 = arith.mulf %172, %173 : vector<16x8xf32>
    %175 = vector.broadcast %124 : vector<1x8xf32> to vector<16x8xf32>
    %176 = arith.addf %174, %175 : vector<16x8xf32>
    %cst_86 = arith.constant dense<0xFF800000> : vector<16xf32>
    %177 = vector.multi_reduction <maximumf>, %176, %cst_86 [1] : vector<16x8xf32> to vector<16xf32>
    %178 = vector.shape_cast %177 : vector<16xf32> to vector<16x1xf32>
    %179 = vector.broadcast %178 : vector<16x1xf32> to vector<16x8xf32>
    %180 = arith.subf %176, %179 : vector<16x8xf32>
    %181 = math.exp %180 : vector<16x8xf32>
    %cst_87 = arith.constant dense<0.000000e+00> : vector<16xf32>
    %182 = vector.multi_reduction <add>, %181, %cst_87 [1] : vector<16x8xf32> to vector<16xf32>
    %183 = vector.shape_cast %182 : vector<16xf32> to vector<16x1xf32>
    %184 = tpu.reciprocal %183 {approx = true} : vector<16x1xf32> -> vector<16x1xf32>
    %185 = vector.broadcast %184 : vector<16x1xf32> to vector<16x8xf32>
    %186 = arith.mulf %181, %185 : vector<16x8xf32>
    %187 = arith.truncf %186 : vector<16x8xf32> to vector<16x8xbf16>
    %188 = arith.truncf %122 : vector<8x32xf32> to vector<8x32xbf16>
    %cst_88 = arith.constant dense<0.000000e+00> : vector<16x32xf32>
    %189 = tpu.matmul %187, %188, %cst_88 {dimension_numbers = #tpu.dot_dimension_numbers<[1], [0], [0], [1], [0, 0, 1, 1], [], []>} : vector<16x8xbf16>, vector<8x32xbf16>, vector<16x32xf32> -> vector<16x32xf32>
    %190 = vector.broadcast %167 : vector<1x32xf32> to vector<16x32xf32>
    %191 = arith.mulf %189, %190 : vector<16x32xf32>
    %192 = arith.addf %160, %191 : vector<16x32xf32>
    %c16_i32_89 = arith.constant 16 : i32
    %193 = vector.broadcast %c16_i32_89 : i32 to vector<1x32xi32>
    %194 = arith.cmpi sge, %127, %193 : vector<1x32xi32>
    %c24_i32 = arith.constant 24 : i32
    %195 = vector.broadcast %c24_i32 : i32 to vector<1x32xi32>
    %196 = arith.cmpi slt, %127, %195 : vector<1x32xi32>
    %197 = arith.andi %194, %196 : vector<1x32xi1>
    %198 = arith.extui %197 : vector<1x32xi1> to vector<1x32xi32>
    %199 = arith.sitofp %198 : vector<1x32xi32> to vector<1x32xf32>
    %200 = vector.broadcast %199 : vector<1x32xf32> to vector<16x32xf32>
    %201 = arith.mulf %111, %200 : vector<16x32xf32>
    %202 = arith.truncf %201 : vector<16x32xf32> to vector<16x32xbf16>
    %203 = arith.truncf %121 : vector<8x32xf32> to vector<8x32xbf16>
    %cst_90 = arith.constant dense<0.000000e+00> : vector<16x8xf32>
    %204 = tpu.matmul %202, %203, %cst_90 {dimension_numbers = #tpu.dot_dimension_numbers<[1], [1], [0], [0], [0, 0, 1, 0], [], []>} : vector<16x32xbf16>, vector<8x32xbf16>, vector<16x8xf32> -> vector<16x8xf32>
    %cst_91 = arith.constant 0.353553385 : f32
    %205 = vector.broadcast %cst_91 : f32 to vector<16x8xf32>
    %206 = arith.mulf %204, %205 : vector<16x8xf32>
    %207 = vector.broadcast %124 : vector<1x8xf32> to vector<16x8xf32>
    %208 = arith.addf %206, %207 : vector<16x8xf32>
    %cst_92 = arith.constant dense<0xFF800000> : vector<16xf32>
    %209 = vector.multi_reduction <maximumf>, %208, %cst_92 [1] : vector<16x8xf32> to vector<16xf32>
    %210 = vector.shape_cast %209 : vector<16xf32> to vector<16x1xf32>
    %211 = vector.broadcast %210 : vector<16x1xf32> to vector<16x8xf32>
    %212 = arith.subf %208, %211 : vector<16x8xf32>
    %213 = math.exp %212 : vector<16x8xf32>
    %cst_93 = arith.constant dense<0.000000e+00> : vector<16xf32>
    %214 = vector.multi_reduction <add>, %213, %cst_93 [1] : vector<16x8xf32> to vector<16xf32>
    %215 = vector.shape_cast %214 : vector<16xf32> to vector<16x1xf32>
    %216 = tpu.reciprocal %215 {approx = true} : vector<16x1xf32> -> vector<16x1xf32>
    %217 = vector.broadcast %216 : vector<16x1xf32> to vector<16x8xf32>
    %218 = arith.mulf %213, %217 : vector<16x8xf32>
    %219 = arith.truncf %218 : vector<16x8xf32> to vector<16x8xbf16>
    %220 = arith.truncf %122 : vector<8x32xf32> to vector<8x32xbf16>
    %cst_94 = arith.constant dense<0.000000e+00> : vector<16x32xf32>
    %221 = tpu.matmul %219, %220, %cst_94 {dimension_numbers = #tpu.dot_dimension_numbers<[1], [0], [0], [1], [0, 0, 1, 1], [], []>} : vector<16x8xbf16>, vector<8x32xbf16>, vector<16x32xf32> -> vector<16x32xf32>
    %222 = vector.broadcast %199 : vector<1x32xf32> to vector<16x32xf32>
    %223 = arith.mulf %221, %222 : vector<16x32xf32>
    %224 = arith.addf %192, %223 : vector<16x32xf32>
    %c24_i32_95 = arith.constant 24 : i32
    %225 = vector.broadcast %c24_i32_95 : i32 to vector<1x32xi32>
    %226 = arith.cmpi sge, %127, %225 : vector<1x32xi32>
    %c32_i32 = arith.constant 32 : i32
    %227 = vector.broadcast %c32_i32 : i32 to vector<1x32xi32>
    %228 = arith.cmpi slt, %127, %227 : vector<1x32xi32>
    %229 = arith.andi %226, %228 : vector<1x32xi1>
    %230 = arith.extui %229 : vector<1x32xi1> to vector<1x32xi32>
    %231 = arith.sitofp %230 : vector<1x32xi32> to vector<1x32xf32>
    %232 = vector.broadcast %231 : vector<1x32xf32> to vector<16x32xf32>
    %233 = arith.mulf %111, %232 : vector<16x32xf32>
    %234 = arith.truncf %233 : vector<16x32xf32> to vector<16x32xbf16>
    %235 = arith.truncf %121 : vector<8x32xf32> to vector<8x32xbf16>
    %cst_96 = arith.constant dense<0.000000e+00> : vector<16x8xf32>
    %236 = tpu.matmul %234, %235, %cst_96 {dimension_numbers = #tpu.dot_dimension_numbers<[1], [1], [0], [0], [0, 0, 1, 0], [], []>} : vector<16x32xbf16>, vector<8x32xbf16>, vector<16x8xf32> -> vector<16x8xf32>
    %cst_97 = arith.constant 0.353553385 : f32
    %237 = vector.broadcast %cst_97 : f32 to vector<16x8xf32>
    %238 = arith.mulf %236, %237 : vector<16x8xf32>
    %239 = vector.broadcast %124 : vector<1x8xf32> to vector<16x8xf32>
    %240 = arith.addf %238, %239 : vector<16x8xf32>
    %cst_98 = arith.constant dense<0xFF800000> : vector<16xf32>
    %241 = vector.multi_reduction <maximumf>, %240, %cst_98 [1] : vector<16x8xf32> to vector<16xf32>
    %242 = vector.shape_cast %241 : vector<16xf32> to vector<16x1xf32>
    %243 = vector.broadcast %242 : vector<16x1xf32> to vector<16x8xf32>
    %244 = arith.subf %240, %243 : vector<16x8xf32>
    %245 = math.exp %244 : vector<16x8xf32>
    %cst_99 = arith.constant dense<0.000000e+00> : vector<16xf32>
    %246 = vector.multi_reduction <add>, %245, %cst_99 [1] : vector<16x8xf32> to vector<16xf32>
    %247 = vector.shape_cast %246 : vector<16xf32> to vector<16x1xf32>
    %248 = tpu.reciprocal %247 {approx = true} : vector<16x1xf32> -> vector<16x1xf32>
    %249 = vector.broadcast %248 : vector<16x1xf32> to vector<16x8xf32>
    %250 = arith.mulf %245, %249 : vector<16x8xf32>
    %251 = arith.truncf %250 : vector<16x8xf32> to vector<16x8xbf16>
    %252 = arith.truncf %122 : vector<8x32xf32> to vector<8x32xbf16>
    %cst_100 = arith.constant dense<0.000000e+00> : vector<16x32xf32>
    %253 = tpu.matmul %251, %252, %cst_100 {dimension_numbers = #tpu.dot_dimension_numbers<[1], [0], [0], [1], [0, 0, 1, 1], [], []>} : vector<16x8xbf16>, vector<8x32xbf16>, vector<16x32xf32> -> vector<16x32xf32>
    %254 = vector.broadcast %231 : vector<1x32xf32> to vector<16x32xf32>
    %255 = arith.mulf %253, %254 : vector<16x32xf32>
    %256 = arith.addf %224, %255 : vector<16x32xf32>
    %257 = arith.truncf %256 : vector<16x32xf32> to vector<16x32xbf16>
    %258 = arith.truncf %125 : vector<32x32xf32> to vector<32x32xbf16>
    %cst_101 = arith.constant dense<0.000000e+00> : vector<16x32xf32>
    %259 = tpu.matmul %257, %258, %cst_101 {dimension_numbers = #tpu.dot_dimension_numbers<[1], [0], [0], [1], [0, 0, 1, 1], [], []>} : vector<16x32xbf16>, vector<32x32xbf16>, vector<16x32xf32> -> vector<16x32xf32>
    %260 = vector.broadcast %126 : vector<1x32xf32> to vector<16x32xf32>
    %261 = arith.addf %259, %260 : vector<16x32xf32>
    %262 = tpu.iota {dimensions = array<i32: 1>} : vector<1x16xi32>
    %c3_i32 = arith.constant 3 : i32
    %263 = vector.broadcast %c3_i32 : i32 to vector<1x16xi32>
    %264 = arith.cmpi slt, %262, %263 : vector<1x16xi32>
    %c8_i32_102 = arith.constant 8 : i32
    %265 = vector.broadcast %c8_i32_102 : i32 to vector<1x16xi32>
    %266 = arith.cmpi sge, %262, %265 : vector<1x16xi32>
    %267 = arith.ori %264, %266 : vector<1x16xi1>
    %cst_103 = arith.constant 0.0909090936 : f32
    %cst_104 = arith.constant 0.000000e+00 : f32
    %268 = vector.broadcast %cst_103 : f32 to vector<1x16xf32>
    %269 = vector.broadcast %cst_104 : f32 to vector<1x16xf32>
    %270 = arith.select %267, %268, %269 : vector<1x16xi1>, vector<1x16xf32>
    %cst_105 = arith.constant dense<0.000000e+00> : vector<1x32xf32>
    %271 = tpu.matmul %270, %261, %cst_105 {dimension_numbers = #tpu.dot_dimension_numbers<[1], [0], [0], [1], [0, 0, 1, 1], [], []>} : vector<1x16xf32>, vector<16x32xf32>, vector<1x32xf32> -> vector<1x32xf32>
    %c0_106 = arith.constant 0 : index
    %c0_107 = arith.constant 0 : index
    %272 = vector.load %arg22[%c0_106, %c0_107] : memref<32x16xf32, #tpu.memory_space<vmem>>, vector<32x16xf32>
    %273 = arith.truncf %271 : vector<1x32xf32> to vector<1x32xbf16>
    %274 = arith.truncf %272 : vector<32x16xf32> to vector<32x16xbf16>
    %cst_108 = arith.constant dense<0.000000e+00> : vector<1x16xf32>
    %275 = tpu.matmul %273, %274, %cst_108 {dimension_numbers = #tpu.dot_dimension_numbers<[1], [0], [0], [1], [0, 0, 1, 1], [], []>} : vector<1x32xbf16>, vector<32x16xbf16>, vector<1x16xf32> -> vector<1x16xf32>
    %c0_109 = arith.constant 0 : index
    %c0_110 = arith.constant 0 : index
    %276 = vector.load %arg23[%c0_109, %c0_110] : memref<1x16xf32, #tpu.memory_space<vmem>>, vector<1x16xf32>
    %277 = arith.addf %275, %276 : vector<1x16xf32>
    %cst_111 = arith.constant 0.000000e+00 : f32
    %278 = vector.broadcast %cst_111 : f32 to vector<1x16xf32>
    %279 = arith.cmpf ogt, %277, %278 : vector<1x16xf32>
    %280 = math.exp %277 : vector<1x16xf32>
    %cst_112 = arith.constant 1.000000e+00 : f32
    %281 = vector.broadcast %cst_112 : f32 to vector<1x16xf32>
    %282 = arith.subf %280, %281 : vector<1x16xf32>
    %cst_113 = arith.constant 1.67326319 : f32
    %283 = vector.broadcast %cst_113 : f32 to vector<1x16xf32>
    %284 = arith.mulf %283, %282 : vector<1x16xf32>
    %285 = arith.select %279, %277, %284 : vector<1x16xi1>, vector<1x16xf32>
    %cst_114 = arith.constant 1.05070102 : f32
    %286 = vector.broadcast %cst_114 : f32 to vector<1x16xf32>
    %287 = arith.mulf %286, %285 : vector<1x16xf32>
    %c0_115 = arith.constant 0 : index
    %c0_116 = arith.constant 0 : index
    %288 = vector.load %arg24[%c0_115, %c0_116] : memref<16x2xf32, #tpu.memory_space<vmem>>, vector<16x2xf32>
    %289 = arith.truncf %287 : vector<1x16xf32> to vector<1x16xbf16>
    %290 = arith.truncf %288 : vector<16x2xf32> to vector<16x2xbf16>
    %cst_117 = arith.constant dense<0.000000e+00> : vector<1x2xf32>
    %291 = tpu.matmul %289, %290, %cst_117 {dimension_numbers = #tpu.dot_dimension_numbers<[1], [0], [0], [1], [0, 0, 1, 1], [], []>} : vector<1x16xbf16>, vector<16x2xbf16>, vector<1x2xf32> -> vector<1x2xf32>
    %c0_118 = arith.constant 0 : index
    %c0_119 = arith.constant 0 : index
    %292 = vector.load %arg25[%c0_118, %c0_119] : memref<1x2xf32, #tpu.memory_space<vmem>>, vector<1x2xf32>
    %293 = arith.addf %291, %292 : vector<1x2xf32>
    %294 = arith.negf %293 : vector<1x2xf32>
    %295 = math.exp %294 : vector<1x2xf32>
    %cst_120 = arith.constant 1.000000e+00 : f32
    %296 = vector.broadcast %cst_120 : f32 to vector<1x2xf32>
    %297 = arith.addf %296, %295 : vector<1x2xf32>
    %298 = arith.divf %296, %297 : vector<1x2xf32>
    %c0_121 = arith.constant 0 : index
    %c0_122 = arith.constant 0 : index
    %c0_123 = arith.constant 0 : index
    %299 = vector.load %arg26[%c0_121, %c0_122, %c0_123] : memref<1x1x2xf32, #tpu.memory_space<vmem>>, vector<1x1x2xf32>
    %300 = vector.shape_cast %299 : vector<1x1x2xf32> to vector<1x2xf32>
    %301 = vector.shape_cast %298 : vector<1x2xf32> to vector<1x1x2xf32>
    tpu.vector_store %arg26[%c0_121, %c0_122, %c0_123], %301 {strides = array<i32>} : memref<1x1x2xf32, #tpu.memory_space<vmem>>, vector<1x1x2xf32>,
    return
  }
  func.func @transform_0(%arg0: i32) -> (i32, i32, i32) {
    %c0_i32 = arith.constant 0 : i32
    %c0_i32_0 = arith.constant 0 : i32
    %c0_i32_1 = arith.constant 0 : i32
    return %arg0, %c0_i32, %c0_i32_0 : i32, i32, i32
  }
  func.func @transform_1(%arg0: i32) -> (i32, i32, i32) {
    %c0_i32 = arith.constant 0 : i32
    %c0_i32_0 = arith.constant 0 : i32
    %c0_i32_1 = arith.constant 0 : i32
    return %arg0, %c0_i32, %c0_i32_0 : i32, i32, i32
  }
  func.func @transform_2(%arg0: i32) -> (i32, i32, i32) {
    %c0_i32 = arith.constant 0 : i32
    %c0_i32_0 = arith.constant 0 : i32
    %c0_i32_1 = arith.constant 0 : i32
    return %arg0, %c0_i32, %c0_i32_0 : i32, i32, i32
  }
  func.func @transform_3(%arg0: i32) -> (i32, i32, i32) {
    %c0_i32 = arith.constant 0 : i32
    %c0_i32_0 = arith.constant 0 : i32
    %c0_i32_1 = arith.constant 0 : i32
    return %arg0, %c0_i32, %c0_i32_0 : i32, i32, i32
  }
  func.func @transform_4(%arg0: i32) -> (i32, i32, i32) {
    %c0_i32 = arith.constant 0 : i32
    %c0_i32_0 = arith.constant 0 : i32
    %c0_i32_1 = arith.constant 0 : i32
    return %arg0, %c0_i32, %c0_i32_0 : i32, i32, i32
  }
  func.func @transform_5(%arg0: i32) -> (i32, i32, i32) {
    %c0_i32 = arith.constant 0 : i32
    %c0_i32_0 = arith.constant 0 : i32
    %c0_i32_1 = arith.constant 0 : i32
    return %arg0, %c0_i32, %c0_i32_0 : i32, i32, i32
  }
  func.func @transform_6(%arg0: i32) -> (i32, i32) {
    %c0_i32 = arith.constant 0 : i32
    %c0_i32_0 = arith.constant 0 : i32
    %c0_i32_1 = arith.constant 0 : i32
    return %c0_i32, %c0_i32_0 : i32, i32
  }
  func.func @transform_7(%arg0: i32) -> (i32, i32) {
    %c0_i32 = arith.constant 0 : i32
    %c0_i32_0 = arith.constant 0 : i32
    %c0_i32_1 = arith.constant 0 : i32
    return %c0_i32, %c0_i32_0 : i32, i32
  }
  func.func @transform_8(%arg0: i32) -> (i32, i32) {
    %c0_i32 = arith.constant 0 : i32
    %c0_i32_0 = arith.constant 0 : i32
    %c0_i32_1 = arith.constant 0 : i32
    return %c0_i32, %c0_i32_0 : i32, i32
  }
  func.func @transform_9(%arg0: i32) -> (i32, i32) {
    %c0_i32 = arith.constant 0 : i32
    %c0_i32_0 = arith.constant 0 : i32
    %c0_i32_1 = arith.constant 0 : i32
    return %c0_i32, %c0_i32_0 : i32, i32
  }
  func.func @transform_10(%arg0: i32) -> (i32, i32) {
    %c0_i32 = arith.constant 0 : i32
    %c0_i32_0 = arith.constant 0 : i32
    %c0_i32_1 = arith.constant 0 : i32
    return %c0_i32, %c0_i32_0 : i32, i32
  }
  func.func @transform_11(%arg0: i32) -> (i32, i32) {
    %c0_i32 = arith.constant 0 : i32
    %c0_i32_0 = arith.constant 0 : i32
    %c0_i32_1 = arith.constant 0 : i32
    return %c0_i32, %c0_i32_0 : i32, i32
  }
  func.func @transform_12(%arg0: i32) -> (i32, i32) {
    %c0_i32 = arith.constant 0 : i32
    %c0_i32_0 = arith.constant 0 : i32
    %c0_i32_1 = arith.constant 0 : i32
    return %c0_i32, %c0_i32_0 : i32, i32
  }
  func.func @transform_13(%arg0: i32) -> (i32, i32) {
    %c0_i32 = arith.constant 0 : i32
    %c0_i32_0 = arith.constant 0 : i32
    %c0_i32_1 = arith.constant 0 : i32
    return %c0_i32, %c0_i32_0 : i32, i32
  }
  func.func @transform_14(%arg0: i32) -> (i32, i32) {
    %c0_i32 = arith.constant 0 : i32
    %c0_i32_0 = arith.constant 0 : i32
    %c0_i32_1 = arith.constant 0 : i32
    return %c0_i32, %c0_i32_0 : i32, i32
  }
  func.func @transform_15(%arg0: i32) -> (i32, i32) {
    %c0_i32 = arith.constant 0 : i32
    %c0_i32_0 = arith.constant 0 : i32
    %c0_i32_1 = arith.constant 0 : i32
    return %c0_i32, %c0_i32_0 : i32, i32
  }
  func.func @transform_16(%arg0: i32) -> (i32, i32) {
    %c0_i32 = arith.constant 0 : i32
    %c0_i32_0 = arith.constant 0 : i32
    %c0_i32_1 = arith.constant 0 : i32
    return %c0_i32, %c0_i32_0 : i32, i32
  }
  func.func @transform_17(%arg0: i32) -> (i32, i32) {
    %c0_i32 = arith.constant 0 : i32
    %c0_i32_0 = arith.constant 0 : i32
    %c0_i32_1 = arith.constant 0 : i32
    return %c0_i32, %c0_i32_0 : i32, i32
  }
  func.func @transform_18(%arg0: i32) -> (i32, i32) {
    %c0_i32 = arith.constant 0 : i32
    %c0_i32_0 = arith.constant 0 : i32
    %c0_i32_1 = arith.constant 0 : i32
    return %c0_i32, %c0_i32_0 : i32, i32
  }
  func.func @transform_19(%arg0: i32) -> (i32, i32) {
    %c0_i32 = arith.constant 0 : i32
    %c0_i32_0 = arith.constant 0 : i32
    %c0_i32_1 = arith.constant 0 : i32
    return %c0_i32, %c0_i32_0 : i32, i32
  }
  func.func @transform_20(%arg0: i32) -> (i32, i32) {
    %c0_i32 = arith.constant 0 : i32
    %c0_i32_0 = arith.constant 0 : i32
    %c0_i32_1 = arith.constant 0 : i32
    return %c0_i32, %c0_i32_0 : i32, i32
  }
  func.func @transform_21(%arg0: i32) -> (i32, i32) {
    %c0_i32 = arith.constant 0 : i32
    %c0_i32_0 = arith.constant 0 : i32
    %c0_i32_1 = arith.constant 0 : i32
    return %c0_i32, %c0_i32_0 : i32, i32
  }
  func.func @transform_22(%arg0: i32) -> (i32, i32) {
    %c0_i32 = arith.constant 0 : i32
    %c0_i32_0 = arith.constant 0 : i32
    %c0_i32_1 = arith.constant 0 : i32
    return %c0_i32, %c0_i32_0 : i32, i32
  }
  func.func @transform_23(%arg0: i32) -> (i32, i32) {
    %c0_i32 = arith.constant 0 : i32
    %c0_i32_0 = arith.constant 0 : i32
    %c0_i32_1 = arith.constant 0 : i32
    return %c0_i32, %c0_i32_0 : i32, i32
  }
  func.func @transform_24(%arg0: i32) -> (i32, i32) {
    %c0_i32 = arith.constant 0 : i32
    %c0_i32_0 = arith.constant 0 : i32
    %c0_i32_1 = arith.constant 0 : i32
    return %c0_i32, %c0_i32_0 : i32, i32
  }
  func.func @transform_25(%arg0: i32) -> (i32, i32, i32) {
    %c0_i32 = arith.constant 0 : i32
    %c0_i32_0 = arith.constant 0 : i32
    %c0_i32_1 = arith.constant 0 : i32
    return %arg0, %c0_i32, %c0_i32_0 : i32, i32, i32
  }
}

module attributes {stable_mosaic.version = 11 : i64} {
  func.func @_encoder_kernel(%arg0: i32, %arg1: memref<1x8x8xf32, #tpu.memory_space<vmem>>, %arg2: memref<1x1x8xf32, #tpu.memory_space<vmem>>, %arg3: memref<8x8xf32, #tpu.memory_space<vmem>>, %arg4: memref<1x8xf32, #tpu.memory_space<vmem>>, %arg5: memref<8x32xf32, #tpu.memory_space<vmem>>, %arg6: memref<1x32xf32, #tpu.memory_space<vmem>>, %arg7: memref<2x32x128xf32, #tpu.memory_space<vmem>>, %arg8: memref<2x32x128xf32, #tpu.memory_space<vmem>>, %arg9: memref<2x1x128xf32, #tpu.memory_space<vmem>>, %arg10: memref<32x96xf32, #tpu.memory_space<vmem>>, %arg11: memref<1x96xf32, #tpu.memory_space<vmem>>, %arg12: memref<32x32xf32, #tpu.memory_space<vmem>>, %arg13: memref<1x32xf32, #tpu.memory_space<vmem>>, %arg14: memref<1x8x32xf32, #tpu.memory_space<vmem>>) attributes {dimension_semantics = [#tpu.dimension_semantics<parallel>], iteration_bounds = array<i64: 2>, scalar_prefetch = 0 : i64, scratch_operands = 0 : i64, tpu.core_type = #tpu.core_type<tc>, window_params = [{transform_indices = @transform_0, window_bounds = array<i64: 1, 8, 8>}, {transform_indices = @transform_1, window_bounds = array<i64: 1, 1, 8>}, {pipeline_mode = #tpu.pipeline_mode<synchronous>, transform_indices = @transform_2, window_bounds = array<i64: 8, 8>}, {pipeline_mode = #tpu.pipeline_mode<synchronous>, transform_indices = @transform_3, window_bounds = array<i64: 1, 8>}, {pipeline_mode = #tpu.pipeline_mode<synchronous>, transform_indices = @transform_4, window_bounds = array<i64: 8, 32>}, {pipeline_mode = #tpu.pipeline_mode<synchronous>, transform_indices = @transform_5, window_bounds = array<i64: 1, 32>}, {pipeline_mode = #tpu.pipeline_mode<synchronous>, transform_indices = @transform_6, window_bounds = array<i64: 2, 32, 128>}, {pipeline_mode = #tpu.pipeline_mode<synchronous>, transform_indices = @transform_7, window_bounds = array<i64: 2, 32, 128>}, {pipeline_mode = #tpu.pipeline_mode<synchronous>, transform_indices = @transform_8, window_bounds = array<i64: 2, 1, 128>}, {pipeline_mode = #tpu.pipeline_mode<synchronous>, transform_indices = @transform_9, window_bounds = array<i64: 32, 96>}, {pipeline_mode = #tpu.pipeline_mode<synchronous>, transform_indices = @transform_10, window_bounds = array<i64: 1, 96>}, {pipeline_mode = #tpu.pipeline_mode<synchronous>, transform_indices = @transform_11, window_bounds = array<i64: 32, 32>}, {pipeline_mode = #tpu.pipeline_mode<synchronous>, transform_indices = @transform_12, window_bounds = array<i64: 1, 32>}, {transform_indices = @transform_13, window_bounds = array<i64: 1, 8, 32>}]} {
    %c0 = arith.constant 0 : index
    %c0_0 = arith.constant 0 : index
    %c0_1 = arith.constant 0 : index
    %0 = vector.load %arg1[%c0, %c0_0, %c0_1] : memref<1x8x8xf32, #tpu.memory_space<vmem>>, vector<1x8x8xf32>
    %1 = vector.shape_cast %0 : vector<1x8x8xf32> to vector<8x8xf32>
    %c0_2 = arith.constant 0 : index
    %c0_3 = arith.constant 0 : index
    %2 = vector.load %arg3[%c0_2, %c0_3] : memref<8x8xf32, #tpu.memory_space<vmem>>, vector<8x8xf32>
    %3 = arith.truncf %1 : vector<8x8xf32> to vector<8x8xbf16>
    %4 = arith.truncf %2 : vector<8x8xf32> to vector<8x8xbf16>
    %cst = arith.constant dense<0.000000e+00> : vector<8x8xf32>
    %5 = tpu.matmul %3, %4, %cst {dimension_numbers = #tpu.dot_dimension_numbers<[1], [0], [0], [1], [0, 0, 1, 1], [], []>} : vector<8x8xbf16>, vector<8x8xbf16>, vector<8x8xf32> -> vector<8x8xf32>
    %c0_4 = arith.constant 0 : index
    %c0_5 = arith.constant 0 : index
    %6 = vector.load %arg4[%c0_4, %c0_5] : memref<1x8xf32, #tpu.memory_space<vmem>>, vector<1x8xf32>
    %7 = vector.broadcast %6 : vector<1x8xf32> to vector<8x8xf32>
    %8 = arith.addf %5, %7 : vector<8x8xf32>
    %cst_6 = arith.constant 0.000000e+00 : f32
    %9 = vector.broadcast %cst_6 : f32 to vector<8x8xf32>
    %10 = arith.maximumf %8, %9 : vector<8x8xf32>
    %c0_7 = arith.constant 0 : index
    %c0_8 = arith.constant 0 : index
    %11 = vector.load %arg5[%c0_7, %c0_8] : memref<8x32xf32, #tpu.memory_space<vmem>>, vector<8x32xf32>
    %12 = arith.truncf %10 : vector<8x8xf32> to vector<8x8xbf16>
    %13 = arith.truncf %11 : vector<8x32xf32> to vector<8x32xbf16>
    %cst_9 = arith.constant dense<0.000000e+00> : vector<8x32xf32>
    %14 = tpu.matmul %12, %13, %cst_9 {dimension_numbers = #tpu.dot_dimension_numbers<[1], [0], [0], [1], [0, 0, 1, 1], [], []>} : vector<8x8xbf16>, vector<8x32xbf16>, vector<8x32xf32> -> vector<8x32xf32>
    %c0_10 = arith.constant 0 : index
    %c0_11 = arith.constant 0 : index
    %15 = vector.load %arg6[%c0_10, %c0_11] : memref<1x32xf32, #tpu.memory_space<vmem>>, vector<1x32xf32>
    %16 = vector.broadcast %15 : vector<1x32xf32> to vector<8x32xf32>
    %17 = arith.addf %14, %16 : vector<8x32xf32>
    %cst_12 = arith.constant 0.000000e+00 : f32
    %18 = vector.broadcast %cst_12 : f32 to vector<8x32xf32>
    %19 = arith.cmpf ogt, %17, %18 : vector<8x32xf32>
    %20 = math.exp %17 : vector<8x32xf32>
    %cst_13 = arith.constant 1.000000e+00 : f32
    %21 = vector.broadcast %cst_13 : f32 to vector<8x32xf32>
    %22 = arith.subf %20, %21 : vector<8x32xf32>
    %cst_14 = arith.constant 1.67326319 : f32
    %23 = vector.broadcast %cst_14 : f32 to vector<8x32xf32>
    %24 = arith.mulf %23, %22 : vector<8x32xf32>
    %25 = arith.select %19, %17, %24 : vector<8x32xi1>, vector<8x32xf32>
    %cst_15 = arith.constant 1.05070102 : f32
    %26 = vector.broadcast %cst_15 : f32 to vector<8x32xf32>
    %27 = arith.mulf %26, %25 : vector<8x32xf32>
    %28 = tpu.iota {dimensions = array<i32: 0>} : vector<8x1xi32>
    %29 = tpu.iota {dimensions = array<i32: 1>} : vector<1x8xi32>
    %c0_16 = arith.constant 0 : index
    %c0_17 = arith.constant 0 : index
    %c0_18 = arith.constant 0 : index
    %30 = vector.load %arg7[%c0_16, %c0_17, %c0_18] : memref<2x32x128xf32, #tpu.memory_space<vmem>>, vector<1x32x128xf32>
    %31 = vector.shape_cast %30 : vector<1x32x128xf32> to vector<32x128xf32>
    %32 = arith.truncf %27 : vector<8x32xf32> to vector<8x32xbf16>
    %33 = arith.truncf %31 : vector<32x128xf32> to vector<32x128xbf16>
    %cst_19 = arith.constant dense<0.000000e+00> : vector<8x128xf32>
    %34 = tpu.matmul %32, %33, %cst_19 {dimension_numbers = #tpu.dot_dimension_numbers<[1], [0], [0], [1], [0, 0, 1, 1], [], []>} : vector<8x32xbf16>, vector<32x128xbf16>, vector<8x128xf32> -> vector<8x128xf32>
    %c0_20 = arith.constant 0 : index
    %c0_21 = arith.constant 0 : index
    %c0_22 = arith.constant 0 : index
    %35 = vector.load %arg9[%c0_20, %c0_21, %c0_22] : memref<2x1x128xf32, #tpu.memory_space<vmem>>, vector<1x1x128xf32>
    %36 = vector.shape_cast %35 : vector<1x1x128xf32> to vector<1x128xf32>
    %37 = vector.broadcast %36 : vector<1x128xf32> to vector<8x128xf32>
    %38 = arith.addf %34, %37 : vector<8x128xf32>
    %c0_23 = arith.constant 0 : index
    %c0_24 = arith.constant 0 : index
    %c0_25 = arith.constant 0 : index
    %39 = vector.load %arg8[%c0_23, %c0_24, %c0_25] : memref<2x32x128xf32, #tpu.memory_space<vmem>>, vector<1x32x128xf32>
    %40 = vector.shape_cast %39 : vector<1x32x128xf32> to vector<32x128xf32>
    %41 = arith.truncf %40 : vector<32x128xf32> to vector<32x128xbf16>
    %cst_26 = arith.constant 0.000000e+00 : f32
    %42 = vector.broadcast %cst_26 : f32 to vector<1x32xf32>
    %cst_27 = arith.constant 0.000000e+00 : f32
    %43 = vector.broadcast %cst_27 : f32 to vector<1x32xf32>
    %cst_28 = arith.constant 0.000000e+00 : f32
    %44 = vector.broadcast %cst_28 : f32 to vector<8x32xf32>
    %c0_i32 = arith.constant 0 : i32
    %45 = vector.broadcast %c0_i32 : i32 to vector<1x8xi32>
    %46 = arith.cmpi eq, %29, %45 : vector<1x8xi32>
    %47 = arith.extui %46 : vector<1x8xi1> to vector<1x8xi32>
    %48 = arith.sitofp %47 : vector<1x8xi32> to vector<1x8xf32>
    %cst_29 = arith.constant dense<0.000000e+00> : vector<1x128xf32>
    %49 = tpu.matmul %48, %38, %cst_29 {dimension_numbers = #tpu.dot_dimension_numbers<[1], [0], [0], [1], [0, 0, 1, 1], [], []>} : vector<1x8xf32>, vector<8x128xf32>, vector<1x128xf32> -> vector<1x128xf32>
    %50 = arith.truncf %42 : vector<1x32xf32> to vector<1x32xbf16>
    %cst_30 = arith.constant dense<0.000000e+00> : vector<1x128xf32>
    %51 = tpu.matmul %50, %41, %cst_30 {dimension_numbers = #tpu.dot_dimension_numbers<[1], [0], [0], [1], [0, 0, 1, 1], [], []>} : vector<1x32xbf16>, vector<32x128xbf16>, vector<1x128xf32> -> vector<1x128xf32>
    %52 = arith.addf %49, %51 : vector<1x128xf32>
    %53 = vector.extract_strided_slice %52 {offsets = [0, 0], sizes = [1, 32], strides = [1, 1]} : vector<1x128xf32> to vector<1x32xf32>
    %54 = arith.negf %53 : vector<1x32xf32>
    %55 = math.exp %54 : vector<1x32xf32>
    %cst_31 = arith.constant 1.000000e+00 : f32
    %56 = vector.broadcast %cst_31 : f32 to vector<1x32xf32>
    %57 = arith.addf %56, %55 : vector<1x32xf32>
    %58 = arith.divf %56, %57 : vector<1x32xf32>
    %59 = vector.extract_strided_slice %52 {offsets = [0, 32], sizes = [1, 32], strides = [1, 1]} : vector<1x128xf32> to vector<1x32xf32>
    %60 = arith.negf %59 : vector<1x32xf32>
    %61 = math.exp %60 : vector<1x32xf32>
    %cst_32 = arith.constant 1.000000e+00 : f32
    %62 = vector.broadcast %cst_32 : f32 to vector<1x32xf32>
    %63 = arith.addf %62, %61 : vector<1x32xf32>
    %64 = arith.divf %62, %63 : vector<1x32xf32>
    %65 = vector.extract_strided_slice %52 {offsets = [0, 64], sizes = [1, 32], strides = [1, 1]} : vector<1x128xf32> to vector<1x32xf32>
    %66 = math.tanh %65 : vector<1x32xf32>
    %67 = vector.extract_strided_slice %52 {offsets = [0, 96], sizes = [1, 32], strides = [1, 1]} : vector<1x128xf32> to vector<1x32xf32>
    %68 = arith.negf %67 : vector<1x32xf32>
    %69 = math.exp %68 : vector<1x32xf32>
    %cst_33 = arith.constant 1.000000e+00 : f32
    %70 = vector.broadcast %cst_33 : f32 to vector<1x32xf32>
    %71 = arith.addf %70, %69 : vector<1x32xf32>
    %72 = arith.divf %70, %71 : vector<1x32xf32>
    %73 = arith.mulf %64, %43 : vector<1x32xf32>
    %74 = arith.mulf %58, %66 : vector<1x32xf32>
    %75 = arith.addf %73, %74 : vector<1x32xf32>
    %76 = math.tanh %75 : vector<1x32xf32>
    %77 = arith.mulf %72, %76 : vector<1x32xf32>
    %c0_i32_34 = arith.constant 0 : i32
    %78 = vector.broadcast %c0_i32_34 : i32 to vector<8x1xi32>
    %79 = arith.cmpi eq, %28, %78 : vector<8x1xi32>
    %cst_35 = arith.constant 0.000000e+00 : f32
    %80 = vector.shape_cast %79 : vector<8x1xi1> to vector<8x1xi1>
    %81 = vector.broadcast %80 : vector<8x1xi1> to vector<8x32xi1>
    %82 = vector.shape_cast %77 : vector<1x32xf32> to vector<1x32xf32>
    %83 = vector.broadcast %82 : vector<1x32xf32> to vector<8x32xf32>
    %84 = vector.broadcast %cst_35 : f32 to vector<8x32xf32>
    %85 = arith.select %81, %83, %84 : vector<8x32xi1>, vector<8x32xf32>
    %86 = arith.addf %44, %85 : vector<8x32xf32>
    %c1_i32 = arith.constant 1 : i32
    %87 = vector.broadcast %c1_i32 : i32 to vector<1x8xi32>
    %88 = arith.cmpi eq, %29, %87 : vector<1x8xi32>
    %89 = arith.extui %88 : vector<1x8xi1> to vector<1x8xi32>
    %90 = arith.sitofp %89 : vector<1x8xi32> to vector<1x8xf32>
    %cst_36 = arith.constant dense<0.000000e+00> : vector<1x128xf32>
    %91 = tpu.matmul %90, %38, %cst_36 {dimension_numbers = #tpu.dot_dimension_numbers<[1], [0], [0], [1], [0, 0, 1, 1], [], []>} : vector<1x8xf32>, vector<8x128xf32>, vector<1x128xf32> -> vector<1x128xf32>
    %92 = arith.truncf %77 : vector<1x32xf32> to vector<1x32xbf16>
    %cst_37 = arith.constant dense<0.000000e+00> : vector<1x128xf32>
    %93 = tpu.matmul %92, %41, %cst_37 {dimension_numbers = #tpu.dot_dimension_numbers<[1], [0], [0], [1], [0, 0, 1, 1], [], []>} : vector<1x32xbf16>, vector<32x128xbf16>, vector<1x128xf32> -> vector<1x128xf32>
    %94 = arith.addf %91, %93 : vector<1x128xf32>
    %95 = vector.extract_strided_slice %94 {offsets = [0, 0], sizes = [1, 32], strides = [1, 1]} : vector<1x128xf32> to vector<1x32xf32>
    %96 = arith.negf %95 : vector<1x32xf32>
    %97 = math.exp %96 : vector<1x32xf32>
    %cst_38 = arith.constant 1.000000e+00 : f32
    %98 = vector.broadcast %cst_38 : f32 to vector<1x32xf32>
    %99 = arith.addf %98, %97 : vector<1x32xf32>
    %100 = arith.divf %98, %99 : vector<1x32xf32>
    %101 = vector.extract_strided_slice %94 {offsets = [0, 32], sizes = [1, 32], strides = [1, 1]} : vector<1x128xf32> to vector<1x32xf32>
    %102 = arith.negf %101 : vector<1x32xf32>
    %103 = math.exp %102 : vector<1x32xf32>
    %cst_39 = arith.constant 1.000000e+00 : f32
    %104 = vector.broadcast %cst_39 : f32 to vector<1x32xf32>
    %105 = arith.addf %104, %103 : vector<1x32xf32>
    %106 = arith.divf %104, %105 : vector<1x32xf32>
    %107 = vector.extract_strided_slice %94 {offsets = [0, 64], sizes = [1, 32], strides = [1, 1]} : vector<1x128xf32> to vector<1x32xf32>
    %108 = math.tanh %107 : vector<1x32xf32>
    %109 = vector.extract_strided_slice %94 {offsets = [0, 96], sizes = [1, 32], strides = [1, 1]} : vector<1x128xf32> to vector<1x32xf32>
    %110 = arith.negf %109 : vector<1x32xf32>
    %111 = math.exp %110 : vector<1x32xf32>
    %cst_40 = arith.constant 1.000000e+00 : f32
    %112 = vector.broadcast %cst_40 : f32 to vector<1x32xf32>
    %113 = arith.addf %112, %111 : vector<1x32xf32>
    %114 = arith.divf %112, %113 : vector<1x32xf32>
    %115 = arith.mulf %106, %75 : vector<1x32xf32>
    %116 = arith.mulf %100, %108 : vector<1x32xf32>
    %117 = arith.addf %115, %116 : vector<1x32xf32>
    %118 = math.tanh %117 : vector<1x32xf32>
    %119 = arith.mulf %114, %118 : vector<1x32xf32>
    %c1_i32_41 = arith.constant 1 : i32
    %120 = vector.broadcast %c1_i32_41 : i32 to vector<8x1xi32>
    %121 = arith.cmpi eq, %28, %120 : vector<8x1xi32>
    %cst_42 = arith.constant 0.000000e+00 : f32
    %122 = vector.shape_cast %121 : vector<8x1xi1> to vector<8x1xi1>
    %123 = vector.broadcast %122 : vector<8x1xi1> to vector<8x32xi1>
    %124 = vector.shape_cast %119 : vector<1x32xf32> to vector<1x32xf32>
    %125 = vector.broadcast %124 : vector<1x32xf32> to vector<8x32xf32>
    %126 = vector.broadcast %cst_42 : f32 to vector<8x32xf32>
    %127 = arith.select %123, %125, %126 : vector<8x32xi1>, vector<8x32xf32>
    %128 = arith.addf %86, %127 : vector<8x32xf32>
    %c2_i32 = arith.constant 2 : i32
    %129 = vector.broadcast %c2_i32 : i32 to vector<1x8xi32>
    %130 = arith.cmpi eq, %29, %129 : vector<1x8xi32>
    %131 = arith.extui %130 : vector<1x8xi1> to vector<1x8xi32>
    %132 = arith.sitofp %131 : vector<1x8xi32> to vector<1x8xf32>
    %cst_43 = arith.constant dense<0.000000e+00> : vector<1x128xf32>
    %133 = tpu.matmul %132, %38, %cst_43 {dimension_numbers = #tpu.dot_dimension_numbers<[1], [0], [0], [1], [0, 0, 1, 1], [], []>} : vector<1x8xf32>, vector<8x128xf32>, vector<1x128xf32> -> vector<1x128xf32>
    %134 = arith.truncf %119 : vector<1x32xf32> to vector<1x32xbf16>
    %cst_44 = arith.constant dense<0.000000e+00> : vector<1x128xf32>
    %135 = tpu.matmul %134, %41, %cst_44 {dimension_numbers = #tpu.dot_dimension_numbers<[1], [0], [0], [1], [0, 0, 1, 1], [], []>} : vector<1x32xbf16>, vector<32x128xbf16>, vector<1x128xf32> -> vector<1x128xf32>
    %136 = arith.addf %133, %135 : vector<1x128xf32>
    %137 = vector.extract_strided_slice %136 {offsets = [0, 0], sizes = [1, 32], strides = [1, 1]} : vector<1x128xf32> to vector<1x32xf32>
    %138 = arith.negf %137 : vector<1x32xf32>
    %139 = math.exp %138 : vector<1x32xf32>
    %cst_45 = arith.constant 1.000000e+00 : f32
    %140 = vector.broadcast %cst_45 : f32 to vector<1x32xf32>
    %141 = arith.addf %140, %139 : vector<1x32xf32>
    %142 = arith.divf %140, %141 : vector<1x32xf32>
    %143 = vector.extract_strided_slice %136 {offsets = [0, 32], sizes = [1, 32], strides = [1, 1]} : vector<1x128xf32> to vector<1x32xf32>
    %144 = arith.negf %143 : vector<1x32xf32>
    %145 = math.exp %144 : vector<1x32xf32>
    %cst_46 = arith.constant 1.000000e+00 : f32
    %146 = vector.broadcast %cst_46 : f32 to vector<1x32xf32>
    %147 = arith.addf %146, %145 : vector<1x32xf32>
    %148 = arith.divf %146, %147 : vector<1x32xf32>
    %149 = vector.extract_strided_slice %136 {offsets = [0, 64], sizes = [1, 32], strides = [1, 1]} : vector<1x128xf32> to vector<1x32xf32>
    %150 = math.tanh %149 : vector<1x32xf32>
    %151 = vector.extract_strided_slice %136 {offsets = [0, 96], sizes = [1, 32], strides = [1, 1]} : vector<1x128xf32> to vector<1x32xf32>
    %152 = arith.negf %151 : vector<1x32xf32>
    %153 = math.exp %152 : vector<1x32xf32>
    %cst_47 = arith.constant 1.000000e+00 : f32
    %154 = vector.broadcast %cst_47 : f32 to vector<1x32xf32>
    %155 = arith.addf %154, %153 : vector<1x32xf32>
    %156 = arith.divf %154, %155 : vector<1x32xf32>
    %157 = arith.mulf %148, %117 : vector<1x32xf32>
    %158 = arith.mulf %142, %150 : vector<1x32xf32>
    %159 = arith.addf %157, %158 : vector<1x32xf32>
    %160 = math.tanh %159 : vector<1x32xf32>
    %161 = arith.mulf %156, %160 : vector<1x32xf32>
    %c2_i32_48 = arith.constant 2 : i32
    %162 = vector.broadcast %c2_i32_48 : i32 to vector<8x1xi32>
    %163 = arith.cmpi eq, %28, %162 : vector<8x1xi32>
    %cst_49 = arith.constant 0.000000e+00 : f32
    %164 = vector.shape_cast %163 : vector<8x1xi1> to vector<8x1xi1>
    %165 = vector.broadcast %164 : vector<8x1xi1> to vector<8x32xi1>
    %166 = vector.shape_cast %161 : vector<1x32xf32> to vector<1x32xf32>
    %167 = vector.broadcast %166 : vector<1x32xf32> to vector<8x32xf32>
    %168 = vector.broadcast %cst_49 : f32 to vector<8x32xf32>
    %169 = arith.select %165, %167, %168 : vector<8x32xi1>, vector<8x32xf32>
    %170 = arith.addf %128, %169 : vector<8x32xf32>
    %c3_i32 = arith.constant 3 : i32
    %171 = vector.broadcast %c3_i32 : i32 to vector<1x8xi32>
    %172 = arith.cmpi eq, %29, %171 : vector<1x8xi32>
    %173 = arith.extui %172 : vector<1x8xi1> to vector<1x8xi32>
    %174 = arith.sitofp %173 : vector<1x8xi32> to vector<1x8xf32>
    %cst_50 = arith.constant dense<0.000000e+00> : vector<1x128xf32>
    %175 = tpu.matmul %174, %38, %cst_50 {dimension_numbers = #tpu.dot_dimension_numbers<[1], [0], [0], [1], [0, 0, 1, 1], [], []>} : vector<1x8xf32>, vector<8x128xf32>, vector<1x128xf32> -> vector<1x128xf32>
    %176 = arith.truncf %161 : vector<1x32xf32> to vector<1x32xbf16>
    %cst_51 = arith.constant dense<0.000000e+00> : vector<1x128xf32>
    %177 = tpu.matmul %176, %41, %cst_51 {dimension_numbers = #tpu.dot_dimension_numbers<[1], [0], [0], [1], [0, 0, 1, 1], [], []>} : vector<1x32xbf16>, vector<32x128xbf16>, vector<1x128xf32> -> vector<1x128xf32>
    %178 = arith.addf %175, %177 : vector<1x128xf32>
    %179 = vector.extract_strided_slice %178 {offsets = [0, 0], sizes = [1, 32], strides = [1, 1]} : vector<1x128xf32> to vector<1x32xf32>
    %180 = arith.negf %179 : vector<1x32xf32>
    %181 = math.exp %180 : vector<1x32xf32>
    %cst_52 = arith.constant 1.000000e+00 : f32
    %182 = vector.broadcast %cst_52 : f32 to vector<1x32xf32>
    %183 = arith.addf %182, %181 : vector<1x32xf32>
    %184 = arith.divf %182, %183 : vector<1x32xf32>
    %185 = vector.extract_strided_slice %178 {offsets = [0, 32], sizes = [1, 32], strides = [1, 1]} : vector<1x128xf32> to vector<1x32xf32>
    %186 = arith.negf %185 : vector<1x32xf32>
    %187 = math.exp %186 : vector<1x32xf32>
    %cst_53 = arith.constant 1.000000e+00 : f32
    %188 = vector.broadcast %cst_53 : f32 to vector<1x32xf32>
    %189 = arith.addf %188, %187 : vector<1x32xf32>
    %190 = arith.divf %188, %189 : vector<1x32xf32>
    %191 = vector.extract_strided_slice %178 {offsets = [0, 64], sizes = [1, 32], strides = [1, 1]} : vector<1x128xf32> to vector<1x32xf32>
    %192 = math.tanh %191 : vector<1x32xf32>
    %193 = vector.extract_strided_slice %178 {offsets = [0, 96], sizes = [1, 32], strides = [1, 1]} : vector<1x128xf32> to vector<1x32xf32>
    %194 = arith.negf %193 : vector<1x32xf32>
    %195 = math.exp %194 : vector<1x32xf32>
    %cst_54 = arith.constant 1.000000e+00 : f32
    %196 = vector.broadcast %cst_54 : f32 to vector<1x32xf32>
    %197 = arith.addf %196, %195 : vector<1x32xf32>
    %198 = arith.divf %196, %197 : vector<1x32xf32>
    %199 = arith.mulf %190, %159 : vector<1x32xf32>
    %200 = arith.mulf %184, %192 : vector<1x32xf32>
    %201 = arith.addf %199, %200 : vector<1x32xf32>
    %202 = math.tanh %201 : vector<1x32xf32>
    %203 = arith.mulf %198, %202 : vector<1x32xf32>
    %c3_i32_55 = arith.constant 3 : i32
    %204 = vector.broadcast %c3_i32_55 : i32 to vector<8x1xi32>
    %205 = arith.cmpi eq, %28, %204 : vector<8x1xi32>
    %cst_56 = arith.constant 0.000000e+00 : f32
    %206 = vector.shape_cast %205 : vector<8x1xi1> to vector<8x1xi1>
    %207 = vector.broadcast %206 : vector<8x1xi1> to vector<8x32xi1>
    %208 = vector.shape_cast %203 : vector<1x32xf32> to vector<1x32xf32>
    %209 = vector.broadcast %208 : vector<1x32xf32> to vector<8x32xf32>
    %210 = vector.broadcast %cst_56 : f32 to vector<8x32xf32>
    %211 = arith.select %207, %209, %210 : vector<8x32xi1>, vector<8x32xf32>
    %212 = arith.addf %170, %211 : vector<8x32xf32>
    %c4_i32 = arith.constant 4 : i32
    %213 = vector.broadcast %c4_i32 : i32 to vector<1x8xi32>
    %214 = arith.cmpi eq, %29, %213 : vector<1x8xi32>
    %215 = arith.extui %214 : vector<1x8xi1> to vector<1x8xi32>
    %216 = arith.sitofp %215 : vector<1x8xi32> to vector<1x8xf32>
    %cst_57 = arith.constant dense<0.000000e+00> : vector<1x128xf32>
    %217 = tpu.matmul %216, %38, %cst_57 {dimension_numbers = #tpu.dot_dimension_numbers<[1], [0], [0], [1], [0, 0, 1, 1], [], []>} : vector<1x8xf32>, vector<8x128xf32>, vector<1x128xf32> -> vector<1x128xf32>
    %218 = arith.truncf %203 : vector<1x32xf32> to vector<1x32xbf16>
    %cst_58 = arith.constant dense<0.000000e+00> : vector<1x128xf32>
    %219 = tpu.matmul %218, %41, %cst_58 {dimension_numbers = #tpu.dot_dimension_numbers<[1], [0], [0], [1], [0, 0, 1, 1], [], []>} : vector<1x32xbf16>, vector<32x128xbf16>, vector<1x128xf32> -> vector<1x128xf32>
    %220 = arith.addf %217, %219 : vector<1x128xf32>
    %221 = vector.extract_strided_slice %220 {offsets = [0, 0], sizes = [1, 32], strides = [1, 1]} : vector<1x128xf32> to vector<1x32xf32>
    %222 = arith.negf %221 : vector<1x32xf32>
    %223 = math.exp %222 : vector<1x32xf32>
    %cst_59 = arith.constant 1.000000e+00 : f32
    %224 = vector.broadcast %cst_59 : f32 to vector<1x32xf32>
    %225 = arith.addf %224, %223 : vector<1x32xf32>
    %226 = arith.divf %224, %225 : vector<1x32xf32>
    %227 = vector.extract_strided_slice %220 {offsets = [0, 32], sizes = [1, 32], strides = [1, 1]} : vector<1x128xf32> to vector<1x32xf32>
    %228 = arith.negf %227 : vector<1x32xf32>
    %229 = math.exp %228 : vector<1x32xf32>
    %cst_60 = arith.constant 1.000000e+00 : f32
    %230 = vector.broadcast %cst_60 : f32 to vector<1x32xf32>
    %231 = arith.addf %230, %229 : vector<1x32xf32>
    %232 = arith.divf %230, %231 : vector<1x32xf32>
    %233 = vector.extract_strided_slice %220 {offsets = [0, 64], sizes = [1, 32], strides = [1, 1]} : vector<1x128xf32> to vector<1x32xf32>
    %234 = math.tanh %233 : vector<1x32xf32>
    %235 = vector.extract_strided_slice %220 {offsets = [0, 96], sizes = [1, 32], strides = [1, 1]} : vector<1x128xf32> to vector<1x32xf32>
    %236 = arith.negf %235 : vector<1x32xf32>
    %237 = math.exp %236 : vector<1x32xf32>
    %cst_61 = arith.constant 1.000000e+00 : f32
    %238 = vector.broadcast %cst_61 : f32 to vector<1x32xf32>
    %239 = arith.addf %238, %237 : vector<1x32xf32>
    %240 = arith.divf %238, %239 : vector<1x32xf32>
    %241 = arith.mulf %232, %201 : vector<1x32xf32>
    %242 = arith.mulf %226, %234 : vector<1x32xf32>
    %243 = arith.addf %241, %242 : vector<1x32xf32>
    %244 = math.tanh %243 : vector<1x32xf32>
    %245 = arith.mulf %240, %244 : vector<1x32xf32>
    %c4_i32_62 = arith.constant 4 : i32
    %246 = vector.broadcast %c4_i32_62 : i32 to vector<8x1xi32>
    %247 = arith.cmpi eq, %28, %246 : vector<8x1xi32>
    %cst_63 = arith.constant 0.000000e+00 : f32
    %248 = vector.shape_cast %247 : vector<8x1xi1> to vector<8x1xi1>
    %249 = vector.broadcast %248 : vector<8x1xi1> to vector<8x32xi1>
    %250 = vector.shape_cast %245 : vector<1x32xf32> to vector<1x32xf32>
    %251 = vector.broadcast %250 : vector<1x32xf32> to vector<8x32xf32>
    %252 = vector.broadcast %cst_63 : f32 to vector<8x32xf32>
    %253 = arith.select %249, %251, %252 : vector<8x32xi1>, vector<8x32xf32>
    %254 = arith.addf %212, %253 : vector<8x32xf32>
    %c5_i32 = arith.constant 5 : i32
    %255 = vector.broadcast %c5_i32 : i32 to vector<1x8xi32>
    %256 = arith.cmpi eq, %29, %255 : vector<1x8xi32>
    %257 = arith.extui %256 : vector<1x8xi1> to vector<1x8xi32>
    %258 = arith.sitofp %257 : vector<1x8xi32> to vector<1x8xf32>
    %cst_64 = arith.constant dense<0.000000e+00> : vector<1x128xf32>
    %259 = tpu.matmul %258, %38, %cst_64 {dimension_numbers = #tpu.dot_dimension_numbers<[1], [0], [0], [1], [0, 0, 1, 1], [], []>} : vector<1x8xf32>, vector<8x128xf32>, vector<1x128xf32> -> vector<1x128xf32>
    %260 = arith.truncf %245 : vector<1x32xf32> to vector<1x32xbf16>
    %cst_65 = arith.constant dense<0.000000e+00> : vector<1x128xf32>
    %261 = tpu.matmul %260, %41, %cst_65 {dimension_numbers = #tpu.dot_dimension_numbers<[1], [0], [0], [1], [0, 0, 1, 1], [], []>} : vector<1x32xbf16>, vector<32x128xbf16>, vector<1x128xf32> -> vector<1x128xf32>
    %262 = arith.addf %259, %261 : vector<1x128xf32>
    %263 = vector.extract_strided_slice %262 {offsets = [0, 0], sizes = [1, 32], strides = [1, 1]} : vector<1x128xf32> to vector<1x32xf32>
    %264 = arith.negf %263 : vector<1x32xf32>
    %265 = math.exp %264 : vector<1x32xf32>
    %cst_66 = arith.constant 1.000000e+00 : f32
    %266 = vector.broadcast %cst_66 : f32 to vector<1x32xf32>
    %267 = arith.addf %266, %265 : vector<1x32xf32>
    %268 = arith.divf %266, %267 : vector<1x32xf32>
    %269 = vector.extract_strided_slice %262 {offsets = [0, 32], sizes = [1, 32], strides = [1, 1]} : vector<1x128xf32> to vector<1x32xf32>
    %270 = arith.negf %269 : vector<1x32xf32>
    %271 = math.exp %270 : vector<1x32xf32>
    %cst_67 = arith.constant 1.000000e+00 : f32
    %272 = vector.broadcast %cst_67 : f32 to vector<1x32xf32>
    %273 = arith.addf %272, %271 : vector<1x32xf32>
    %274 = arith.divf %272, %273 : vector<1x32xf32>
    %275 = vector.extract_strided_slice %262 {offsets = [0, 64], sizes = [1, 32], strides = [1, 1]} : vector<1x128xf32> to vector<1x32xf32>
    %276 = math.tanh %275 : vector<1x32xf32>
    %277 = vector.extract_strided_slice %262 {offsets = [0, 96], sizes = [1, 32], strides = [1, 1]} : vector<1x128xf32> to vector<1x32xf32>
    %278 = arith.negf %277 : vector<1x32xf32>
    %279 = math.exp %278 : vector<1x32xf32>
    %cst_68 = arith.constant 1.000000e+00 : f32
    %280 = vector.broadcast %cst_68 : f32 to vector<1x32xf32>
    %281 = arith.addf %280, %279 : vector<1x32xf32>
    %282 = arith.divf %280, %281 : vector<1x32xf32>
    %283 = arith.mulf %274, %243 : vector<1x32xf32>
    %284 = arith.mulf %268, %276 : vector<1x32xf32>
    %285 = arith.addf %283, %284 : vector<1x32xf32>
    %286 = math.tanh %285 : vector<1x32xf32>
    %287 = arith.mulf %282, %286 : vector<1x32xf32>
    %c5_i32_69 = arith.constant 5 : i32
    %288 = vector.broadcast %c5_i32_69 : i32 to vector<8x1xi32>
    %289 = arith.cmpi eq, %28, %288 : vector<8x1xi32>
    %cst_70 = arith.constant 0.000000e+00 : f32
    %290 = vector.shape_cast %289 : vector<8x1xi1> to vector<8x1xi1>
    %291 = vector.broadcast %290 : vector<8x1xi1> to vector<8x32xi1>
    %292 = vector.shape_cast %287 : vector<1x32xf32> to vector<1x32xf32>
    %293 = vector.broadcast %292 : vector<1x32xf32> to vector<8x32xf32>
    %294 = vector.broadcast %cst_70 : f32 to vector<8x32xf32>
    %295 = arith.select %291, %293, %294 : vector<8x32xi1>, vector<8x32xf32>
    %296 = arith.addf %254, %295 : vector<8x32xf32>
    %c6_i32 = arith.constant 6 : i32
    %297 = vector.broadcast %c6_i32 : i32 to vector<1x8xi32>
    %298 = arith.cmpi eq, %29, %297 : vector<1x8xi32>
    %299 = arith.extui %298 : vector<1x8xi1> to vector<1x8xi32>
    %300 = arith.sitofp %299 : vector<1x8xi32> to vector<1x8xf32>
    %cst_71 = arith.constant dense<0.000000e+00> : vector<1x128xf32>
    %301 = tpu.matmul %300, %38, %cst_71 {dimension_numbers = #tpu.dot_dimension_numbers<[1], [0], [0], [1], [0, 0, 1, 1], [], []>} : vector<1x8xf32>, vector<8x128xf32>, vector<1x128xf32> -> vector<1x128xf32>
    %302 = arith.truncf %287 : vector<1x32xf32> to vector<1x32xbf16>
    %cst_72 = arith.constant dense<0.000000e+00> : vector<1x128xf32>
    %303 = tpu.matmul %302, %41, %cst_72 {dimension_numbers = #tpu.dot_dimension_numbers<[1], [0], [0], [1], [0, 0, 1, 1], [], []>} : vector<1x32xbf16>, vector<32x128xbf16>, vector<1x128xf32> -> vector<1x128xf32>
    %304 = arith.addf %301, %303 : vector<1x128xf32>
    %305 = vector.extract_strided_slice %304 {offsets = [0, 0], sizes = [1, 32], strides = [1, 1]} : vector<1x128xf32> to vector<1x32xf32>
    %306 = arith.negf %305 : vector<1x32xf32>
    %307 = math.exp %306 : vector<1x32xf32>
    %cst_73 = arith.constant 1.000000e+00 : f32
    %308 = vector.broadcast %cst_73 : f32 to vector<1x32xf32>
    %309 = arith.addf %308, %307 : vector<1x32xf32>
    %310 = arith.divf %308, %309 : vector<1x32xf32>
    %311 = vector.extract_strided_slice %304 {offsets = [0, 32], sizes = [1, 32], strides = [1, 1]} : vector<1x128xf32> to vector<1x32xf32>
    %312 = arith.negf %311 : vector<1x32xf32>
    %313 = math.exp %312 : vector<1x32xf32>
    %cst_74 = arith.constant 1.000000e+00 : f32
    %314 = vector.broadcast %cst_74 : f32 to vector<1x32xf32>
    %315 = arith.addf %314, %313 : vector<1x32xf32>
    %316 = arith.divf %314, %315 : vector<1x32xf32>
    %317 = vector.extract_strided_slice %304 {offsets = [0, 64], sizes = [1, 32], strides = [1, 1]} : vector<1x128xf32> to vector<1x32xf32>
    %318 = math.tanh %317 : vector<1x32xf32>
    %319 = vector.extract_strided_slice %304 {offsets = [0, 96], sizes = [1, 32], strides = [1, 1]} : vector<1x128xf32> to vector<1x32xf32>
    %320 = arith.negf %319 : vector<1x32xf32>
    %321 = math.exp %320 : vector<1x32xf32>
    %cst_75 = arith.constant 1.000000e+00 : f32
    %322 = vector.broadcast %cst_75 : f32 to vector<1x32xf32>
    %323 = arith.addf %322, %321 : vector<1x32xf32>
    %324 = arith.divf %322, %323 : vector<1x32xf32>
    %325 = arith.mulf %316, %285 : vector<1x32xf32>
    %326 = arith.mulf %310, %318 : vector<1x32xf32>
    %327 = arith.addf %325, %326 : vector<1x32xf32>
    %328 = math.tanh %327 : vector<1x32xf32>
    %329 = arith.mulf %324, %328 : vector<1x32xf32>
    %c6_i32_76 = arith.constant 6 : i32
    %330 = vector.broadcast %c6_i32_76 : i32 to vector<8x1xi32>
    %331 = arith.cmpi eq, %28, %330 : vector<8x1xi32>
    %cst_77 = arith.constant 0.000000e+00 : f32
    %332 = vector.shape_cast %331 : vector<8x1xi1> to vector<8x1xi1>
    %333 = vector.broadcast %332 : vector<8x1xi1> to vector<8x32xi1>
    %334 = vector.shape_cast %329 : vector<1x32xf32> to vector<1x32xf32>
    %335 = vector.broadcast %334 : vector<1x32xf32> to vector<8x32xf32>
    %336 = vector.broadcast %cst_77 : f32 to vector<8x32xf32>
    %337 = arith.select %333, %335, %336 : vector<8x32xi1>, vector<8x32xf32>
    %338 = arith.addf %296, %337 : vector<8x32xf32>
    %c7_i32 = arith.constant 7 : i32
    %339 = vector.broadcast %c7_i32 : i32 to vector<1x8xi32>
    %340 = arith.cmpi eq, %29, %339 : vector<1x8xi32>
    %341 = arith.extui %340 : vector<1x8xi1> to vector<1x8xi32>
    %342 = arith.sitofp %341 : vector<1x8xi32> to vector<1x8xf32>
    %cst_78 = arith.constant dense<0.000000e+00> : vector<1x128xf32>
    %343 = tpu.matmul %342, %38, %cst_78 {dimension_numbers = #tpu.dot_dimension_numbers<[1], [0], [0], [1], [0, 0, 1, 1], [], []>} : vector<1x8xf32>, vector<8x128xf32>, vector<1x128xf32> -> vector<1x128xf32>
    %344 = arith.truncf %329 : vector<1x32xf32> to vector<1x32xbf16>
    %cst_79 = arith.constant dense<0.000000e+00> : vector<1x128xf32>
    %345 = tpu.matmul %344, %41, %cst_79 {dimension_numbers = #tpu.dot_dimension_numbers<[1], [0], [0], [1], [0, 0, 1, 1], [], []>} : vector<1x32xbf16>, vector<32x128xbf16>, vector<1x128xf32> -> vector<1x128xf32>
    %346 = arith.addf %343, %345 : vector<1x128xf32>
    %347 = vector.extract_strided_slice %346 {offsets = [0, 0], sizes = [1, 32], strides = [1, 1]} : vector<1x128xf32> to vector<1x32xf32>
    %348 = arith.negf %347 : vector<1x32xf32>
    %349 = math.exp %348 : vector<1x32xf32>
    %cst_80 = arith.constant 1.000000e+00 : f32
    %350 = vector.broadcast %cst_80 : f32 to vector<1x32xf32>
    %351 = arith.addf %350, %349 : vector<1x32xf32>
    %352 = arith.divf %350, %351 : vector<1x32xf32>
    %353 = vector.extract_strided_slice %346 {offsets = [0, 32], sizes = [1, 32], strides = [1, 1]} : vector<1x128xf32> to vector<1x32xf32>
    %354 = arith.negf %353 : vector<1x32xf32>
    %355 = math.exp %354 : vector<1x32xf32>
    %cst_81 = arith.constant 1.000000e+00 : f32
    %356 = vector.broadcast %cst_81 : f32 to vector<1x32xf32>
    %357 = arith.addf %356, %355 : vector<1x32xf32>
    %358 = arith.divf %356, %357 : vector<1x32xf32>
    %359 = vector.extract_strided_slice %346 {offsets = [0, 64], sizes = [1, 32], strides = [1, 1]} : vector<1x128xf32> to vector<1x32xf32>
    %360 = math.tanh %359 : vector<1x32xf32>
    %361 = vector.extract_strided_slice %346 {offsets = [0, 96], sizes = [1, 32], strides = [1, 1]} : vector<1x128xf32> to vector<1x32xf32>
    %362 = arith.negf %361 : vector<1x32xf32>
    %363 = math.exp %362 : vector<1x32xf32>
    %cst_82 = arith.constant 1.000000e+00 : f32
    %364 = vector.broadcast %cst_82 : f32 to vector<1x32xf32>
    %365 = arith.addf %364, %363 : vector<1x32xf32>
    %366 = arith.divf %364, %365 : vector<1x32xf32>
    %367 = arith.mulf %358, %327 : vector<1x32xf32>
    %368 = arith.mulf %352, %360 : vector<1x32xf32>
    %369 = arith.addf %367, %368 : vector<1x32xf32>
    %370 = math.tanh %369 : vector<1x32xf32>
    %371 = arith.mulf %366, %370 : vector<1x32xf32>
    %c7_i32_83 = arith.constant 7 : i32
    %372 = vector.broadcast %c7_i32_83 : i32 to vector<8x1xi32>
    %373 = arith.cmpi eq, %28, %372 : vector<8x1xi32>
    %cst_84 = arith.constant 0.000000e+00 : f32
    %374 = vector.shape_cast %373 : vector<8x1xi1> to vector<8x1xi1>
    %375 = vector.broadcast %374 : vector<8x1xi1> to vector<8x32xi1>
    %376 = vector.shape_cast %371 : vector<1x32xf32> to vector<1x32xf32>
    %377 = vector.broadcast %376 : vector<1x32xf32> to vector<8x32xf32>
    %378 = vector.broadcast %cst_84 : f32 to vector<8x32xf32>
    %379 = arith.select %375, %377, %378 : vector<8x32xi1>, vector<8x32xf32>
    %380 = arith.addf %338, %379 : vector<8x32xf32>
    %c1 = arith.constant 1 : index
    %c0_85 = arith.constant 0 : index
    %c0_86 = arith.constant 0 : index
    %381 = vector.load %arg7[%c1, %c0_85, %c0_86] : memref<2x32x128xf32, #tpu.memory_space<vmem>>, vector<1x32x128xf32>
    %382 = vector.shape_cast %381 : vector<1x32x128xf32> to vector<32x128xf32>
    %383 = arith.truncf %380 : vector<8x32xf32> to vector<8x32xbf16>
    %384 = arith.truncf %382 : vector<32x128xf32> to vector<32x128xbf16>
    %cst_87 = arith.constant dense<0.000000e+00> : vector<8x128xf32>
    %385 = tpu.matmul %383, %384, %cst_87 {dimension_numbers = #tpu.dot_dimension_numbers<[1], [0], [0], [1], [0, 0, 1, 1], [], []>} : vector<8x32xbf16>, vector<32x128xbf16>, vector<8x128xf32> -> vector<8x128xf32>
    %c1_88 = arith.constant 1 : index
    %c0_89 = arith.constant 0 : index
    %c0_90 = arith.constant 0 : index
    %386 = vector.load %arg9[%c1_88, %c0_89, %c0_90] : memref<2x1x128xf32, #tpu.memory_space<vmem>>, vector<1x1x128xf32>
    %387 = vector.shape_cast %386 : vector<1x1x128xf32> to vector<1x128xf32>
    %388 = vector.broadcast %387 : vector<1x128xf32> to vector<8x128xf32>
    %389 = arith.addf %385, %388 : vector<8x128xf32>
    %c1_91 = arith.constant 1 : index
    %c0_92 = arith.constant 0 : index
    %c0_93 = arith.constant 0 : index
    %390 = vector.load %arg8[%c1_91, %c0_92, %c0_93] : memref<2x32x128xf32, #tpu.memory_space<vmem>>, vector<1x32x128xf32>
    %391 = vector.shape_cast %390 : vector<1x32x128xf32> to vector<32x128xf32>
    %392 = arith.truncf %391 : vector<32x128xf32> to vector<32x128xbf16>
    %cst_94 = arith.constant 0.000000e+00 : f32
    %393 = vector.broadcast %cst_94 : f32 to vector<1x32xf32>
    %cst_95 = arith.constant 0.000000e+00 : f32
    %394 = vector.broadcast %cst_95 : f32 to vector<1x32xf32>
    %cst_96 = arith.constant 0.000000e+00 : f32
    %395 = vector.broadcast %cst_96 : f32 to vector<8x32xf32>
    %c0_i32_97 = arith.constant 0 : i32
    %396 = vector.broadcast %c0_i32_97 : i32 to vector<1x8xi32>
    %397 = arith.cmpi eq, %29, %396 : vector<1x8xi32>
    %398 = arith.extui %397 : vector<1x8xi1> to vector<1x8xi32>
    %399 = arith.sitofp %398 : vector<1x8xi32> to vector<1x8xf32>
    %cst_98 = arith.constant dense<0.000000e+00> : vector<1x128xf32>
    %400 = tpu.matmul %399, %389, %cst_98 {dimension_numbers = #tpu.dot_dimension_numbers<[1], [0], [0], [1], [0, 0, 1, 1], [], []>} : vector<1x8xf32>, vector<8x128xf32>, vector<1x128xf32> -> vector<1x128xf32>
    %401 = arith.truncf %393 : vector<1x32xf32> to vector<1x32xbf16>
    %cst_99 = arith.constant dense<0.000000e+00> : vector<1x128xf32>
    %402 = tpu.matmul %401, %392, %cst_99 {dimension_numbers = #tpu.dot_dimension_numbers<[1], [0], [0], [1], [0, 0, 1, 1], [], []>} : vector<1x32xbf16>, vector<32x128xbf16>, vector<1x128xf32> -> vector<1x128xf32>
    %403 = arith.addf %400, %402 : vector<1x128xf32>
    %404 = vector.extract_strided_slice %403 {offsets = [0, 0], sizes = [1, 32], strides = [1, 1]} : vector<1x128xf32> to vector<1x32xf32>
    %405 = arith.negf %404 : vector<1x32xf32>
    %406 = math.exp %405 : vector<1x32xf32>
    %cst_100 = arith.constant 1.000000e+00 : f32
    %407 = vector.broadcast %cst_100 : f32 to vector<1x32xf32>
    %408 = arith.addf %407, %406 : vector<1x32xf32>
    %409 = arith.divf %407, %408 : vector<1x32xf32>
    %410 = vector.extract_strided_slice %403 {offsets = [0, 32], sizes = [1, 32], strides = [1, 1]} : vector<1x128xf32> to vector<1x32xf32>
    %411 = arith.negf %410 : vector<1x32xf32>
    %412 = math.exp %411 : vector<1x32xf32>
    %cst_101 = arith.constant 1.000000e+00 : f32
    %413 = vector.broadcast %cst_101 : f32 to vector<1x32xf32>
    %414 = arith.addf %413, %412 : vector<1x32xf32>
    %415 = arith.divf %413, %414 : vector<1x32xf32>
    %416 = vector.extract_strided_slice %403 {offsets = [0, 64], sizes = [1, 32], strides = [1, 1]} : vector<1x128xf32> to vector<1x32xf32>
    %417 = math.tanh %416 : vector<1x32xf32>
    %418 = vector.extract_strided_slice %403 {offsets = [0, 96], sizes = [1, 32], strides = [1, 1]} : vector<1x128xf32> to vector<1x32xf32>
    %419 = arith.negf %418 : vector<1x32xf32>
    %420 = math.exp %419 : vector<1x32xf32>
    %cst_102 = arith.constant 1.000000e+00 : f32
    %421 = vector.broadcast %cst_102 : f32 to vector<1x32xf32>
    %422 = arith.addf %421, %420 : vector<1x32xf32>
    %423 = arith.divf %421, %422 : vector<1x32xf32>
    %424 = arith.mulf %415, %394 : vector<1x32xf32>
    %425 = arith.mulf %409, %417 : vector<1x32xf32>
    %426 = arith.addf %424, %425 : vector<1x32xf32>
    %427 = math.tanh %426 : vector<1x32xf32>
    %428 = arith.mulf %423, %427 : vector<1x32xf32>
    %c0_i32_103 = arith.constant 0 : i32
    %429 = vector.broadcast %c0_i32_103 : i32 to vector<8x1xi32>
    %430 = arith.cmpi eq, %28, %429 : vector<8x1xi32>
    %cst_104 = arith.constant 0.000000e+00 : f32
    %431 = vector.shape_cast %430 : vector<8x1xi1> to vector<8x1xi1>
    %432 = vector.broadcast %431 : vector<8x1xi1> to vector<8x32xi1>
    %433 = vector.shape_cast %428 : vector<1x32xf32> to vector<1x32xf32>
    %434 = vector.broadcast %433 : vector<1x32xf32> to vector<8x32xf32>
    %435 = vector.broadcast %cst_104 : f32 to vector<8x32xf32>
    %436 = arith.select %432, %434, %435 : vector<8x32xi1>, vector<8x32xf32>
    %437 = arith.addf %395, %436 : vector<8x32xf32>
    %c1_i32_105 = arith.constant 1 : i32
    %438 = vector.broadcast %c1_i32_105 : i32 to vector<1x8xi32>
    %439 = arith.cmpi eq, %29, %438 : vector<1x8xi32>
    %440 = arith.extui %439 : vector<1x8xi1> to vector<1x8xi32>
    %441 = arith.sitofp %440 : vector<1x8xi32> to vector<1x8xf32>
    %cst_106 = arith.constant dense<0.000000e+00> : vector<1x128xf32>
    %442 = tpu.matmul %441, %389, %cst_106 {dimension_numbers = #tpu.dot_dimension_numbers<[1], [0], [0], [1], [0, 0, 1, 1], [], []>} : vector<1x8xf32>, vector<8x128xf32>, vector<1x128xf32> -> vector<1x128xf32>
    %443 = arith.truncf %428 : vector<1x32xf32> to vector<1x32xbf16>
    %cst_107 = arith.constant dense<0.000000e+00> : vector<1x128xf32>
    %444 = tpu.matmul %443, %392, %cst_107 {dimension_numbers = #tpu.dot_dimension_numbers<[1], [0], [0], [1], [0, 0, 1, 1], [], []>} : vector<1x32xbf16>, vector<32x128xbf16>, vector<1x128xf32> -> vector<1x128xf32>
    %445 = arith.addf %442, %444 : vector<1x128xf32>
    %446 = vector.extract_strided_slice %445 {offsets = [0, 0], sizes = [1, 32], strides = [1, 1]} : vector<1x128xf32> to vector<1x32xf32>
    %447 = arith.negf %446 : vector<1x32xf32>
    %448 = math.exp %447 : vector<1x32xf32>
    %cst_108 = arith.constant 1.000000e+00 : f32
    %449 = vector.broadcast %cst_108 : f32 to vector<1x32xf32>
    %450 = arith.addf %449, %448 : vector<1x32xf32>
    %451 = arith.divf %449, %450 : vector<1x32xf32>
    %452 = vector.extract_strided_slice %445 {offsets = [0, 32], sizes = [1, 32], strides = [1, 1]} : vector<1x128xf32> to vector<1x32xf32>
    %453 = arith.negf %452 : vector<1x32xf32>
    %454 = math.exp %453 : vector<1x32xf32>
    %cst_109 = arith.constant 1.000000e+00 : f32
    %455 = vector.broadcast %cst_109 : f32 to vector<1x32xf32>
    %456 = arith.addf %455, %454 : vector<1x32xf32>
    %457 = arith.divf %455, %456 : vector<1x32xf32>
    %458 = vector.extract_strided_slice %445 {offsets = [0, 64], sizes = [1, 32], strides = [1, 1]} : vector<1x128xf32> to vector<1x32xf32>
    %459 = math.tanh %458 : vector<1x32xf32>
    %460 = vector.extract_strided_slice %445 {offsets = [0, 96], sizes = [1, 32], strides = [1, 1]} : vector<1x128xf32> to vector<1x32xf32>
    %461 = arith.negf %460 : vector<1x32xf32>
    %462 = math.exp %461 : vector<1x32xf32>
    %cst_110 = arith.constant 1.000000e+00 : f32
    %463 = vector.broadcast %cst_110 : f32 to vector<1x32xf32>
    %464 = arith.addf %463, %462 : vector<1x32xf32>
    %465 = arith.divf %463, %464 : vector<1x32xf32>
    %466 = arith.mulf %457, %426 : vector<1x32xf32>
    %467 = arith.mulf %451, %459 : vector<1x32xf32>
    %468 = arith.addf %466, %467 : vector<1x32xf32>
    %469 = math.tanh %468 : vector<1x32xf32>
    %470 = arith.mulf %465, %469 : vector<1x32xf32>
    %c1_i32_111 = arith.constant 1 : i32
    %471 = vector.broadcast %c1_i32_111 : i32 to vector<8x1xi32>
    %472 = arith.cmpi eq, %28, %471 : vector<8x1xi32>
    %cst_112 = arith.constant 0.000000e+00 : f32
    %473 = vector.shape_cast %472 : vector<8x1xi1> to vector<8x1xi1>
    %474 = vector.broadcast %473 : vector<8x1xi1> to vector<8x32xi1>
    %475 = vector.shape_cast %470 : vector<1x32xf32> to vector<1x32xf32>
    %476 = vector.broadcast %475 : vector<1x32xf32> to vector<8x32xf32>
    %477 = vector.broadcast %cst_112 : f32 to vector<8x32xf32>
    %478 = arith.select %474, %476, %477 : vector<8x32xi1>, vector<8x32xf32>
    %479 = arith.addf %437, %478 : vector<8x32xf32>
    %c2_i32_113 = arith.constant 2 : i32
    %480 = vector.broadcast %c2_i32_113 : i32 to vector<1x8xi32>
    %481 = arith.cmpi eq, %29, %480 : vector<1x8xi32>
    %482 = arith.extui %481 : vector<1x8xi1> to vector<1x8xi32>
    %483 = arith.sitofp %482 : vector<1x8xi32> to vector<1x8xf32>
    %cst_114 = arith.constant dense<0.000000e+00> : vector<1x128xf32>
    %484 = tpu.matmul %483, %389, %cst_114 {dimension_numbers = #tpu.dot_dimension_numbers<[1], [0], [0], [1], [0, 0, 1, 1], [], []>} : vector<1x8xf32>, vector<8x128xf32>, vector<1x128xf32> -> vector<1x128xf32>
    %485 = arith.truncf %470 : vector<1x32xf32> to vector<1x32xbf16>
    %cst_115 = arith.constant dense<0.000000e+00> : vector<1x128xf32>
    %486 = tpu.matmul %485, %392, %cst_115 {dimension_numbers = #tpu.dot_dimension_numbers<[1], [0], [0], [1], [0, 0, 1, 1], [], []>} : vector<1x32xbf16>, vector<32x128xbf16>, vector<1x128xf32> -> vector<1x128xf32>
    %487 = arith.addf %484, %486 : vector<1x128xf32>
    %488 = vector.extract_strided_slice %487 {offsets = [0, 0], sizes = [1, 32], strides = [1, 1]} : vector<1x128xf32> to vector<1x32xf32>
    %489 = arith.negf %488 : vector<1x32xf32>
    %490 = math.exp %489 : vector<1x32xf32>
    %cst_116 = arith.constant 1.000000e+00 : f32
    %491 = vector.broadcast %cst_116 : f32 to vector<1x32xf32>
    %492 = arith.addf %491, %490 : vector<1x32xf32>
    %493 = arith.divf %491, %492 : vector<1x32xf32>
    %494 = vector.extract_strided_slice %487 {offsets = [0, 32], sizes = [1, 32], strides = [1, 1]} : vector<1x128xf32> to vector<1x32xf32>
    %495 = arith.negf %494 : vector<1x32xf32>
    %496 = math.exp %495 : vector<1x32xf32>
    %cst_117 = arith.constant 1.000000e+00 : f32
    %497 = vector.broadcast %cst_117 : f32 to vector<1x32xf32>
    %498 = arith.addf %497, %496 : vector<1x32xf32>
    %499 = arith.divf %497, %498 : vector<1x32xf32>
    %500 = vector.extract_strided_slice %487 {offsets = [0, 64], sizes = [1, 32], strides = [1, 1]} : vector<1x128xf32> to vector<1x32xf32>
    %501 = math.tanh %500 : vector<1x32xf32>
    %502 = vector.extract_strided_slice %487 {offsets = [0, 96], sizes = [1, 32], strides = [1, 1]} : vector<1x128xf32> to vector<1x32xf32>
    %503 = arith.negf %502 : vector<1x32xf32>
    %504 = math.exp %503 : vector<1x32xf32>
    %cst_118 = arith.constant 1.000000e+00 : f32
    %505 = vector.broadcast %cst_118 : f32 to vector<1x32xf32>
    %506 = arith.addf %505, %504 : vector<1x32xf32>
    %507 = arith.divf %505, %506 : vector<1x32xf32>
    %508 = arith.mulf %499, %468 : vector<1x32xf32>
    %509 = arith.mulf %493, %501 : vector<1x32xf32>
    %510 = arith.addf %508, %509 : vector<1x32xf32>
    %511 = math.tanh %510 : vector<1x32xf32>
    %512 = arith.mulf %507, %511 : vector<1x32xf32>
    %c2_i32_119 = arith.constant 2 : i32
    %513 = vector.broadcast %c2_i32_119 : i32 to vector<8x1xi32>
    %514 = arith.cmpi eq, %28, %513 : vector<8x1xi32>
    %cst_120 = arith.constant 0.000000e+00 : f32
    %515 = vector.shape_cast %514 : vector<8x1xi1> to vector<8x1xi1>
    %516 = vector.broadcast %515 : vector<8x1xi1> to vector<8x32xi1>
    %517 = vector.shape_cast %512 : vector<1x32xf32> to vector<1x32xf32>
    %518 = vector.broadcast %517 : vector<1x32xf32> to vector<8x32xf32>
    %519 = vector.broadcast %cst_120 : f32 to vector<8x32xf32>
    %520 = arith.select %516, %518, %519 : vector<8x32xi1>, vector<8x32xf32>
    %521 = arith.addf %479, %520 : vector<8x32xf32>
    %c3_i32_121 = arith.constant 3 : i32
    %522 = vector.broadcast %c3_i32_121 : i32 to vector<1x8xi32>
    %523 = arith.cmpi eq, %29, %522 : vector<1x8xi32>
    %524 = arith.extui %523 : vector<1x8xi1> to vector<1x8xi32>
    %525 = arith.sitofp %524 : vector<1x8xi32> to vector<1x8xf32>
    %cst_122 = arith.constant dense<0.000000e+00> : vector<1x128xf32>
    %526 = tpu.matmul %525, %389, %cst_122 {dimension_numbers = #tpu.dot_dimension_numbers<[1], [0], [0], [1], [0, 0, 1, 1], [], []>} : vector<1x8xf32>, vector<8x128xf32>, vector<1x128xf32> -> vector<1x128xf32>
    %527 = arith.truncf %512 : vector<1x32xf32> to vector<1x32xbf16>
    %cst_123 = arith.constant dense<0.000000e+00> : vector<1x128xf32>
    %528 = tpu.matmul %527, %392, %cst_123 {dimension_numbers = #tpu.dot_dimension_numbers<[1], [0], [0], [1], [0, 0, 1, 1], [], []>} : vector<1x32xbf16>, vector<32x128xbf16>, vector<1x128xf32> -> vector<1x128xf32>
    %529 = arith.addf %526, %528 : vector<1x128xf32>
    %530 = vector.extract_strided_slice %529 {offsets = [0, 0], sizes = [1, 32], strides = [1, 1]} : vector<1x128xf32> to vector<1x32xf32>
    %531 = arith.negf %530 : vector<1x32xf32>
    %532 = math.exp %531 : vector<1x32xf32>
    %cst_124 = arith.constant 1.000000e+00 : f32
    %533 = vector.broadcast %cst_124 : f32 to vector<1x32xf32>
    %534 = arith.addf %533, %532 : vector<1x32xf32>
    %535 = arith.divf %533, %534 : vector<1x32xf32>
    %536 = vector.extract_strided_slice %529 {offsets = [0, 32], sizes = [1, 32], strides = [1, 1]} : vector<1x128xf32> to vector<1x32xf32>
    %537 = arith.negf %536 : vector<1x32xf32>
    %538 = math.exp %537 : vector<1x32xf32>
    %cst_125 = arith.constant 1.000000e+00 : f32
    %539 = vector.broadcast %cst_125 : f32 to vector<1x32xf32>
    %540 = arith.addf %539, %538 : vector<1x32xf32>
    %541 = arith.divf %539, %540 : vector<1x32xf32>
    %542 = vector.extract_strided_slice %529 {offsets = [0, 64], sizes = [1, 32], strides = [1, 1]} : vector<1x128xf32> to vector<1x32xf32>
    %543 = math.tanh %542 : vector<1x32xf32>
    %544 = vector.extract_strided_slice %529 {offsets = [0, 96], sizes = [1, 32], strides = [1, 1]} : vector<1x128xf32> to vector<1x32xf32>
    %545 = arith.negf %544 : vector<1x32xf32>
    %546 = math.exp %545 : vector<1x32xf32>
    %cst_126 = arith.constant 1.000000e+00 : f32
    %547 = vector.broadcast %cst_126 : f32 to vector<1x32xf32>
    %548 = arith.addf %547, %546 : vector<1x32xf32>
    %549 = arith.divf %547, %548 : vector<1x32xf32>
    %550 = arith.mulf %541, %510 : vector<1x32xf32>
    %551 = arith.mulf %535, %543 : vector<1x32xf32>
    %552 = arith.addf %550, %551 : vector<1x32xf32>
    %553 = math.tanh %552 : vector<1x32xf32>
    %554 = arith.mulf %549, %553 : vector<1x32xf32>
    %c3_i32_127 = arith.constant 3 : i32
    %555 = vector.broadcast %c3_i32_127 : i32 to vector<8x1xi32>
    %556 = arith.cmpi eq, %28, %555 : vector<8x1xi32>
    %cst_128 = arith.constant 0.000000e+00 : f32
    %557 = vector.shape_cast %556 : vector<8x1xi1> to vector<8x1xi1>
    %558 = vector.broadcast %557 : vector<8x1xi1> to vector<8x32xi1>
    %559 = vector.shape_cast %554 : vector<1x32xf32> to vector<1x32xf32>
    %560 = vector.broadcast %559 : vector<1x32xf32> to vector<8x32xf32>
    %561 = vector.broadcast %cst_128 : f32 to vector<8x32xf32>
    %562 = arith.select %558, %560, %561 : vector<8x32xi1>, vector<8x32xf32>
    %563 = arith.addf %521, %562 : vector<8x32xf32>
    %c4_i32_129 = arith.constant 4 : i32
    %564 = vector.broadcast %c4_i32_129 : i32 to vector<1x8xi32>
    %565 = arith.cmpi eq, %29, %564 : vector<1x8xi32>
    %566 = arith.extui %565 : vector<1x8xi1> to vector<1x8xi32>
    %567 = arith.sitofp %566 : vector<1x8xi32> to vector<1x8xf32>
    %cst_130 = arith.constant dense<0.000000e+00> : vector<1x128xf32>
    %568 = tpu.matmul %567, %389, %cst_130 {dimension_numbers = #tpu.dot_dimension_numbers<[1], [0], [0], [1], [0, 0, 1, 1], [], []>} : vector<1x8xf32>, vector<8x128xf32>, vector<1x128xf32> -> vector<1x128xf32>
    %569 = arith.truncf %554 : vector<1x32xf32> to vector<1x32xbf16>
    %cst_131 = arith.constant dense<0.000000e+00> : vector<1x128xf32>
    %570 = tpu.matmul %569, %392, %cst_131 {dimension_numbers = #tpu.dot_dimension_numbers<[1], [0], [0], [1], [0, 0, 1, 1], [], []>} : vector<1x32xbf16>, vector<32x128xbf16>, vector<1x128xf32> -> vector<1x128xf32>
    %571 = arith.addf %568, %570 : vector<1x128xf32>
    %572 = vector.extract_strided_slice %571 {offsets = [0, 0], sizes = [1, 32], strides = [1, 1]} : vector<1x128xf32> to vector<1x32xf32>
    %573 = arith.negf %572 : vector<1x32xf32>
    %574 = math.exp %573 : vector<1x32xf32>
    %cst_132 = arith.constant 1.000000e+00 : f32
    %575 = vector.broadcast %cst_132 : f32 to vector<1x32xf32>
    %576 = arith.addf %575, %574 : vector<1x32xf32>
    %577 = arith.divf %575, %576 : vector<1x32xf32>
    %578 = vector.extract_strided_slice %571 {offsets = [0, 32], sizes = [1, 32], strides = [1, 1]} : vector<1x128xf32> to vector<1x32xf32>
    %579 = arith.negf %578 : vector<1x32xf32>
    %580 = math.exp %579 : vector<1x32xf32>
    %cst_133 = arith.constant 1.000000e+00 : f32
    %581 = vector.broadcast %cst_133 : f32 to vector<1x32xf32>
    %582 = arith.addf %581, %580 : vector<1x32xf32>
    %583 = arith.divf %581, %582 : vector<1x32xf32>
    %584 = vector.extract_strided_slice %571 {offsets = [0, 64], sizes = [1, 32], strides = [1, 1]} : vector<1x128xf32> to vector<1x32xf32>
    %585 = math.tanh %584 : vector<1x32xf32>
    %586 = vector.extract_strided_slice %571 {offsets = [0, 96], sizes = [1, 32], strides = [1, 1]} : vector<1x128xf32> to vector<1x32xf32>
    %587 = arith.negf %586 : vector<1x32xf32>
    %588 = math.exp %587 : vector<1x32xf32>
    %cst_134 = arith.constant 1.000000e+00 : f32
    %589 = vector.broadcast %cst_134 : f32 to vector<1x32xf32>
    %590 = arith.addf %589, %588 : vector<1x32xf32>
    %591 = arith.divf %589, %590 : vector<1x32xf32>
    %592 = arith.mulf %583, %552 : vector<1x32xf32>
    %593 = arith.mulf %577, %585 : vector<1x32xf32>
    %594 = arith.addf %592, %593 : vector<1x32xf32>
    %595 = math.tanh %594 : vector<1x32xf32>
    %596 = arith.mulf %591, %595 : vector<1x32xf32>
    %c4_i32_135 = arith.constant 4 : i32
    %597 = vector.broadcast %c4_i32_135 : i32 to vector<8x1xi32>
    %598 = arith.cmpi eq, %28, %597 : vector<8x1xi32>
    %cst_136 = arith.constant 0.000000e+00 : f32
    %599 = vector.shape_cast %598 : vector<8x1xi1> to vector<8x1xi1>
    %600 = vector.broadcast %599 : vector<8x1xi1> to vector<8x32xi1>
    %601 = vector.shape_cast %596 : vector<1x32xf32> to vector<1x32xf32>
    %602 = vector.broadcast %601 : vector<1x32xf32> to vector<8x32xf32>
    %603 = vector.broadcast %cst_136 : f32 to vector<8x32xf32>
    %604 = arith.select %600, %602, %603 : vector<8x32xi1>, vector<8x32xf32>
    %605 = arith.addf %563, %604 : vector<8x32xf32>
    %c5_i32_137 = arith.constant 5 : i32
    %606 = vector.broadcast %c5_i32_137 : i32 to vector<1x8xi32>
    %607 = arith.cmpi eq, %29, %606 : vector<1x8xi32>
    %608 = arith.extui %607 : vector<1x8xi1> to vector<1x8xi32>
    %609 = arith.sitofp %608 : vector<1x8xi32> to vector<1x8xf32>
    %cst_138 = arith.constant dense<0.000000e+00> : vector<1x128xf32>
    %610 = tpu.matmul %609, %389, %cst_138 {dimension_numbers = #tpu.dot_dimension_numbers<[1], [0], [0], [1], [0, 0, 1, 1], [], []>} : vector<1x8xf32>, vector<8x128xf32>, vector<1x128xf32> -> vector<1x128xf32>
    %611 = arith.truncf %596 : vector<1x32xf32> to vector<1x32xbf16>
    %cst_139 = arith.constant dense<0.000000e+00> : vector<1x128xf32>
    %612 = tpu.matmul %611, %392, %cst_139 {dimension_numbers = #tpu.dot_dimension_numbers<[1], [0], [0], [1], [0, 0, 1, 1], [], []>} : vector<1x32xbf16>, vector<32x128xbf16>, vector<1x128xf32> -> vector<1x128xf32>
    %613 = arith.addf %610, %612 : vector<1x128xf32>
    %614 = vector.extract_strided_slice %613 {offsets = [0, 0], sizes = [1, 32], strides = [1, 1]} : vector<1x128xf32> to vector<1x32xf32>
    %615 = arith.negf %614 : vector<1x32xf32>
    %616 = math.exp %615 : vector<1x32xf32>
    %cst_140 = arith.constant 1.000000e+00 : f32
    %617 = vector.broadcast %cst_140 : f32 to vector<1x32xf32>
    %618 = arith.addf %617, %616 : vector<1x32xf32>
    %619 = arith.divf %617, %618 : vector<1x32xf32>
    %620 = vector.extract_strided_slice %613 {offsets = [0, 32], sizes = [1, 32], strides = [1, 1]} : vector<1x128xf32> to vector<1x32xf32>
    %621 = arith.negf %620 : vector<1x32xf32>
    %622 = math.exp %621 : vector<1x32xf32>
    %cst_141 = arith.constant 1.000000e+00 : f32
    %623 = vector.broadcast %cst_141 : f32 to vector<1x32xf32>
    %624 = arith.addf %623, %622 : vector<1x32xf32>
    %625 = arith.divf %623, %624 : vector<1x32xf32>
    %626 = vector.extract_strided_slice %613 {offsets = [0, 64], sizes = [1, 32], strides = [1, 1]} : vector<1x128xf32> to vector<1x32xf32>
    %627 = math.tanh %626 : vector<1x32xf32>
    %628 = vector.extract_strided_slice %613 {offsets = [0, 96], sizes = [1, 32], strides = [1, 1]} : vector<1x128xf32> to vector<1x32xf32>
    %629 = arith.negf %628 : vector<1x32xf32>
    %630 = math.exp %629 : vector<1x32xf32>
    %cst_142 = arith.constant 1.000000e+00 : f32
    %631 = vector.broadcast %cst_142 : f32 to vector<1x32xf32>
    %632 = arith.addf %631, %630 : vector<1x32xf32>
    %633 = arith.divf %631, %632 : vector<1x32xf32>
    %634 = arith.mulf %625, %594 : vector<1x32xf32>
    %635 = arith.mulf %619, %627 : vector<1x32xf32>
    %636 = arith.addf %634, %635 : vector<1x32xf32>
    %637 = math.tanh %636 : vector<1x32xf32>
    %638 = arith.mulf %633, %637 : vector<1x32xf32>
    %c5_i32_143 = arith.constant 5 : i32
    %639 = vector.broadcast %c5_i32_143 : i32 to vector<8x1xi32>
    %640 = arith.cmpi eq, %28, %639 : vector<8x1xi32>
    %cst_144 = arith.constant 0.000000e+00 : f32
    %641 = vector.shape_cast %640 : vector<8x1xi1> to vector<8x1xi1>
    %642 = vector.broadcast %641 : vector<8x1xi1> to vector<8x32xi1>
    %643 = vector.shape_cast %638 : vector<1x32xf32> to vector<1x32xf32>
    %644 = vector.broadcast %643 : vector<1x32xf32> to vector<8x32xf32>
    %645 = vector.broadcast %cst_144 : f32 to vector<8x32xf32>
    %646 = arith.select %642, %644, %645 : vector<8x32xi1>, vector<8x32xf32>
    %647 = arith.addf %605, %646 : vector<8x32xf32>
    %c6_i32_145 = arith.constant 6 : i32
    %648 = vector.broadcast %c6_i32_145 : i32 to vector<1x8xi32>
    %649 = arith.cmpi eq, %29, %648 : vector<1x8xi32>
    %650 = arith.extui %649 : vector<1x8xi1> to vector<1x8xi32>
    %651 = arith.sitofp %650 : vector<1x8xi32> to vector<1x8xf32>
    %cst_146 = arith.constant dense<0.000000e+00> : vector<1x128xf32>
    %652 = tpu.matmul %651, %389, %cst_146 {dimension_numbers = #tpu.dot_dimension_numbers<[1], [0], [0], [1], [0, 0, 1, 1], [], []>} : vector<1x8xf32>, vector<8x128xf32>, vector<1x128xf32> -> vector<1x128xf32>
    %653 = arith.truncf %638 : vector<1x32xf32> to vector<1x32xbf16>
    %cst_147 = arith.constant dense<0.000000e+00> : vector<1x128xf32>
    %654 = tpu.matmul %653, %392, %cst_147 {dimension_numbers = #tpu.dot_dimension_numbers<[1], [0], [0], [1], [0, 0, 1, 1], [], []>} : vector<1x32xbf16>, vector<32x128xbf16>, vector<1x128xf32> -> vector<1x128xf32>
    %655 = arith.addf %652, %654 : vector<1x128xf32>
    %656 = vector.extract_strided_slice %655 {offsets = [0, 0], sizes = [1, 32], strides = [1, 1]} : vector<1x128xf32> to vector<1x32xf32>
    %657 = arith.negf %656 : vector<1x32xf32>
    %658 = math.exp %657 : vector<1x32xf32>
    %cst_148 = arith.constant 1.000000e+00 : f32
    %659 = vector.broadcast %cst_148 : f32 to vector<1x32xf32>
    %660 = arith.addf %659, %658 : vector<1x32xf32>
    %661 = arith.divf %659, %660 : vector<1x32xf32>
    %662 = vector.extract_strided_slice %655 {offsets = [0, 32], sizes = [1, 32], strides = [1, 1]} : vector<1x128xf32> to vector<1x32xf32>
    %663 = arith.negf %662 : vector<1x32xf32>
    %664 = math.exp %663 : vector<1x32xf32>
    %cst_149 = arith.constant 1.000000e+00 : f32
    %665 = vector.broadcast %cst_149 : f32 to vector<1x32xf32>
    %666 = arith.addf %665, %664 : vector<1x32xf32>
    %667 = arith.divf %665, %666 : vector<1x32xf32>
    %668 = vector.extract_strided_slice %655 {offsets = [0, 64], sizes = [1, 32], strides = [1, 1]} : vector<1x128xf32> to vector<1x32xf32>
    %669 = math.tanh %668 : vector<1x32xf32>
    %670 = vector.extract_strided_slice %655 {offsets = [0, 96], sizes = [1, 32], strides = [1, 1]} : vector<1x128xf32> to vector<1x32xf32>
    %671 = arith.negf %670 : vector<1x32xf32>
    %672 = math.exp %671 : vector<1x32xf32>
    %cst_150 = arith.constant 1.000000e+00 : f32
    %673 = vector.broadcast %cst_150 : f32 to vector<1x32xf32>
    %674 = arith.addf %673, %672 : vector<1x32xf32>
    %675 = arith.divf %673, %674 : vector<1x32xf32>
    %676 = arith.mulf %667, %636 : vector<1x32xf32>
    %677 = arith.mulf %661, %669 : vector<1x32xf32>
    %678 = arith.addf %676, %677 : vector<1x32xf32>
    %679 = math.tanh %678 : vector<1x32xf32>
    %680 = arith.mulf %675, %679 : vector<1x32xf32>
    %c6_i32_151 = arith.constant 6 : i32
    %681 = vector.broadcast %c6_i32_151 : i32 to vector<8x1xi32>
    %682 = arith.cmpi eq, %28, %681 : vector<8x1xi32>
    %cst_152 = arith.constant 0.000000e+00 : f32
    %683 = vector.shape_cast %682 : vector<8x1xi1> to vector<8x1xi1>
    %684 = vector.broadcast %683 : vector<8x1xi1> to vector<8x32xi1>
    %685 = vector.shape_cast %680 : vector<1x32xf32> to vector<1x32xf32>
    %686 = vector.broadcast %685 : vector<1x32xf32> to vector<8x32xf32>
    %687 = vector.broadcast %cst_152 : f32 to vector<8x32xf32>
    %688 = arith.select %684, %686, %687 : vector<8x32xi1>, vector<8x32xf32>
    %689 = arith.addf %647, %688 : vector<8x32xf32>
    %c7_i32_153 = arith.constant 7 : i32
    %690 = vector.broadcast %c7_i32_153 : i32 to vector<1x8xi32>
    %691 = arith.cmpi eq, %29, %690 : vector<1x8xi32>
    %692 = arith.extui %691 : vector<1x8xi1> to vector<1x8xi32>
    %693 = arith.sitofp %692 : vector<1x8xi32> to vector<1x8xf32>
    %cst_154 = arith.constant dense<0.000000e+00> : vector<1x128xf32>
    %694 = tpu.matmul %693, %389, %cst_154 {dimension_numbers = #tpu.dot_dimension_numbers<[1], [0], [0], [1], [0, 0, 1, 1], [], []>} : vector<1x8xf32>, vector<8x128xf32>, vector<1x128xf32> -> vector<1x128xf32>
    %695 = arith.truncf %680 : vector<1x32xf32> to vector<1x32xbf16>
    %cst_155 = arith.constant dense<0.000000e+00> : vector<1x128xf32>
    %696 = tpu.matmul %695, %392, %cst_155 {dimension_numbers = #tpu.dot_dimension_numbers<[1], [0], [0], [1], [0, 0, 1, 1], [], []>} : vector<1x32xbf16>, vector<32x128xbf16>, vector<1x128xf32> -> vector<1x128xf32>
    %697 = arith.addf %694, %696 : vector<1x128xf32>
    %698 = vector.extract_strided_slice %697 {offsets = [0, 0], sizes = [1, 32], strides = [1, 1]} : vector<1x128xf32> to vector<1x32xf32>
    %699 = arith.negf %698 : vector<1x32xf32>
    %700 = math.exp %699 : vector<1x32xf32>
    %cst_156 = arith.constant 1.000000e+00 : f32
    %701 = vector.broadcast %cst_156 : f32 to vector<1x32xf32>
    %702 = arith.addf %701, %700 : vector<1x32xf32>
    %703 = arith.divf %701, %702 : vector<1x32xf32>
    %704 = vector.extract_strided_slice %697 {offsets = [0, 32], sizes = [1, 32], strides = [1, 1]} : vector<1x128xf32> to vector<1x32xf32>
    %705 = arith.negf %704 : vector<1x32xf32>
    %706 = math.exp %705 : vector<1x32xf32>
    %cst_157 = arith.constant 1.000000e+00 : f32
    %707 = vector.broadcast %cst_157 : f32 to vector<1x32xf32>
    %708 = arith.addf %707, %706 : vector<1x32xf32>
    %709 = arith.divf %707, %708 : vector<1x32xf32>
    %710 = vector.extract_strided_slice %697 {offsets = [0, 64], sizes = [1, 32], strides = [1, 1]} : vector<1x128xf32> to vector<1x32xf32>
    %711 = math.tanh %710 : vector<1x32xf32>
    %712 = vector.extract_strided_slice %697 {offsets = [0, 96], sizes = [1, 32], strides = [1, 1]} : vector<1x128xf32> to vector<1x32xf32>
    %713 = arith.negf %712 : vector<1x32xf32>
    %714 = math.exp %713 : vector<1x32xf32>
    %cst_158 = arith.constant 1.000000e+00 : f32
    %715 = vector.broadcast %cst_158 : f32 to vector<1x32xf32>
    %716 = arith.addf %715, %714 : vector<1x32xf32>
    %717 = arith.divf %715, %716 : vector<1x32xf32>
    %718 = arith.mulf %709, %678 : vector<1x32xf32>
    %719 = arith.mulf %703, %711 : vector<1x32xf32>
    %720 = arith.addf %718, %719 : vector<1x32xf32>
    %721 = math.tanh %720 : vector<1x32xf32>
    %722 = arith.mulf %717, %721 : vector<1x32xf32>
    %c7_i32_159 = arith.constant 7 : i32
    %723 = vector.broadcast %c7_i32_159 : i32 to vector<8x1xi32>
    %724 = arith.cmpi eq, %28, %723 : vector<8x1xi32>
    %cst_160 = arith.constant 0.000000e+00 : f32
    %725 = vector.shape_cast %724 : vector<8x1xi1> to vector<8x1xi1>
    %726 = vector.broadcast %725 : vector<8x1xi1> to vector<8x32xi1>
    %727 = vector.shape_cast %722 : vector<1x32xf32> to vector<1x32xf32>
    %728 = vector.broadcast %727 : vector<1x32xf32> to vector<8x32xf32>
    %729 = vector.broadcast %cst_160 : f32 to vector<8x32xf32>
    %730 = arith.select %726, %728, %729 : vector<8x32xi1>, vector<8x32xf32>
    %731 = arith.addf %689, %730 : vector<8x32xf32>
    %cst_161 = arith.constant 0.000000e+00 : f32
    %732 = vector.broadcast %cst_161 : f32 to vector<8x32xf32>
    %733 = arith.cmpf ogt, %731, %732 : vector<8x32xf32>
    %734 = math.exp %731 : vector<8x32xf32>
    %cst_162 = arith.constant 1.000000e+00 : f32
    %735 = vector.broadcast %cst_162 : f32 to vector<8x32xf32>
    %736 = arith.subf %734, %735 : vector<8x32xf32>
    %cst_163 = arith.constant 1.67326319 : f32
    %737 = vector.broadcast %cst_163 : f32 to vector<8x32xf32>
    %738 = arith.mulf %737, %736 : vector<8x32xf32>
    %739 = arith.select %733, %731, %738 : vector<8x32xi1>, vector<8x32xf32>
    %cst_164 = arith.constant 1.05070102 : f32
    %740 = vector.broadcast %cst_164 : f32 to vector<8x32xf32>
    %741 = arith.mulf %740, %739 : vector<8x32xf32>
    %c0_165 = arith.constant 0 : index
    %c0_166 = arith.constant 0 : index
    %742 = vector.load %arg10[%c0_165, %c0_166] : memref<32x96xf32, #tpu.memory_space<vmem>>, vector<32x96xf32>
    %743 = arith.truncf %741 : vector<8x32xf32> to vector<8x32xbf16>
    %744 = arith.truncf %742 : vector<32x96xf32> to vector<32x96xbf16>
    %cst_167 = arith.constant dense<0.000000e+00> : vector<8x96xf32>
    %745 = tpu.matmul %743, %744, %cst_167 {dimension_numbers = #tpu.dot_dimension_numbers<[1], [0], [0], [1], [0, 0, 1, 1], [], []>} : vector<8x32xbf16>, vector<32x96xbf16>, vector<8x96xf32> -> vector<8x96xf32>
    %c0_168 = arith.constant 0 : index
    %c0_169 = arith.constant 0 : index
    %746 = vector.load %arg11[%c0_168, %c0_169] : memref<1x96xf32, #tpu.memory_space<vmem>>, vector<1x96xf32>
    %747 = vector.broadcast %746 : vector<1x96xf32> to vector<8x96xf32>
    %748 = arith.addf %745, %747 : vector<8x96xf32>
    %749 = vector.extract_strided_slice %748 {offsets = [0, 0], sizes = [8, 32], strides = [1, 1]} : vector<8x96xf32> to vector<8x32xf32>
    %750 = vector.extract_strided_slice %748 {offsets = [0, 32], sizes = [8, 32], strides = [1, 1]} : vector<8x96xf32> to vector<8x32xf32>
    %751 = vector.extract_strided_slice %748 {offsets = [0, 64], sizes = [8, 32], strides = [1, 1]} : vector<8x96xf32> to vector<8x32xf32>
    %c0_170 = arith.constant 0 : index
    %c0_171 = arith.constant 0 : index
    %c0_172 = arith.constant 0 : index
    %752 = vector.load %arg2[%c0_170, %c0_171, %c0_172] : memref<1x1x8xf32, #tpu.memory_space<vmem>>, vector<1x1x8xf32>
    %753 = vector.shape_cast %752 : vector<1x1x8xf32> to vector<1x8xf32>
    %c0_173 = arith.constant 0 : index
    %c0_174 = arith.constant 0 : index
    %754 = vector.load %arg12[%c0_173, %c0_174] : memref<32x32xf32, #tpu.memory_space<vmem>>, vector<32x32xf32>
    %c0_175 = arith.constant 0 : index
    %c0_176 = arith.constant 0 : index
    %755 = vector.load %arg13[%c0_175, %c0_176] : memref<1x32xf32, #tpu.memory_space<vmem>>, vector<1x32xf32>
    %756 = tpu.iota {dimensions = array<i32: 1>} : vector<1x32xi32>
    %cst_177 = arith.constant 0.000000e+00 : f32
    %757 = vector.broadcast %cst_177 : f32 to vector<8x32xf32>
    %c0_i32_178 = arith.constant 0 : i32
    %758 = vector.broadcast %c0_i32_178 : i32 to vector<1x32xi32>
    %759 = arith.cmpi sge, %756, %758 : vector<1x32xi32>
    %c8_i32 = arith.constant 8 : i32
    %760 = vector.broadcast %c8_i32 : i32 to vector<1x32xi32>
    %761 = arith.cmpi slt, %756, %760 : vector<1x32xi32>
    %762 = arith.andi %759, %761 : vector<1x32xi1>
    %763 = arith.extui %762 : vector<1x32xi1> to vector<1x32xi32>
    %764 = arith.sitofp %763 : vector<1x32xi32> to vector<1x32xf32>
    %765 = vector.broadcast %764 : vector<1x32xf32> to vector<8x32xf32>
    %766 = arith.mulf %749, %765 : vector<8x32xf32>
    %767 = arith.truncf %766 : vector<8x32xf32> to vector<8x32xbf16>
    %768 = arith.truncf %750 : vector<8x32xf32> to vector<8x32xbf16>
    %cst_179 = arith.constant dense<0.000000e+00> : vector<8x8xf32>
    %769 = tpu.matmul %767, %768, %cst_179 {dimension_numbers = #tpu.dot_dimension_numbers<[1], [1], [0], [0], [0, 0, 1, 0], [], []>} : vector<8x32xbf16>, vector<8x32xbf16>, vector<8x8xf32> -> vector<8x8xf32>
    %cst_180 = arith.constant 0.353553385 : f32
    %770 = vector.broadcast %cst_180 : f32 to vector<8x8xf32>
    %771 = arith.mulf %769, %770 : vector<8x8xf32>
    %772 = vector.broadcast %753 : vector<1x8xf32> to vector<8x8xf32>
    %773 = arith.addf %771, %772 : vector<8x8xf32>
    %cst_181 = arith.constant dense<0xFF800000> : vector<8xf32>
    %774 = vector.multi_reduction <maximumf>, %773, %cst_181 [1] : vector<8x8xf32> to vector<8xf32>
    %775 = vector.shape_cast %774 : vector<8xf32> to vector<8x1xf32>
    %776 = vector.broadcast %775 : vector<8x1xf32> to vector<8x8xf32>
    %777 = arith.subf %773, %776 : vector<8x8xf32>
    %778 = math.exp %777 : vector<8x8xf32>
    %cst_182 = arith.constant dense<0.000000e+00> : vector<8xf32>
    %779 = vector.multi_reduction <add>, %778, %cst_182 [1] : vector<8x8xf32> to vector<8xf32>
    %780 = vector.shape_cast %779 : vector<8xf32> to vector<8x1xf32>
    %781 = tpu.reciprocal %780 {approx = true} : vector<8x1xf32> -> vector<8x1xf32>
    %782 = vector.broadcast %781 : vector<8x1xf32> to vector<8x8xf32>
    %783 = arith.mulf %778, %782 : vector<8x8xf32>
    %784 = arith.truncf %783 : vector<8x8xf32> to vector<8x8xbf16>
    %785 = arith.truncf %751 : vector<8x32xf32> to vector<8x32xbf16>
    %cst_183 = arith.constant dense<0.000000e+00> : vector<8x32xf32>
    %786 = tpu.matmul %784, %785, %cst_183 {dimension_numbers = #tpu.dot_dimension_numbers<[1], [0], [0], [1], [0, 0, 1, 1], [], []>} : vector<8x8xbf16>, vector<8x32xbf16>, vector<8x32xf32> -> vector<8x32xf32>
    %787 = vector.broadcast %764 : vector<1x32xf32> to vector<8x32xf32>
    %788 = arith.mulf %786, %787 : vector<8x32xf32>
    %789 = arith.addf %757, %788 : vector<8x32xf32>
    %c8_i32_184 = arith.constant 8 : i32
    %790 = vector.broadcast %c8_i32_184 : i32 to vector<1x32xi32>
    %791 = arith.cmpi sge, %756, %790 : vector<1x32xi32>
    %c16_i32 = arith.constant 16 : i32
    %792 = vector.broadcast %c16_i32 : i32 to vector<1x32xi32>
    %793 = arith.cmpi slt, %756, %792 : vector<1x32xi32>
    %794 = arith.andi %791, %793 : vector<1x32xi1>
    %795 = arith.extui %794 : vector<1x32xi1> to vector<1x32xi32>
    %796 = arith.sitofp %795 : vector<1x32xi32> to vector<1x32xf32>
    %797 = vector.broadcast %796 : vector<1x32xf32> to vector<8x32xf32>
    %798 = arith.mulf %749, %797 : vector<8x32xf32>
    %799 = arith.truncf %798 : vector<8x32xf32> to vector<8x32xbf16>
    %800 = arith.truncf %750 : vector<8x32xf32> to vector<8x32xbf16>
    %cst_185 = arith.constant dense<0.000000e+00> : vector<8x8xf32>
    %801 = tpu.matmul %799, %800, %cst_185 {dimension_numbers = #tpu.dot_dimension_numbers<[1], [1], [0], [0], [0, 0, 1, 0], [], []>} : vector<8x32xbf16>, vector<8x32xbf16>, vector<8x8xf32> -> vector<8x8xf32>
    %cst_186 = arith.constant 0.353553385 : f32
    %802 = vector.broadcast %cst_186 : f32 to vector<8x8xf32>
    %803 = arith.mulf %801, %802 : vector<8x8xf32>
    %804 = vector.broadcast %753 : vector<1x8xf32> to vector<8x8xf32>
    %805 = arith.addf %803, %804 : vector<8x8xf32>
    %cst_187 = arith.constant dense<0xFF800000> : vector<8xf32>
    %806 = vector.multi_reduction <maximumf>, %805, %cst_187 [1] : vector<8x8xf32> to vector<8xf32>
    %807 = vector.shape_cast %806 : vector<8xf32> to vector<8x1xf32>
    %808 = vector.broadcast %807 : vector<8x1xf32> to vector<8x8xf32>
    %809 = arith.subf %805, %808 : vector<8x8xf32>
    %810 = math.exp %809 : vector<8x8xf32>
    %cst_188 = arith.constant dense<0.000000e+00> : vector<8xf32>
    %811 = vector.multi_reduction <add>, %810, %cst_188 [1] : vector<8x8xf32> to vector<8xf32>
    %812 = vector.shape_cast %811 : vector<8xf32> to vector<8x1xf32>
    %813 = tpu.reciprocal %812 {approx = true} : vector<8x1xf32> -> vector<8x1xf32>
    %814 = vector.broadcast %813 : vector<8x1xf32> to vector<8x8xf32>
    %815 = arith.mulf %810, %814 : vector<8x8xf32>
    %816 = arith.truncf %815 : vector<8x8xf32> to vector<8x8xbf16>
    %817 = arith.truncf %751 : vector<8x32xf32> to vector<8x32xbf16>
    %cst_189 = arith.constant dense<0.000000e+00> : vector<8x32xf32>
    %818 = tpu.matmul %816, %817, %cst_189 {dimension_numbers = #tpu.dot_dimension_numbers<[1], [0], [0], [1], [0, 0, 1, 1], [], []>} : vector<8x8xbf16>, vector<8x32xbf16>, vector<8x32xf32> -> vector<8x32xf32>
    %819 = vector.broadcast %796 : vector<1x32xf32> to vector<8x32xf32>
    %820 = arith.mulf %818, %819 : vector<8x32xf32>
    %821 = arith.addf %789, %820 : vector<8x32xf32>
    %c16_i32_190 = arith.constant 16 : i32
    %822 = vector.broadcast %c16_i32_190 : i32 to vector<1x32xi32>
    %823 = arith.cmpi sge, %756, %822 : vector<1x32xi32>
    %c24_i32 = arith.constant 24 : i32
    %824 = vector.broadcast %c24_i32 : i32 to vector<1x32xi32>
    %825 = arith.cmpi slt, %756, %824 : vector<1x32xi32>
    %826 = arith.andi %823, %825 : vector<1x32xi1>
    %827 = arith.extui %826 : vector<1x32xi1> to vector<1x32xi32>
    %828 = arith.sitofp %827 : vector<1x32xi32> to vector<1x32xf32>
    %829 = vector.broadcast %828 : vector<1x32xf32> to vector<8x32xf32>
    %830 = arith.mulf %749, %829 : vector<8x32xf32>
    %831 = arith.truncf %830 : vector<8x32xf32> to vector<8x32xbf16>
    %832 = arith.truncf %750 : vector<8x32xf32> to vector<8x32xbf16>
    %cst_191 = arith.constant dense<0.000000e+00> : vector<8x8xf32>
    %833 = tpu.matmul %831, %832, %cst_191 {dimension_numbers = #tpu.dot_dimension_numbers<[1], [1], [0], [0], [0, 0, 1, 0], [], []>} : vector<8x32xbf16>, vector<8x32xbf16>, vector<8x8xf32> -> vector<8x8xf32>
    %cst_192 = arith.constant 0.353553385 : f32
    %834 = vector.broadcast %cst_192 : f32 to vector<8x8xf32>
    %835 = arith.mulf %833, %834 : vector<8x8xf32>
    %836 = vector.broadcast %753 : vector<1x8xf32> to vector<8x8xf32>
    %837 = arith.addf %835, %836 : vector<8x8xf32>
    %cst_193 = arith.constant dense<0xFF800000> : vector<8xf32>
    %838 = vector.multi_reduction <maximumf>, %837, %cst_193 [1] : vector<8x8xf32> to vector<8xf32>
    %839 = vector.shape_cast %838 : vector<8xf32> to vector<8x1xf32>
    %840 = vector.broadcast %839 : vector<8x1xf32> to vector<8x8xf32>
    %841 = arith.subf %837, %840 : vector<8x8xf32>
    %842 = math.exp %841 : vector<8x8xf32>
    %cst_194 = arith.constant dense<0.000000e+00> : vector<8xf32>
    %843 = vector.multi_reduction <add>, %842, %cst_194 [1] : vector<8x8xf32> to vector<8xf32>
    %844 = vector.shape_cast %843 : vector<8xf32> to vector<8x1xf32>
    %845 = tpu.reciprocal %844 {approx = true} : vector<8x1xf32> -> vector<8x1xf32>
    %846 = vector.broadcast %845 : vector<8x1xf32> to vector<8x8xf32>
    %847 = arith.mulf %842, %846 : vector<8x8xf32>
    %848 = arith.truncf %847 : vector<8x8xf32> to vector<8x8xbf16>
    %849 = arith.truncf %751 : vector<8x32xf32> to vector<8x32xbf16>
    %cst_195 = arith.constant dense<0.000000e+00> : vector<8x32xf32>
    %850 = tpu.matmul %848, %849, %cst_195 {dimension_numbers = #tpu.dot_dimension_numbers<[1], [0], [0], [1], [0, 0, 1, 1], [], []>} : vector<8x8xbf16>, vector<8x32xbf16>, vector<8x32xf32> -> vector<8x32xf32>
    %851 = vector.broadcast %828 : vector<1x32xf32> to vector<8x32xf32>
    %852 = arith.mulf %850, %851 : vector<8x32xf32>
    %853 = arith.addf %821, %852 : vector<8x32xf32>
    %c24_i32_196 = arith.constant 24 : i32
    %854 = vector.broadcast %c24_i32_196 : i32 to vector<1x32xi32>
    %855 = arith.cmpi sge, %756, %854 : vector<1x32xi32>
    %c32_i32 = arith.constant 32 : i32
    %856 = vector.broadcast %c32_i32 : i32 to vector<1x32xi32>
    %857 = arith.cmpi slt, %756, %856 : vector<1x32xi32>
    %858 = arith.andi %855, %857 : vector<1x32xi1>
    %859 = arith.extui %858 : vector<1x32xi1> to vector<1x32xi32>
    %860 = arith.sitofp %859 : vector<1x32xi32> to vector<1x32xf32>
    %861 = vector.broadcast %860 : vector<1x32xf32> to vector<8x32xf32>
    %862 = arith.mulf %749, %861 : vector<8x32xf32>
    %863 = arith.truncf %862 : vector<8x32xf32> to vector<8x32xbf16>
    %864 = arith.truncf %750 : vector<8x32xf32> to vector<8x32xbf16>
    %cst_197 = arith.constant dense<0.000000e+00> : vector<8x8xf32>
    %865 = tpu.matmul %863, %864, %cst_197 {dimension_numbers = #tpu.dot_dimension_numbers<[1], [1], [0], [0], [0, 0, 1, 0], [], []>} : vector<8x32xbf16>, vector<8x32xbf16>, vector<8x8xf32> -> vector<8x8xf32>
    %cst_198 = arith.constant 0.353553385 : f32
    %866 = vector.broadcast %cst_198 : f32 to vector<8x8xf32>
    %867 = arith.mulf %865, %866 : vector<8x8xf32>
    %868 = vector.broadcast %753 : vector<1x8xf32> to vector<8x8xf32>
    %869 = arith.addf %867, %868 : vector<8x8xf32>
    %cst_199 = arith.constant dense<0xFF800000> : vector<8xf32>
    %870 = vector.multi_reduction <maximumf>, %869, %cst_199 [1] : vector<8x8xf32> to vector<8xf32>
    %871 = vector.shape_cast %870 : vector<8xf32> to vector<8x1xf32>
    %872 = vector.broadcast %871 : vector<8x1xf32> to vector<8x8xf32>
    %873 = arith.subf %869, %872 : vector<8x8xf32>
    %874 = math.exp %873 : vector<8x8xf32>
    %cst_200 = arith.constant dense<0.000000e+00> : vector<8xf32>
    %875 = vector.multi_reduction <add>, %874, %cst_200 [1] : vector<8x8xf32> to vector<8xf32>
    %876 = vector.shape_cast %875 : vector<8xf32> to vector<8x1xf32>
    %877 = tpu.reciprocal %876 {approx = true} : vector<8x1xf32> -> vector<8x1xf32>
    %878 = vector.broadcast %877 : vector<8x1xf32> to vector<8x8xf32>
    %879 = arith.mulf %874, %878 : vector<8x8xf32>
    %880 = arith.truncf %879 : vector<8x8xf32> to vector<8x8xbf16>
    %881 = arith.truncf %751 : vector<8x32xf32> to vector<8x32xbf16>
    %cst_201 = arith.constant dense<0.000000e+00> : vector<8x32xf32>
    %882 = tpu.matmul %880, %881, %cst_201 {dimension_numbers = #tpu.dot_dimension_numbers<[1], [0], [0], [1], [0, 0, 1, 1], [], []>} : vector<8x8xbf16>, vector<8x32xbf16>, vector<8x32xf32> -> vector<8x32xf32>
    %883 = vector.broadcast %860 : vector<1x32xf32> to vector<8x32xf32>
    %884 = arith.mulf %882, %883 : vector<8x32xf32>
    %885 = arith.addf %853, %884 : vector<8x32xf32>
    %886 = arith.truncf %885 : vector<8x32xf32> to vector<8x32xbf16>
    %887 = arith.truncf %754 : vector<32x32xf32> to vector<32x32xbf16>
    %cst_202 = arith.constant dense<0.000000e+00> : vector<8x32xf32>
    %888 = tpu.matmul %886, %887, %cst_202 {dimension_numbers = #tpu.dot_dimension_numbers<[1], [0], [0], [1], [0, 0, 1, 1], [], []>} : vector<8x32xbf16>, vector<32x32xbf16>, vector<8x32xf32> -> vector<8x32xf32>
    %889 = vector.broadcast %755 : vector<1x32xf32> to vector<8x32xf32>
    %890 = arith.addf %888, %889 : vector<8x32xf32>
    %c0_203 = arith.constant 0 : index
    %c0_204 = arith.constant 0 : index
    %c0_205 = arith.constant 0 : index
    %891 = vector.load %arg14[%c0_203, %c0_204, %c0_205] : memref<1x8x32xf32, #tpu.memory_space<vmem>>, vector<1x8x32xf32>
    %892 = vector.shape_cast %891 : vector<1x8x32xf32> to vector<8x32xf32>
    %893 = vector.shape_cast %890 : vector<8x32xf32> to vector<1x8x32xf32>
    tpu.vector_store %arg14[%c0_203, %c0_204, %c0_205], %893 {strides = array<i32>} : memref<1x8x32xf32, #tpu.memory_space<vmem>>, vector<1x8x32xf32>,
    return
  }
  func.func @transform_0(%arg0: i32) -> (i32, i32, i32) {
    %c0_i32 = arith.constant 0 : i32
    %c0_i32_0 = arith.constant 0 : i32
    %c0_i32_1 = arith.constant 0 : i32
    return %arg0, %c0_i32, %c0_i32_0 : i32, i32, i32
  }
  func.func @transform_1(%arg0: i32) -> (i32, i32, i32) {
    %c0_i32 = arith.constant 0 : i32
    %c0_i32_0 = arith.constant 0 : i32
    %c0_i32_1 = arith.constant 0 : i32
    return %arg0, %c0_i32, %c0_i32_0 : i32, i32, i32
  }
  func.func @transform_2(%arg0: i32) -> (i32, i32) {
    %c0_i32 = arith.constant 0 : i32
    %c0_i32_0 = arith.constant 0 : i32
    %c0_i32_1 = arith.constant 0 : i32
    return %c0_i32, %c0_i32_0 : i32, i32
  }
  func.func @transform_3(%arg0: i32) -> (i32, i32) {
    %c0_i32 = arith.constant 0 : i32
    %c0_i32_0 = arith.constant 0 : i32
    %c0_i32_1 = arith.constant 0 : i32
    return %c0_i32, %c0_i32_0 : i32, i32
  }
  func.func @transform_4(%arg0: i32) -> (i32, i32) {
    %c0_i32 = arith.constant 0 : i32
    %c0_i32_0 = arith.constant 0 : i32
    %c0_i32_1 = arith.constant 0 : i32
    return %c0_i32, %c0_i32_0 : i32, i32
  }
  func.func @transform_5(%arg0: i32) -> (i32, i32) {
    %c0_i32 = arith.constant 0 : i32
    %c0_i32_0 = arith.constant 0 : i32
    %c0_i32_1 = arith.constant 0 : i32
    return %c0_i32, %c0_i32_0 : i32, i32
  }
  func.func @transform_6(%arg0: i32) -> (i32, i32, i32) {
    %c0_i32 = arith.constant 0 : i32
    %c0_i32_0 = arith.constant 0 : i32
    %c0_i32_1 = arith.constant 0 : i32
    %c0_i32_2 = arith.constant 0 : i32
    return %c0_i32, %c0_i32_0, %c0_i32_1 : i32, i32, i32
  }
  func.func @transform_7(%arg0: i32) -> (i32, i32, i32) {
    %c0_i32 = arith.constant 0 : i32
    %c0_i32_0 = arith.constant 0 : i32
    %c0_i32_1 = arith.constant 0 : i32
    %c0_i32_2 = arith.constant 0 : i32
    return %c0_i32, %c0_i32_0, %c0_i32_1 : i32, i32, i32
  }
  func.func @transform_8(%arg0: i32) -> (i32, i32, i32) {
    %c0_i32 = arith.constant 0 : i32
    %c0_i32_0 = arith.constant 0 : i32
    %c0_i32_1 = arith.constant 0 : i32
    %c0_i32_2 = arith.constant 0 : i32
    return %c0_i32, %c0_i32_0, %c0_i32_1 : i32, i32, i32
  }
  func.func @transform_9(%arg0: i32) -> (i32, i32) {
    %c0_i32 = arith.constant 0 : i32
    %c0_i32_0 = arith.constant 0 : i32
    %c0_i32_1 = arith.constant 0 : i32
    return %c0_i32, %c0_i32_0 : i32, i32
  }
  func.func @transform_10(%arg0: i32) -> (i32, i32) {
    %c0_i32 = arith.constant 0 : i32
    %c0_i32_0 = arith.constant 0 : i32
    %c0_i32_1 = arith.constant 0 : i32
    return %c0_i32, %c0_i32_0 : i32, i32
  }
  func.func @transform_11(%arg0: i32) -> (i32, i32) {
    %c0_i32 = arith.constant 0 : i32
    %c0_i32_0 = arith.constant 0 : i32
    %c0_i32_1 = arith.constant 0 : i32
    return %c0_i32, %c0_i32_0 : i32, i32
  }
  func.func @transform_12(%arg0: i32) -> (i32, i32) {
    %c0_i32 = arith.constant 0 : i32
    %c0_i32_0 = arith.constant 0 : i32
    %c0_i32_1 = arith.constant 0 : i32
    return %c0_i32, %c0_i32_0 : i32, i32
  }
  func.func @transform_13(%arg0: i32) -> (i32, i32, i32) {
    %c0_i32 = arith.constant 0 : i32
    %c0_i32_0 = arith.constant 0 : i32
    %c0_i32_1 = arith.constant 0 : i32
    return %arg0, %c0_i32, %c0_i32_0 : i32, i32, i32
  }
}

</mosaic_0001>

<bundles_post_ra>
// kernel: model_forward.3
= control target key start
LH: loop header
LB: loop body
LE: loop exit
PB: predicated region body
PF: predicated region fallthrough
CT: control target
= control target key end

     0   :  { %s2965_s0 = inlined_call_operand.vmem [shape: f32[2,1,8], index: 0, kind: input, shape index: {}]   ;;  %s2966_s1 = inlined_call_operand.vmem [shape: f32[2,1,8], index: 1, kind: input, shape index: {}]   ;;  %s2967_s2 = inlined_call_operand.vmem [shape: f32[2,1,8], index: 2, kind: input, shape index: {}]   ;;  %s2968_s3 = inlined_call_operand.vmem [shape: f32[2,8,8], index: 3, kind: input, shape index: {}]   ;;  %s2969_s4 = inlined_call_operand.vmem [shape: f32[2,8,32], index: 4, kind: input, shape index: {}]   ;;  %s2970_s5 = inlined_call_operand.vmem [shape: f32[2,1,8], index: 5, kind: input, shape index: {}]   ;;  %s2971_s6 = inlined_call_operand.vmem [shape: f32[8,32], index: 6, kind: input, shape index: {}]   ;;  %s2972_s7 = inlined_call_operand.vmem [shape: f32[1,32], index: 7, kind: input, shape index: {}]   ;;  %s2973_s8 = inlined_call_operand.vmem [shape: f32[8,32], index: 8, kind: input, shape index: {}]   ;;  %s2974_s9 = inlined_call_operand.vmem [shape: f32[1,32], index: 9, kind: input, shape index: {}]   ;;  %s2975_s10 = inlined_call_operand.vmem [shape: f32[8,32], index: 10, kind: input, shape index: {}]   ;;  %s2976_s11 = inlined_call_operand.vmem [shape: f32[1,32], index: 11, kind: input, shape index: {}]   ;;  %s2977_s12 = inlined_call_operand.vmem [shape: f32[8,32], index: 12, kind: input, shape index: {}]   ;;  %s2978_s13 = inlined_call_operand.vmem [shape: f32[8,1], index: 13, kind: input, shape index: {}]   ;;  %s2979_s14 = inlined_call_operand.vmem [shape: f32[8,32], index: 14, kind: input, shape index: {}]   ;;  %s2980_s15 = inlined_call_operand.vmem [shape: f32[32,32], index: 15, kind: input, shape index: {}]   ;;  %s2981_s16 = inlined_call_operand.vmem [shape: f32[1,32], index: 16, kind: input, shape index: {}]   ;;  %s2982_s17 = inlined_call_operand.vmem [shape: f32[32,64], index: 17, kind: input, shape index: {}]   ;;  %s2983_s18 = inlined_call_operand.vmem [shape: f32[1,64], index: 18, kind: input, shape index: {}]   ;;  %s2984_s19 = inlined_call_operand.vmem [shape: f32[32,32], index: 19, kind: input, shape index: {}]   ;;  %s2985_s20 = inlined_call_operand.vmem [shape: f32[1,32], index: 20, kind: input, shape index: {}]   ;;  %s2986_s21 = inlined_call_operand.vmem [shape: f32[32,16], index: 21, kind: input, shape index: {}]   ;;  %s2987_s22 = inlined_call_operand.vmem [shape: f32[1,16], index: 22, kind: input, shape index: {}]   ;;  %s2988_s23 = inlined_call_operand.vmem [shape: f32[16,2], index: 23, kind: input, shape index: {}]   ;;  %s2989_s24 = inlined_call_operand.vmem [shape: f32[1,2], index: 24, kind: input, shape index: {}]   ;;  %s2990_s25 = inlined_call_operand.hbm [shape: f32[2,1,2], index: 25, kind: output, shape index: {}]  }
   0x1   :  { %2996 = sst [smem:[#allocation11_spill]] %s2965_s0 }
   0x2   :  { %2997 = sst [smem:[#allocation12_spill]] %s2966_s1 }
   0x3   :  { %2998 = sst [smem:[#allocation13_spill]] %s2967_s2 }
   0x4   :  { %2999 = sst [smem:[#allocation14_spill]] %s2968_s3 }
   0x5   :  { %3000 = sst [smem:[#allocation15_spill]] %s2969_s4 }
   0x6   :  { %3001 = sst [smem:[#allocation16_spill]] %s2970_s5 }
   0x7   :  { %3002 = sst [smem:[#allocation17_spill]] %s2971_s6 }
   0x8   :  { %3003 = sst [smem:[#allocation18_spill]] %s2972_s7 }
   0x9   :  { %3004 = sst [smem:[#allocation19_spill]] %s2973_s8 }
   0xa   :  { %3005 = sst [smem:[#allocation20_spill]] %s2974_s9 }
   0xb   :  { %3006 = sst [smem:[#allocation21_spill]] %s2975_s10 }
   0xc   :  { %3007 = sst [smem:[#allocation22_spill]] %s2977_s12 }
   0xd   :  { %3008 = sst [smem:[#allocation23_spill]] %s2978_s13 }
   0xe   :  { %30 = vsyncpa [#allocation4], 0 }
   0xf   :  { %32 = vsyncpa [#allocation4 + $0x1], 0  ;;  %s2602_s29 = smov 0   ;;  %s2604_s2 = smov 0  }
  0x10   :  { %s2606_s6 = smov 0   ;;  %s2608_s30 = smov 0  }
  0x11 LB: > { %3009 = sst [smem:[#allocation6_spill]] %s2453_s29  ;;  %s2623_s7 = sadd.s32 4294967295, %s2465_s30   ;;  %s2465_s30 = sphi %s2608_s30, %s3031_s30   ;;  %s2461_s6 = sphi %s2606_s6, %s3033_s6   ;;  %s2457_s2 = sphi %s2604_s2, %s3035_s2   ;;  %s2453_s29 = sphi %s2602_s29, %s3034_s29  }
  0x12   : > { %3010 = sst [smem:[#allocation7_spill]] %s2461_s6  ;;  %s2116_s3 = sadd.s32 4294967294, %s2465_s30  }
  0x13   : > { %s2627_s26 = sadd.s32 1, %s2465_s30   ;;  %s600_s1 = sadd.s32 1, %s2461_s6 }
  0x14   : > { %3011 = sst [smem:[#allocation8_spill]] %s2627_s26  ;;  %s597_s8 = ssub.s32 %s2465_s30, %s2627_s26 }
  0x15   : > { %p610_p0 = scmp.ne.s32.totalorder %s2461_s6, %s2457_s2  ;;  %p598_p1 = scmp.eq.s32.totalorder %s597_s8, 0 }
  0x16   : > { %p611_p2 = scmp.eq.s32.totalorder %s2623_s7, 1  ;;  %p616_p3 = scmp.ne.s32.totalorder %s2457_s2, %s2453_s29 }
  0x17   : > { %p617_p4 = scmp.eq.s32.totalorder %s2116_s3, 1  ;;  %p2119_p7 = scmp.ge.s32.totalorder %s2465_s30, 1 }
  0x18   : > { %s2638_s27 = scalar_select %p598_p1, %s2461_s6, %s600_s1  }
  0x19   : > { %p2640_p5 = por %p611_p2, %p610_p0  ;;  %p2644_p6 = por %p617_p4, %p616_p3 }
  0x1a   : > { %3012 = sst [smem:[#allocation9_spill]] %s2638_s27  ;;  %p730_p8 = scmp.lt.s32.totalorder %s2465_s30, 3 }
  0x1b   : > { %s3014_s28 = scalar_select %p2644_p6, 1, 0 }
  0x1c   : > { %p731_p9 = pnand %p2119_p7, %p730_p8 }
  0x1d   : > { %3015 = sst [smem:[#allocation10_spill]] %s3014_s28  ;;  %p812_p10 = scmp.lt.s32.totalorder (!%p731_p9), %s2623_s7, 1 }
  0x1e   : > { %734 = sbr.rel (%p731_p9) target bundleno = 2100 (0x834), region = 120  ;;  %s3016_s0 = sld [smem:[#allocation17_spill]] (!%p731_p9) }
  0x1f   : > { %s3017_s8 = sld [smem:[#allocation19_spill]] (!%p731_p9) }
  0x20   : > { %s3018_s10 = sld [smem:[#allocation21_spill]] (!%p731_p9) }
  0x21   : > { %s3019_s12 = sld [smem:[#allocation22_spill]] (!%p731_p9) }
  0x22   : > { %s3020_s13 = sld [smem:[#allocation23_spill]] (!%p731_p9) }
  0x23   : > { %vm842_vm0 = vcmask 1043456   ;;  %v2467_v2 = vmov 0.0   ;;  %vm2468_vm1 = vmmov 0   ;;  %v2469_v11 = vmov 0   ;;  %s3023_s1 = sld [smem:[#allocation13_spill]]  ;;  %v1169_v23 = vld [vmem:[%s2982_s17 + $0x10] sm:$0xff] }
  0x24   : > { %v834_v0 = vld [vmem:[%s3016_s0] sm:$0xff]  ;;  %2198 = vmatprep.subr.bf16.mxu0 %v2467_v2  ;;  %2204 = vmatprep.subr.bf16.mxu1 %v2467_v2  ;;  %s2670_s0 = scalar_select %p812_p10, %s2623_s7, 1  ;;  %vm838_vm2 = vcmask 64512   ;;  %v1170_v24 = vld [vmem:[%s2982_s17 + $0x18] sm:$0xff]  ;;  %v1168_v27 = vld [vmem:[%s2982_s17 + $0x8] sm:$0xff]  ;;  %vm1037_vm3 = vcmask 261120  }
  0x25   : > { %v894_v1 = vld [vmem:[%s3017_s8] sm:$0xff]  ;;  %v836_v3 = vpack.c.bf16 %v834_v0, %v834_v0  ;;  %2200 = vmatprep.mubr.msk.bf16.mxu0 %vm2468_vm1, %v2467_v2  ;;  %2206 = vmatprep.mubr.msk.bf16.mxu1 %vm2468_vm1, %v2467_v2  ;;  %s3021_s8 = sld [smem:[#allocation11_spill]]  ;;  %v1173_v25 = vpack.c.bf16 %v1170_v24, %v1169_v23  ;;  %v1110_v30 = vld [vmem:[%s2980_s15 + $0x10] sm:$0xff]  ;;  %v1111_v31 = vld [vmem:[%s2980_s15 + $0x18] sm:$0xff] }
  0x26   : > { %v896_v4 = vpack.c.bf16 %v894_v1, %v894_v1  ;;  %v952_v5 = vld [vmem:[%s3018_s10] sm:$0xff]  ;;  %2358 = vset.pattern.permute.xlu0 %v2469_v11  ;;  %s2120_s6 = sshll.u32 %s2670_s0, 3  ;;  %s3025_s27 = sld [smem:[#allocation15_spill]]  ;;  %v1114_v33 = vpack.c.bf16 %v1111_v31, %v1110_v30  ;;  %v1109_v35 = vld [vmem:[%s2980_s15 + $0x8] sm:$0xff] }
  0x27   : > { %v1040_v6 = vld [vmem:[%s3019_s12] sm:$0xff]  ;;  %v954_v7 = vpack.c.bf16 %v952_v5, %v952_v5  ;;  %v844_v9 = vsel %vm842_vm0, %v836_v3, 0  ;;  %s3022_s12 = sld [smem:[#allocation12_spill]] }
  0x28   : > { %v1042_v8 = vpack.c.bf16 %v1040_v6, %v1040_v6  ;;  %v902_v10 = vsel %vm842_vm0, %v896_v4, 0  ;;  %v1089_v12 = vld [vmem:[%s3020_s13] sm:$0xff]  ;;  %2199 = vmatpush3.bf16.msra.mxu0 %v844_v9  ;;  %s3026_s28 = sld [smem:[#allocation18_spill]]  ;;  %v1009_v4 = vlaneseq }
  0x29   : > { %2205 = vmatpush3.bf16.msra.mxu1 %v902_v10  ;;  %2210 = vmatprep.subr.bf16.mxu0 %v2467_v2  ;;  %v960_v17 = vsel %vm842_vm0, %v954_v7, 0  ;;  %v1167_v26 = vld [vmem:[%s2982_s17] sm:$0xff]  ;;  %s3027_s5 = sld [smem:[#allocation20_spill]] }
  0x2a   : > { %2216 = vmatprep.subr.bf16.mxu1 %v2467_v2  ;;  %v1047_v18 = vsel %vm842_vm0, %v1042_v8, 0  ;;  %1092 = vperm.xlu0 %2358, %v1089_v12   ;;  %v1172_v28 = vpack.c.bf16 %v1168_v27, %v1167_v26  ;;  %v1108_v34 = vld [vmem:[%s2980_s15] sm:$0xff]  ;;  %v1010_v8 = vshrl.u32 %v1009_v4, 7 }
  0x2b   : > { %s814_s9 = scalar_lea.vmem %s3021_s8, %s2670_s0  ;;  %s820_s8 = scalar_lea.vmem %s3023_s1, %s2670_s0  ;;  %v1113_v36 = vpack.c.bf16 %v1109_v35, %v1108_v34  ;;  %v955_v52 = vld [vmem:[%s2976_s11] sm:$0x1] }
  0x2c   : > { %v833_v13 = vld [vmem:[%s814_s9] sm:$0x1]  ;;  %s3024_s9 = sld [smem:[#allocation14_spill]]  ;;  %s828_s13 = scalar_lea.vmem %s3025_s27, %s2120_s6  ;;  %vm1011_vm6 = vcmp.eq.s32.totalorder %v1010_v8, 0  ;;  %vm1019_vm7 = vcmp.eq.s32.totalorder %v1010_v8, 1  ;;  %vm1028_vm10 = vcmp.eq.s32.totalorder %v1010_v8, 2 }
  0x2d   : > { %s817_s26 = scalar_lea.vmem %s3022_s12, %s2670_s0  ;;  %v835_v15 = vpack.c.bf16 %v833_v13, %v833_v13  ;;  %v951_v19 = vld [vmem:[%s820_s8] sm:$0x1] }
  0x2e   : > { %v893_v14 = vld [vmem:[%s817_s26] sm:$0x1]  ;;  %v953_v21 = vpack.c.bf16 %v951_v19, %v951_v19 }
  0x2f   : > { %v895_v16 = vpack.c.bf16 %v893_v14, %v893_v14  ;;  %2201 = vmatmul.mubr.msk.bf16.vlgmr.msra.gmra.mxu0 %vm838_vm2, %v835_v15  ;;  %v1166_v29 = vld [vmem:[%s828_s13] sm:$0xff]  ;;  %v1016_v14 = vsub.s32 0, %v1010_v8 }
  0x30   : > { %2211 = vmatpush3.bf16.msra.mxu0 %v960_v17  ;;  %2212 = vmatprep.mubr.msk.bf16.mxu0 %vm2468_vm1, %v2467_v2  ;;  %v1171_v32 = vpack.c.bf16 %v1166_v29, %v1166_v29  ;;  %v837_v37 = vld [vmem:[%s3026_s28] sm:$0x1] }
  0x31   : > { %2207 = vmatmul.mubr.msk.bf16.vlgmr.msra.gmra.mxu1 %vm838_vm2, %v895_v16  ;;  %2222 = vmatprep.subr.bf16.mxu0 %v2467_v2  ;;  %v897_v38 = vld [vmem:[%s3027_s5] sm:$0x1] }
  0x32   : > { %s824_s26 = scalar_lea.vmem %s3024_s9, %s2120_s6  ;;  %2217 = vmatpush3.bf16.msra.mxu1 %v1047_v18  ;;  %2218 = vmatprep.mubr.msk.bf16.mxu1 %vm2468_vm1, %v2467_v2  ;;  %v1096_v55 = vld [vmem:[%s2979_s14] sm:$0xff]  ;;  %s3028_s6 = sld [smem:[#allocation16_spill]] }
  0x33   : > { %v1039_v20 = vld [vmem:[%s824_s26] sm:$0xff]  ;;  %2230 = vmatprep.subr.bf16.mxu1 %v2467_v2  ;;  %s2471_s9 = smov [#allocation3]  }
  0x34   : > { %v1041_v22 = vpack.c.bf16 %v1039_v20, %v1039_v20  ;;  %s2409_s13 = sshll.u32 %s2471_s9, 4  ;;  %s2410_s13 = int_to_ptr.vmem [resolvable:$false] %s2409_s13 }
  0x37   : > { %2213 = vmatmul.mubr.msk.bf16.vlgmr.msra.gmra.mxu0 %vm838_vm2, %v953_v21 }
  0x38   : > { %2226 = vmatprep.mubr.msk.bf16.mxu0 %vm2468_vm1, %v2467_v2  ;;  %2223 = vmatpush3.bf16.msra.mxu0 %v1114_v33  ;;  %s831_s26 = scalar_lea.vmem %s3028_s6, %s2670_s0  ;;  %s2470_s0 = smov 96  }
  0x39   : > { %2219 = vmatmul.mubr.msk.bf16.vlgmr.msra.gmra.mxu1 %vm838_vm2, %v1041_v22  ;;  %2224 = vmatprep.subr.bf16.mxu0 %v2467_v2  ;;  %v2136_v8 = vld [vmem:[%s831_s26] ss:$0 sm:$0xff]  ;;  %s810_s26 = sand.u32 1, %s2457_s2  }
  0x3a   : > { %2234 = vmatprep.mubr.msk.bf16.mxu1 %vm2468_vm1, %v2467_v2  ;;  %2231 = vmatpush3.bf16.msra.mxu1 %v1173_v25  ;;  %s811_s5 = scalar_lea.vmem [#allocation3], %s810_s26  ;;  %s2001_s10 = scalar_lea.sflag [#allocation4], %s810_s26 }
  0x3b   : > { %2232 = vmatprep.subr.bf16.mxu1 %v2467_v2  ;;  %s2013_s27 = sshll.u32 %s811_s5, 4  ;;  %s2014_s27 = int_to_ptr.vmem [resolvable:$true] %s2013_s27 }
  0x3c   : > { %2225 = vmatpush3.bf16.msra.mxu0 %v1113_v36  ;;  %s2405_s12 = scalar_lea.vmem %s2014_s27, 16  ;;  %p2412_p0 = scmp.lt.s32.totalorder %s2014_s27, %s2410_s13 }
  0x3d   : > { %2238 = vmatprep.subr.bf16.mxu0 %v2467_v2  ;;  %p2406_p11 = scmp.ne.s32.totalorder %s2014_s27, %s2405_s12 }
  0x3e   : > { %2233 = vmatpush3.bf16.msra.mxu1 %v1172_v28 }
  0x3f   : > { %2244 = vmatprep.subr.bf16.mxu1 %v2467_v2  ;;  %p2407_p12 = pnand %p2406_p11, %p2640_p5 }
  0x41   : > { %2235 = vmatmul.mubr.msk.bf16.vlgmr.msra.gmra.mxu1 %vm1037_vm3, %v1171_v32  ;;  %p2408_p13 = pneg %p2407_p12 }
  0x42   : > { %2246 = vmatprep.mubr.msk.bf16.mxu1 %vm2468_vm1, %v2467_v2 }
  0xa5   : > { %v1093_v49 = vpop.permute.xlu0 %1092 }
  0xef   : > { %v880_v39 = vpop.f32.mrf.mxu0 }
  0xf0   : > { %v881_v41 = vadd.f32 %v880_v39, %v837_v37 }
  0xf1   : > { %v938_v40 = vpop.f32.mrf.mxu1  ;;  %v2202_v43 = vpop.f32.mrf.mxu0 }
  0xf2   : > { %v939_v42 = vadd.f32 %v938_v40, %v897_v38  ;;  %v887_v45 = vmul.f32 1.442695, %v881_v41  ;;  %vm886_vm4 = vcmp.gt.f32.partialorder %v881_v41, 0.0  ;;  %v2132_v38 = vld [vmem:[%s2983_s18] ss:$0 sm:$0xff] }
  0xf3   : > { %v2208_v44 = vpop.f32.mrf.mxu1  ;;  %v883_v47 = vpop.f32.mrf.mxu0 }
  0xf4   : > { %v945_v46 = vmul.f32 1.442695, %v939_v42  ;;  %2359 = vpow2.f32 %v887_v45  ;;  %vm944_vm5 = vcmp.gt.f32.partialorder %v939_v42, 0.0  ;;  %v2130_v47 = vld [vmem:[%s2981_s16] ss:$0 sm:$0xff] }
  0xf5   : > { %v941_v48 = vpop.f32.mrf.mxu1  ;;  %v2203_v50 = vpop.f32.mrf.mxu0 }
  0xf6   : > { %2361 = vpow2.f32 %v945_v46  ;;  %v2774_v46 = vand.u32 127, %v1009_v4 }
  0xf7   : > { %v2209_v51 = vpop.f32.mrf.mxu1  ;;  %v996_v53 = vpop.f32.mrf.mxu0 }
  0xf8   : > { %v997_v56 = vadd.f32 %v996_v53, %v955_v52  ;;  %vm1233_vm11 = vcmp.lt.s32.totalorder %v2774_v46, 8  ;;  %vm1375_vm12 = vcmp.ge.s32.totalorder %v2774_v46, 8  ;;  %vm1376_vm13 = vcmp.lt.s32.totalorder %v2774_v46, 16 }
  0xf9   : > { %v1083_v54 = vpop.f32.mrf.mxu1  ;;  %v2214_v58 = vpop.f32.mrf.mxu0  ;;  %v2781_v51 = vsel %vm1233_vm11, 1.0, %v2467_v2  ;;  %vm1377_vm14 = vmand %vm1375_vm12, %vm1376_vm13  ;;  %vm1502_vm15 = vcmp.ge.s32.totalorder %v2774_v46, 16 }
  0xfa   : > { %v1095_v57 = vmul.f32 %v1093_v49, %v1083_v54  ;;  %v1003_v60 = vmul.f32 1.442695, %v997_v56  ;;  %vm1002_vm8 = vcmp.gt.f32.partialorder %v997_v56, 0.0  ;;  %v2791_v58 = vsel %vm1377_vm14, 1.0, %v2467_v2 }
  0xfb   : > { %v2220_v59 = vpop.f32.mrf.mxu1  ;;  %v999_v62 = vpop.f32.mrf.mxu0 }
  0xfc   : > { %v1097_v61 = vadd.f32 %v1096_v55, %v1095_v57  ;;  %2363 = vpow2.f32 %v1003_v60 }
  0xfd   : > { %v1086_v63 = vpop.f32.mrf.mxu1  ;;  %v2215_v1 = vpop.f32.mrf.mxu0 }
  0xfe   : > { %v1099_v0 = vmul.f32 1.442695, %v1097_v61  ;;  %vm1098_vm9 = vcmp.gt.f32.partialorder %v1097_v61, 0.0 }
  0xff   : > { %v2221_v3 = vpop.f32.mrf.mxu1 }
 0x100   : > { %2365 = vpow2.f32 %v1099_v0 }
 0x101   : > { %v2360_v5 = vpop.eup %2359  ;;  %v1218_v39 = vpop.f32.mrf.mxu1 }
 0x102   : > { %v2123_v7 = vadd.f32 -1.0, %v2360_v5  ;;  %v1219_v40 = vadd.f32 %v2132_v38, %v1218_v39 }
 0x103   : > { %v2362_v6 = vpop.eup %2361 }
 0x104   : > { %v2125_v9 = vadd.f32 -1.0, %v2362_v6  ;;  %v890_v10 = vmul.f32 1.6732632, %v2123_v7 }
 0x106   : > { %v948_v11 = vmul.f32 1.6732632, %v2125_v9  ;;  %v891_v12 = vsel %vm886_vm4, %v881_v41, %v890_v10  ;;  %v2236_v41 = vpop.f32.mrf.mxu1  ;;  %vm1503_vm4 = vcmp.lt.s32.totalorder %v2774_v46, 24 }
 0x107   : > { %v892_v13 = vmul.f32 1.050701, %v891_v12 }
 0x108   : > { %v949_v15 = vsel %vm944_vm5, %v939_v42, %v948_v11  ;;  %v2769_v42 = vpack.c.bf16 %v1219_v40, %v1219_v40  ;;  %v1221_v43 = vpop.f32.mrf.mxu1  ;;  %vm1504_vm5 = vmand %vm1502_vm15, %vm1503_vm4 }
 0x109   : > { %v950_v16 = vmul.f32 1.050701, %v949_v15  ;;  %v2364_v17 = vpop.eup %2363  ;;  %v1017_v20 = vrot.slane %v892_v13, %v1016_v14  ;;  %v2802_v62 = vsel %vm1504_vm5, 1.0, %v2467_v2 }
 0x10a   : > { %v2127_v18 = vadd.f32 -1.0, %v2364_v17  ;;  %v1245_v44 = vsel %vm1037_vm3, %v2769_v42, 0  ;;  %v2237_v45 = vpop.f32.mrf.mxu1 }
 0x10b   : > { %v1025_v21 = vrot.slane %v950_v16, %v1016_v14  ;;  %v1018_v26 = vsel %vm1011_vm6, %v1017_v20, 0.0  ;;  %vm1629_vm6 = vcmp.ge.s32.totalorder %v2774_v46, 24 }
 0x10c   : > { %v1006_v22 = vmul.f32 1.6732632, %v2127_v18 }
 0x10d   : > { %v2366_v19 = vpop.eup %2365  ;;  %v1026_v27 = vsel %vm1019_vm7, %v1025_v21, 0.0  ;;  %vm1630_vm7 = vcmp.lt.s32.totalorder %v2774_v46, 32 }
 0x10e   : > { %v2129_v23 = vadd.f32 -1.0, %v2366_v19  ;;  %v1007_v24 = vsel %vm1002_vm8, %v997_v56, %v1006_v22  ;;  %v1027_v32 = vadd.f32 %v1026_v27, %v1018_v26  ;;  %vm1631_vm8 = vmand %vm1629_vm6, %vm1630_vm7 }
 0x10f   : > { %v1008_v28 = vmul.f32 1.050701, %v1007_v24  ;;  %v2813_v3 = vsel %vm1631_vm8, 1.0, %v2467_v2 }
 0x110   : > { %v1102_v25 = vmul.f32 1.6732632, %v2129_v23 }
 0x111   : > { %v1034_v30 = vrot.slane %v1008_v28, %v1016_v14 }
 0x112   : > { %v1103_v29 = vsel %vm1098_vm9, %v1097_v61, %v1102_v25  ;;  %vm1812_vm9 = vcmask 130048  }
 0x113   : > { %v1104_v31 = vmul.f32 1.050701, %v1103_v29  ;;  %v1035_v33 = vsel %vm1028_vm10, %v1034_v30, 0.0 }
 0x114   : > { %v1036_v34 = vadd.f32 %v1035_v33, %v1027_v32 }
 0x115   : > { %1105 = vst.msk [vmem:[#allocation2 + $0x8] sm:$0xff] %vm1037_vm3, %v1104_v31 }
 0x116   : > { %1038 = vst.msk [vmem:[#allocation2] sm:$0xff] %vm1037_vm3, %v1036_v34 }
 0x11c   : > { %v1107_v36 = vld [vmem:[#allocation2 + $0x8] sm:$0xff] }
 0x11d   : > { %v1106_v35 = vld [vmem:[#allocation2] sm:$0xff] }
 0x11e   : > { %v1112_v37 = vpack.c.bf16 %v1107_v36, %v1106_v35 }
 0x120   : > { %2227 = vmatmul.mubr.msk.bf16.vlgmr.msra.gmra.mxu0 %vm1037_vm3, %v1112_v37 }
 0x121   : > { %2240 = vmatprep.mubr.msk.bf16.mxu0 %vm2468_vm1, %v2467_v2  ;;  %2239 = vmatpush3.bf16.xpose.msra.mxu0 %v1245_v44 }
 0x122   : > { %2250 = vmatprep.subr.bf16.mxu0 %v2467_v2 }
 0x1e0   : > { %v1159_v48 = vpop.f32.mrf.mxu0 }
 0x1e1   : > { %v1160_v50 = vadd.f32 %v2130_v47, %v1159_v48 }
 0x1e2   : > { %v2228_v49 = vpop.f32.mrf.mxu0 }
 0x1e3   : > { %v1237_v55 = vmul.f32 %v2781_v51, %v1160_v50  ;;  %v1380_v60 = vmul.f32 %v2791_v58, %v1160_v50  ;;  %v1507_v0 = vmul.f32 %v2802_v62, %v1160_v50  ;;  %v1634_v5 = vmul.f32 %v2813_v3, %v1160_v50 }
 0x1e4   : > { %v1162_v52 = vpop.f32.mrf.mxu0 }
 0x1e5   : > { %v1163_v53 = vadd.f32 %v2130_v47, %v1162_v52 }
 0x1e6   : > { %v2229_v54 = vpop.f32.mrf.mxu0 }
 0x1e7   : > { %v1238_v56 = vmul.f32 %v2781_v51, %v1163_v53  ;;  %v1381_v59 = vmul.f32 %v2791_v58, %v1163_v53  ;;  %v1508_v63 = vmul.f32 %v2802_v62, %v1163_v53  ;;  %v1635_v4 = vmul.f32 %v2813_v3, %v1163_v53 }
 0x1e9   : > { %v1239_v57 = vpack.c.bf16 %v1238_v56, %v1237_v55  ;;  %v1382_v61 = vpack.c.bf16 %v1381_v59, %v1380_v60  ;;  %v1509_v1 = vpack.c.bf16 %v1508_v63, %v1507_v0  ;;  %v1636_v6 = vpack.c.bf16 %v1635_v4, %v1634_v5 }
 0x1eb   : > { %2241 = vmatmul.mubr.msk.bf16.vlgmr.msra.gmra.mxu0 %vm1037_vm3, %v1239_v57 }
 0x1ec   : > { %2251 = vmatpush3.bf16.xpose.msra.mxu0 %v1245_v44  ;;  %2252 = vmatprep.mubr.msk.bf16.mxu0 %vm2468_vm1, %v2467_v2 }
 0x1ed   : > { %2262 = vmatprep.subr.bf16.mxu0 %v2467_v2 }
 0x1f3   : > { %2253 = vmatmul.mubr.msk.bf16.vlgmr.msra.gmra.mxu0 %vm1037_vm3, %v1382_v61 }
 0x1f4   : > { %2263 = vmatpush3.bf16.xpose.msra.mxu0 %v1245_v44  ;;  %2264 = vmatprep.mubr.msk.bf16.mxu0 %vm2468_vm1, %v2467_v2 }
 0x1f5   : > { %2274 = vmatprep.subr.bf16.mxu0 %v2467_v2 }
 0x1fb   : > { %2265 = vmatmul.mubr.msk.bf16.vlgmr.msra.gmra.mxu0 %vm1037_vm3, %v1509_v1 }
 0x1fc   : > { %2275 = vmatpush3.bf16.xpose.msra.mxu0 %v1245_v44  ;;  %2276 = vmatprep.mubr.msk.bf16.mxu0 %vm2468_vm1, %v2467_v2 }
 0x1fd   : > { %2286 = vmatprep.subr.bf16.mxu0 %v2467_v2 }
 0x203   : > { %2277 = vmatmul.mubr.msk.bf16.vlgmr.msra.gmra.mxu0 %vm1037_vm3, %v1636_v6 }
 0x204   : > { %2290 = vmatprep.mubr.msk.bf16.mxu0 %vm2468_vm1, %v2467_v2 }
 0x2ab   : > { %v1281_v7 = vpop.f32.mrf.mxu0 }
 0x2ac   : > { %v1288_v9 = vmul.f32 0.35355338, %v1281_v7 }
 0x2ad   : > { %v2242_v10 = vpop.f32.mrf.mxu0 }
 0x2ae   : > { %v1296_v11 = vadd.f32 %v2136_v8, %v1288_v9 }
 0x2af   : > { %v1284_v12 = vpop.f32.mrf.mxu0 }
 0x2b0   : > { %v1289_v13 = vmul.f32 0.35355338, %v1284_v12  ;;  %v1298_v14 = vsel %vm838_vm2, %v1296_v11, -inf }
 0x2b1   : > { %1299 = vmax.xlane.f32.xlu0 %v1298_v14  ;;  %v2243_v15 = vpop.f32.mrf.mxu0 }
 0x2b2   : > { %v1297_v16 = vadd.f32 %v2136_v8, %v1289_v13 }
 0x2b3   : > { %v1420_v17 = vpop.f32.mrf.mxu0 }
 0x2b4   : > { %v1427_v18 = vmul.f32 0.35355338, %v1420_v17  ;;  %v1301_v19 = vsel %vm838_vm2, %v1297_v16, -inf }
 0x2b5   : > { %1302 = vmax.xlane.f32.xlu1 %v1301_v19  ;;  %v2254_v20 = vpop.f32.mrf.mxu0 }
 0x2b6   : > { %v1429_v21 = vadd.f32 %v2136_v8, %v1427_v18 }
 0x2b7   : > { %v1423_v22 = vpop.f32.mrf.mxu0 }
 0x2b8   : > { %v1428_v23 = vmul.f32 0.35355338, %v1423_v22  ;;  %v1431_v24 = vsel %vm838_vm2, %v1429_v21, -inf }
 0x2b9   : > { %1432 = vmax.xlane.f32.xlu1 %v1431_v24  ;;  %v2255_v25 = vpop.f32.mrf.mxu0 }
 0x2ba   : > { %v1430_v26 = vadd.f32 %v2136_v8, %v1428_v23 }
 0x2bb   : > { %v1547_v27 = vpop.f32.mrf.mxu0 }
 0x2bc   : > { %v1554_v28 = vmul.f32 0.35355338, %v1547_v27  ;;  %v1434_v29 = vsel %vm838_vm2, %v1430_v26, -inf }
 0x2bd   : > { %1435 = vmax.xlane.f32.xlu1 %v1434_v29  ;;  %v2266_v30 = vpop.f32.mrf.mxu0 }
 0x2be   : > { %v1556_v31 = vadd.f32 %v2136_v8, %v1554_v28 }
 0x2bf   : > { %v1550_v32 = vpop.f32.mrf.mxu0 }
 0x2c0   : > { %v1555_v33 = vmul.f32 0.35355338, %v1550_v32  ;;  %v1558_v34 = vsel %vm838_vm2, %v1556_v31, -inf }
 0x2c1   : > { %1559 = vmax.xlane.f32.xlu1 %v1558_v34  ;;  %v2267_v35 = vpop.f32.mrf.mxu0 }
 0x2c2   : > { %v1557_v36 = vadd.f32 %v2136_v8, %v1555_v33 }
 0x2c3   : > { %v1674_v37 = vpop.f32.mrf.mxu0 }
 0x2c4   : > { %v1681_v38 = vmul.f32 0.35355338, %v1674_v37  ;;  %v1561_v39 = vsel %vm838_vm2, %v1557_v36, -inf }
 0x2c5   : > { %1562 = vmax.xlane.f32.xlu1 %v1561_v39  ;;  %v2278_v40 = vpop.f32.mrf.mxu0 }
 0x2c6   : > { %v1683_v41 = vadd.f32 %v2136_v8, %v1681_v38 }
 0x2c7   : > { %v1677_v43 = vpop.f32.mrf.mxu0 }
 0x2c8   : > { %v1682_v44 = vmul.f32 0.35355338, %v1677_v43  ;;  %v1685_v45 = vsel %vm838_vm2, %v1683_v41, -inf }
 0x2c9   : > { %1686 = vmax.xlane.f32.xlu1 %v1685_v45  ;;  %v2279_v47 = vpop.f32.mrf.mxu0 }
 0x2ca   : > { %v1684_v48 = vadd.f32 %v2136_v8, %v1682_v44 }
 0x2cc   : > { %v1688_v49 = vsel %vm838_vm2, %v1684_v48, -inf }
 0x2cd   : > { %1689 = vmax.xlane.f32.xlu1 %v1688_v49 }
 0x33a   : > { %v1300_v50 = vpop.xlane.xlu0 %1299 }
 0x33b   : > { %v1304_v52 = vsub.f32 %v1296_v11, %v1300_v50 }
 0x33d   : > { %v1306_v53 = vmul.f32 1.442695, %v1304_v52 }
 0x33e   : > { %v1303_v54 = vpop.xlane.xlu1 %1302 }
 0x33f   : > { %2367 = vpow2.f32 %v1306_v53  ;;  %v1305_v55 = vsub.f32 %v1297_v16, %v1303_v54 }
 0x341   : > { %v1308_v56 = vmul.f32 1.442695, %v1305_v55 }
 0x342   : > { %v1433_v57 = vpop.xlane.xlu1 %1432 }
 0x343   : > { %2369 = vpow2.f32 %v1308_v56  ;;  %v1437_v59 = vsub.f32 %v1429_v21, %v1433_v57 }
 0x345   : > { %v1439_v60 = vmul.f32 1.442695, %v1437_v59 }
 0x346   : > { %v1436_v61 = vpop.xlane.xlu1 %1435 }
 0x347   : > { %2371 = vpow2.f32 %v1439_v60  ;;  %v1438_v63 = vsub.f32 %v1430_v26, %v1436_v61 }
 0x349   : > { %v1441_v0 = vmul.f32 1.442695, %v1438_v63 }
 0x34a   : > { %v1560_v1 = vpop.xlane.xlu1 %1559 }
 0x34b   : > { %2373 = vpow2.f32 %v1441_v0  ;;  %v1564_v4 = vsub.f32 %v1556_v31, %v1560_v1  ;;  %v1227_v1 = vld [vmem:[%s2984_s19 + $0x10] sm:$0xff] }
 0x34c   : > { %v2368_v5 = vpop.eup %2367 }
 0x34d   : > { %v1566_v6 = vmul.f32 1.442695, %v1564_v4  ;;  %v1310_v7 = vsel %vm838_vm2, %v2368_v5, 0.0  ;;  %v1228_v4 = vld [vmem:[%s2984_s19 + $0x18] sm:$0xff] }
 0x34e   : > { %v1563_v8 = vpop.xlane.xlu1 %1562  ;;  %1311 = vadd.xlane.f32.xlu1 %v1310_v7  ;;  %v1226_v7 = vld [vmem:[%s2984_s19 + $0x8] sm:$0xff] }
 0x34f   : > { %2375 = vpow2.f32 %v1566_v6  ;;  %v1565_v9 = vsub.f32 %v1557_v36, %v1563_v8  ;;  %v1225_v6 = vld [vmem:[%s2984_s19] sm:$0xff] }
 0x350   : > { %v2370_v10 = vpop.eup %2369  ;;  %v1757_v8 = vpack.c.bf16 %v1226_v7, %v1225_v6 }
 0x351   : > { %v1568_v11 = vmul.f32 1.442695, %v1565_v9  ;;  %v1313_v12 = vsel %vm838_vm2, %v2370_v10, 0.0 }
 0x352   : > { %v1687_v13 = vpop.xlane.xlu1 %1686  ;;  %1314 = vadd.xlane.f32.xlu1 %v1313_v12 }
 0x353   : > { %2377 = vpow2.f32 %v1568_v11  ;;  %v1691_v14 = vsub.f32 %v1683_v41, %v1687_v13 }
 0x354   : > { %v2372_v15 = vpop.eup %2371 }
 0x355   : > { %v1693_v16 = vmul.f32 1.442695, %v1691_v14  ;;  %v1443_v17 = vsel %vm838_vm2, %v2372_v15, 0.0 }
 0x356   : > { %1444 = vadd.xlane.f32.xlu0 %v1443_v17  ;;  %v1690_v18 = vpop.xlane.xlu1 %1689 }
 0x357   : > { %2379 = vpow2.f32 %v1693_v16  ;;  %v1692_v19 = vsub.f32 %v1684_v48, %v1690_v18 }
 0x358   : > { %v2374_v20 = vpop.eup %2373 }
 0x359   : > { %v1695_v21 = vmul.f32 1.442695, %v1692_v19  ;;  %v1446_v22 = vsel %vm838_vm2, %v2374_v20, 0.0 }
 0x35a   : > { %1447 = vadd.xlane.f32.xlu1 %v1446_v22 }
 0x35b   : > { %2381 = vpow2.f32 %v1695_v21 }
 0x35c   : > { %v2376_v23 = vpop.eup %2375 }
 0x35d   : > { %v1570_v24 = vsel %vm838_vm2, %v2376_v23, 0.0 }
 0x35e   : > { %1571 = vadd.xlane.f32.xlu0 %v1570_v24 }
 0x360   : > { %v2378_v25 = vpop.eup %2377 }
 0x361   : > { %v1573_v26 = vsel %vm838_vm2, %v2378_v25, 0.0 }
 0x362   : > { %1574 = vadd.xlane.f32.xlu1 %v1573_v26 }
 0x364   : > { %v2380_v27 = vpop.eup %2379 }
 0x365   : > { %v1697_v28 = vsel %vm838_vm2, %v2380_v27, 0.0 }
 0x366   : > { %1698 = vadd.xlane.f32.xlu0 %v1697_v28 }
 0x368   : > { %v2382_v29 = vpop.eup %2381 }
 0x369   : > { %v1700_v30 = vsel %vm838_vm2, %v2382_v29, 0.0 }
 0x36a   : > { %1701 = vadd.xlane.f32.xlu1 %v1700_v30 }
 0x37c   : > { %1322 = vrot.lane.b32.xlu0 %v2769_v42, %s2470_s0  ;;  %s2154_s0 = sshll.u32 %s2623_s7, 4  ;;  %s2411_s7 = scalar_lea.vmem %s2410_s13, 32 }
 0x37d   : > { %s2930_s8 = scalar_lea.hbm %s2990_s25, %s2154_s0  ;;  %p2413_p1 = scmp.lt.s32.totalorder %s2411_s7, %s2405_s12 }
 0x37f   : > { %p2414_p2 = por %p2413_p1, %p2412_p0 }
 0x381   : > { %p2415_p3 = pnand %p2414_p2, %p2408_p13 }
 0x3d7   : > { %v1312_v31 = vpop.xlane.xlu1 %1311 }
 0x3db   : > { %v1315_v32 = vpop.xlane.xlu1 %1314 }
 0x3dc   : > { %2383 = vrcp.f32 %v1315_v32 }
 0x3dd   : > { %2385 = vrcp.f32 %v1312_v31 }
 0x3df   : > { %v1445_v33 = vpop.xlane.xlu0 %1444 }
 0x3e3   : > { %v1448_v34 = vpop.xlane.xlu1 %1447 }
 0x3e4   : > { %2387 = vrcp.f32 %v1448_v34 }
 0x3e5   : > { %2389 = vrcp.f32 %v1445_v33 }
 0x3e7   : > { %v1572_v35 = vpop.xlane.xlu0 %1571 }
 0x3e9   : > { %v2384_v36 = vpop.eup %2383 }
 0x3ea   : > { %v2386_v39 = vpop.eup %2385  ;;  %v1319_v40 = vmul.f32 %v2384_v36, %v2370_v10 }
 0x3eb   : > { %v1575_v37 = vpop.xlane.xlu1 %1574  ;;  %v1318_v42 = vmul.f32 %v2386_v39, %v2368_v5  ;;  %v1758_v5 = vpack.c.bf16 %v1228_v4, %v1227_v1 }
 0x3ec   : > { %2391 = vrcp.f32 %v1575_v37 }
 0x3ed   : > { %2393 = vrcp.f32 %v1572_v35  ;;  %v1320_v44 = vpack.c.bf16 %v1319_v40, %v1318_v42  ;;  %2287 = vmatpush3.bf16.msra.mxu0 %v1758_v5 }
 0x3ee   : > { %2288 = vmatprep.subr.bf16.mxu0 %v2467_v2 }
 0x3ef   : > { %v1699_v38 = vpop.xlane.xlu0 %1698 }
 0x3f1   : > { %v2388_v45 = vpop.eup %2387  ;;  %2289 = vmatpush3.bf16.msra.mxu0 %v1757_v8 }
 0x3f2   : > { %v2390_v48 = vpop.eup %2389  ;;  %v1452_v49 = vmul.f32 %v2388_v45, %v2374_v20  ;;  %2301 = vmatprep.subr.bf16.mxu0 %v2467_v2 }
 0x3f3   : > { %v1323_v41 = vpop.permute.xlu0 %1322  ;;  %v1702_v47 = vpop.xlane.xlu1 %1701  ;;  %v1451_v50 = vmul.f32 %v2390_v48, %v2372_v15  ;;  %v1887_v48 = vld [vmem:[%s2986_s21 + $0x8] sm:$0xff] }
 0x3f4   : > { %v1328_v43 = vsel %vm842_vm0, %v1323_v41, 0  ;;  %2395 = vrcp.f32 %v1702_v47  ;;  %vm1809_vm0 = vcmp.lt.s32.totalorder %v2774_v46, 3  ;;  %v2147_v41 = vld [vmem:[%s2985_s20] ss:$0 sm:$0xff] }
 0x3f5   : > { %2245 = vmatpush3.bf16.msra.mxu1 %v1328_v43  ;;  %2397 = vrcp.f32 %v1699_v38  ;;  %v1453_v52 = vpack.c.bf16 %v1452_v49, %v1451_v50  ;;  %v1886_v46 = vld [vmem:[%s2986_s21] sm:$0xff] }
 0x3f6   : > { %2256 = vmatprep.subr.bf16.mxu1 %v2467_v2  ;;  %v1891_v49 = vpack.c.bf16 %v1887_v48, %v1886_v46 }
 0x3f8   : > { %2247 = vmatmul.mubr.msk.bf16.vlgmr.msra.gmra.mxu1 %vm838_vm2, %v1320_v44 }
 0x3f9   : > { %2257 = vmatpush3.bf16.msra.mxu1 %v1328_v43  ;;  %2258 = vmatprep.mubr.msk.bf16.mxu1 %vm2468_vm1, %v2467_v2  ;;  %v2392_v53 = vpop.eup %2391 }
 0x3fa   : > { %2268 = vmatprep.subr.bf16.mxu1 %v2467_v2  ;;  %v2394_v54 = vpop.eup %2393  ;;  %v1579_v55 = vmul.f32 %v2392_v53, %v2378_v25 }
 0x3fb   : > { %v1578_v56 = vmul.f32 %v2394_v54, %v2376_v23  ;;  %v1944_v54 = vld [vmem:[%s2988_s23] sm:$0xff] }
 0x3fd   : > { %v1580_v57 = vpack.c.bf16 %v1579_v55, %v1578_v56  ;;  %v1893_v56 = vld [vmem:[%s2987_s22] sm:$0x1] }
 0x400   : > { %2259 = vmatmul.mubr.msk.bf16.vlgmr.msra.gmra.mxu1 %vm838_vm2, %v1453_v52 }
 0x401   : > { %2269 = vmatpush3.bf16.msra.mxu1 %v1328_v43  ;;  %2270 = vmatprep.mubr.msk.bf16.mxu1 %vm2468_vm1, %v2467_v2  ;;  %v2396_v59 = vpop.eup %2395 }
 0x402   : > { %2280 = vmatprep.subr.bf16.mxu1 %v2467_v2  ;;  %v2398_v60 = vpop.eup %2397  ;;  %v1706_v61 = vmul.f32 %v2396_v59, %v2382_v29 }
 0x403   : > { %v1705_v63 = vmul.f32 %v2398_v60, %v2380_v27 }
 0x405   : > { %v1707_v0 = vpack.c.bf16 %v1706_v61, %v1705_v63 }
 0x408   : > { %2271 = vmatmul.mubr.msk.bf16.vlgmr.msra.gmra.mxu1 %vm838_vm2, %v1580_v57 }
 0x409   : > { %2281 = vmatpush3.bf16.msra.mxu1 %v1328_v43  ;;  %2282 = vmatprep.mubr.msk.bf16.mxu1 %vm2468_vm1, %v2467_v2 }
 0x40a   : > { %2294 = vmatprep.subr.mxu1 %v2467_v2 }
 0x410   : > { %2283 = vmatmul.mubr.msk.bf16.vlgmr.msra.gmra.mxu1 %vm838_vm2, %v1707_v0  ;;  %vm1810_vm2 = vmor %vm1809_vm0, %vm1375_vm12 }
 0x411   : > { %2298 = vmatprep.mubr.msk.f32.mxu1 %vm2468_vm1, %v2467_v2  ;;  %v1811_v47 = vsel %vm1810_vm2, 0.09090909, %v2467_v2 }
 0x4b8   : > { %v1364_v9 = vpop.f32.mrf.mxu1 }
 0x4b9   : > { %v1371_v24 = vmul.f32 %v2781_v51, %v1364_v9  ;;  %v1948_v9 = vld [vmem:[%s2989_s24] sm:$0x1] }
 0x4ba   : > { %v2248_v10 = vpop.f32.mrf.mxu1 }
 0x4bc   : > { %v1367_v11 = vpop.f32.mrf.mxu1 }
 0x4bd   : > { %v1372_v25 = vmul.f32 %v2781_v51, %v1367_v11  ;;  %v1888_v51 = vld [vmem:[%s2986_s21 + $0x10] sm:$0xff] }
 0x4be   : > { %v2249_v12 = vpop.f32.mrf.mxu1 }
 0x4c0   : > { %v1491_v13 = vpop.f32.mrf.mxu1 }
 0x4c1   : > { %v1498_v21 = vmul.f32 %v2791_v58, %v1491_v13 }
 0x4c2   : > { %v2260_v14 = vpop.f32.mrf.mxu1 }
 0x4c3   : > { %v1500_v29 = vadd.f32 %v1498_v21, %v1371_v24 }
 0x4c4   : > { %v1494_v15 = vpop.f32.mrf.mxu1 }
 0x4c5   : > { %v1499_v22 = vmul.f32 %v2791_v58, %v1494_v15 }
 0x4c6   : > { %v2261_v16 = vpop.f32.mrf.mxu1 }
 0x4c7   : > { %v1501_v30 = vadd.f32 %v1499_v22, %v1372_v25 }
 0x4c8   : > { %v1618_v17 = vpop.f32.mrf.mxu1 }
 0x4c9   : > { %v1625_v26 = vmul.f32 %v2802_v62, %v1618_v17 }
 0x4ca   : > { %v2272_v18 = vpop.f32.mrf.mxu1 }
 0x4cb   : > { %v1627_v33 = vadd.f32 %v1625_v26, %v1500_v29 }
 0x4cc   : > { %v1621_v19 = vpop.f32.mrf.mxu1 }
 0x4cd   : > { %v1626_v27 = vmul.f32 %v2802_v62, %v1621_v19  ;;  %v1889_v62 = vld [vmem:[%s2986_s21 + $0x18] sm:$0xff] }
 0x4ce   : > { %v2273_v20 = vpop.f32.mrf.mxu1  ;;  %v1892_v39 = vpack.c.bf16 %v1889_v62, %v1888_v51 }
 0x4cf   : > { %v1628_v34 = vadd.f32 %v1626_v27, %v1501_v30 }
 0x4d0   : > { %v1745_v23 = vpop.f32.mrf.mxu1 }
 0x4d1   : > { %v1752_v31 = vmul.f32 %v2813_v3, %v1745_v23 }
 0x4d2   : > { %v2284_v28 = vpop.f32.mrf.mxu1 }
 0x4d3   : > { %v1754_v36 = vadd.f32 %v1752_v31, %v1627_v33 }
 0x4d4   : > { %v1748_v32 = vpop.f32.mrf.mxu1 }
 0x4d5   : > { %v1753_v35 = vmul.f32 %v2813_v3, %v1748_v32 }
 0x4d6   : > { %v2285_v58 = vpop.f32.mrf.mxu1 }
 0x4d7   : > { %v1755_v37 = vadd.f32 %v1753_v35, %v1628_v34 }
 0x4d9   : > { %v1756_v38 = vpack.c.bf16 %v1755_v37, %v1754_v36 }
 0x4db   : > { %2291 = vmatmul.mubr.msk.bf16.vlgmr.msra.gmra.mxu0 %vm1037_vm3, %v1756_v38 }
 0x4dc   : > { %2305 = vmatprep.mubr.msk.bf16.mxu0 %vm2468_vm1, %v2467_v2  ;;  %2302 = vmatpush3.bf16.msra.mxu0 %v1892_v39 }
 0x4dd   : > { %2303 = vmatprep.subr.bf16.mxu0 %v2467_v2 }
 0x4e0   : > { %2304 = vmatpush3.bf16.msra.mxu0 %v1891_v49 }
 0x59b   : > { %v1802_v3 = vpop.f32.mrf.mxu0 }
 0x59c   : > { %v1803_v45 = vadd.f32 %v2147_v41, %v1802_v3 }
 0x59d   : > { %v2292_v40 = vpop.f32.mrf.mxu0 }
 0x59f   : > { %v1805_v43 = vpop.f32.mrf.mxu0 }
 0x5a0   : > { %v1806_v42 = vadd.f32 %v2147_v41, %v1805_v43 }
 0x5a1   : > { %v2293_v44 = vpop.f32.mrf.mxu0 }
 0x5a2   : > { %2295 = vmatpush3.msra.mxu1 %v1806_v42 }
 0x5a3   : > { %2296 = vmatprep.subr.mxu1 %v2467_v2 }
 0x5a4   : > { %2297 = vmatpush3.msra.mxu1 %v1803_v45 }
 0x5a5   : > { %2299 = vmatmul.mubr.msk.f32.vlgmr.msra.gmra.mxu1 %vm1812_vm9, %v1811_v47  ;;  %2309 = vmatprep.subr.bf16.mxu1 %v2467_v2 }
 0x5a6   : > { %2311 = vmatprep.mubr.msk.bf16.mxu1 %vm2468_vm1, %v2467_v2  ;;  %v1945_v2 = vld [vmem:[%s2988_s23 + $0x8] sm:$0xff] }
 0x5a7   : > { %v1947_v55 = vpack.c.bf16 %v1945_v2, %v1944_v54 }
 0x5a9   : > { %2310 = vmatpush3.bf16.msra.mxu1 %v1947_v55 }
 0x665   : > { %v1882_v50 = vpop.f32.mrf.mxu1 }
 0x666   : > { %v1890_v52 = vpack.c.bf16 %v1882_v50, %v1882_v50 }
 0x667   : > { %v2300_v53 = vpop.f32.mrf.mxu1 }
 0x668   : > { %2306 = vmatmul.mubr.msk.bf16.vlgmr.msra.gmra.mxu0 %vm1037_vm3, %v1890_v52  ;;  %vm1998_vm3 = vcmask 8192  }
 0x728   : > { %v1931_v57 = vpop.f32.mrf.mxu0 }
 0x729   : > { %v1932_v59 = vadd.f32 %v1931_v57, %v1893_v56 }
 0x72a   : > { %v2307_v60 = vpop.f32.mrf.mxu0 }
 0x72b   : > { %v1938_v61 = vmul.f32 1.442695, %v1932_v59  ;;  %vm1937_vm1 = vcmp.gt.f32.partialorder %v1932_v59, 0.0 }
 0x72c   : > { %v1934_v63 = vpop.f32.mrf.mxu0 }
 0x72d   : > { %2399 = vpow2.f32 %v1938_v61 }
 0x72e   : > { %v2308_v0 = vpop.f32.mrf.mxu0 }
 0x73a   : > { %v2400_v1 = vpop.eup %2399 }
 0x73b   : > { %v2151_v4 = vadd.f32 -1.0, %v2400_v1 }
 0x73d   : > { %v1941_v5 = vmul.f32 1.6732632, %v2151_v4 }
 0x73f   : > { %v1942_v6 = vsel %vm1937_vm1, %v1932_v59, %v1941_v5 }
 0x740   : > { %v1943_v7 = vmul.f32 1.050701, %v1942_v6 }
 0x742   : > { %v1946_v8 = vpack.c.bf16 %v1943_v7, %v1943_v7 }
 0x744   : > { %2312 = vmatmul.mubr.msk.bf16.vlgmr.msra.gmra.mxu1 %vm1812_vm9, %v1946_v8 }
 0x804   : > { %v1986_v10 = vpop.f32.mrf.mxu1 }
 0x805   : > { %v1987_v11 = vadd.f32 %v1986_v10, %v1948_v9 }
 0x806   : > { %v2313_v12 = vpop.f32.mrf.mxu1 }
 0x807   : > { %v2153_v13 = vmul.f32 -1.442695, %v1987_v11 }
 0x808   : > { %v1989_v14 = vpop.f32.mrf.mxu1 }
 0x809   : > { %2401 = vpow2.f32 %v2153_v13 }
 0x80a   : > { %v2314_v15 = vpop.f32.mrf.mxu1 }
 0x816   : > { %v2402_v16 = vpop.eup %2401 }
 0x817   : > { %v1995_v17 = vadd.f32 1.0, %v2402_v16 }
 0x819   : > { %2403 = vrcp.f32 %v1995_v17 }
 0x826   : > { %v2404_v18 = vpop.eup %2403 }
 0x827   : > { %1999 = vst.msk [vmem:[%s811_s5] sm:$0x1] %vm1998_vm3, %v2404_v18 }
 0x828   : > { %2418 = shalt.err (!%p2415_p3)
}
 0x829   : > { %s2419_s29 = scalar_lea.hbm %s2930_s8, 16  ;;  %s2423_s26 = scalar_lea.hbm %s2990_s25, 32 }
 0x82a   : > { %p2420_p4 = scmp.ne.s32.totalorder %s2930_s8, %s2419_s29  ;;  %p2424_p9 = scmp.lt.s32.totalorder %s2930_s8, %s2990_s25 }
 0x82b   : > { %p2425_p10 = scmp.lt.s32.totalorder %s2423_s26, %s2419_s29 }
 0x82c   : > { %p2421_p7 = pnand %p2420_p4, %p2640_p5 }
 0x82d   : > { %p2426_p11 = por %p2425_p10, %p2424_p9 }
 0x82e   : > { %p2422_p8 = pneg %p2421_p7 }
 0x830   : > { %p2427_p12 = pnand %p2426_p11, %p2422_p8 }
 0x832   : > { %2430 = shalt.err (!%p2427_p12)
}
 0x833   : > { %2315 = dma.vmem_to_hbm [thread:$0]  (%p2640_p5), %s2014_s27, 16, %s2930_s8, %s2001_s10  }
 0x834 PF: > { %s3029_s3 = sld [smem:[#allocation6_spill]]  ;;  %p2321_p13 = scmp.ge.s32.totalorder %s2465_s30, 2 }
 0x836   : > { %p2318_p0 = pnand %p2321_p13, %p2644_p6 }
 0x838   : > { %p2319_p1 = pneg %p2318_p0 }
 0x83a   : > { %s2025_s12 = sand.u32 1, %s3029_s3  }
 0x83b   : > { %s2026_s9 = scalar_lea.sflag [#allocation4], %s2025_s12 }
 0x83c   : > { %2448 = dma.done.wait (%p2319_p1), %s2026_s9, 16  }
 0x83d   : > { %2450 = vsyncadd (%p2319_p1), %s2026_s9, 4294967280  ;;  %s3031_s30 = sld [smem:[#allocation8_spill]]  ;;  %s3034_s29 = smov %s2457_s2 }
 0x83e   : > { %s3032_s13 = sld [smem:[#allocation7_spill]] }
 0x83f   : > { %s3033_s6 = sld [smem:[#allocation9_spill]] }
 0x843   : > { %p35_p2 = scmp.ge.s32.totalorder %s3031_s30, 4  }
 0x844   : > { %s3035_s2 = smov %s3032_s13 }
 0x845   :  { %37 = sbr.rel (!%p35_p2) target bundleno = 17 (0x11), region = 170 }
 0x84a   :  { %2030 = vsyncpa [#allocation4], 1 }
 0x84b   :  { %2032 = vsyncpa [#allocation4 + $0x1], 1 }

// kernel: model_forward.2
= control target key start
LH: loop header
LB: loop body
LE: loop exit
PB: predicated region body
PF: predicated region fallthrough
CT: control target
= control target key end

     0   :  { %18 = vsyncpa [#allocation3], 0  ;;  %s5776_s0 = inlined_call_operand.vmem [shape: f32[2,8,8], index: 0, kind: input, shape index: {}]   ;;  %s5777_s1 = inlined_call_operand.vmem [shape: f32[2,1,8], index: 1, kind: input, shape index: {}]   ;;  %s5778_s2 = inlined_call_operand.hbm [shape: f32[8,8], index: 2, kind: input, shape index: {}]   ;;  %s5779_s3 = inlined_call_operand.hbm [shape: f32[1,8], index: 3, kind: input, shape index: {}]   ;;  %s5780_s4 = inlined_call_operand.hbm [shape: f32[8,32], index: 4, kind: input, shape index: {}]   ;;  %s5781_s5 = inlined_call_operand.hbm [shape: f32[1,32], index: 5, kind: input, shape index: {}]   ;;  %s5782_s6 = inlined_call_operand.vmem [shape: f32[2,32,128], index: 6, kind: input, shape index: {}]   ;;  %s5783_s7 = inlined_call_operand.hbm [shape: f32[2,32,128], index: 7, kind: input, shape index: {}]   ;;  %s5784_s8 = inlined_call_operand.hbm [shape: f32[2,1,128], index: 8, kind: input, shape index: {}]   ;;  %s5785_s9 = inlined_call_operand.vmem [shape: f32[32,96], index: 9, kind: input, shape index: {}]   ;;  %s5786_s10 = inlined_call_operand.hbm [shape: f32[1,96], index: 10, kind: input, shape index: {}]   ;;  %s5787_s11 = inlined_call_operand.hbm [shape: f32[32,32], index: 11, kind: input, shape index: {}]   ;;  %s5788_s12 = inlined_call_operand.hbm [shape: f32[1,32], index: 12, kind: input, shape index: {}]   ;;  %s5789_s13 = inlined_call_operand.vmem [shape: f32[2,8,32], index: 13, kind: output, shape index: {}]  }
   0x1   :  { %19 = vsyncpa [#allocation5], 0 }
   0x2   :  { %20 = vsyncpa [#allocation8], 0 }
   0x3   :  { %21 = vsyncpa [#allocation11], 0 }
   0x4   :  { %22 = vsyncpa [#allocation14], 0  ;;  %s5105_s25 = smov 0  }
   0x5 LB: > { %s5016_s26 = smov [#allocation4]   ;;  %s5111_s28 = sadd.s32 4294967295, %s5014_s25   ;;  %s5014_s25 = sphi %s5105_s25, %s28_s25  }
   0x6   : > { %s366_s27 = sshll.u32 %s5016_s26, 4  ;;  %p3975_p0 = scmp.ge.s32.totalorder %s5014_s25, 1  ;;  %s367_s27 = int_to_ptr.vmem [resolvable:$true] %s366_s27 }
   0x7   : > { %p342_p1 = scmp.lt.s32.totalorder %s5014_s25, 3  ;;  %p5790_p2 = scmp.eq.s32.totalorder %s5111_s28, 0 }
   0x8   : > { %s5017_s30 = smov [#allocation7]   ;;  %s5018_s15 = smov [#allocation10]  }
   0x9   : > { %p5116_p3 = pnand %p3975_p0, %p342_p1  ;;  %s388_s14 = sshll.u32 %s5017_s30, 4  ;;  %s389_s14 = int_to_ptr.vmem [resolvable:$true] %s388_s14 }
   0xa   : > { %s414_s16 = sshll.u32 %s5018_s15, 4  ;;  %s4765_s19 = scalar_lea.vmem %s367_s27, 16  ;;  %s5128_s16 = int_to_ptr.vmem [resolvable:$true] %s414_s16 }
   0xb   : > { %s5792_s29 = scalar_select %p5116_p3, 1, 0 }
   0xc   : > { %p4533_p4 = pneg %p5116_p3  ;;  %p4766_p7 = scmp.ne.s32.totalorder %s367_s27, %s4765_s19 }
   0xd   : > { %s4772_s20 = scalar_lea.vmem %s367_s27, 32  ;;  %p4773_p10 = scmp.lt.s32.totalorder %s367_s27, %s367_s27 }
   0xe   : > { %p5124_p5 = pnand %p5790_p2, %p4533_p4  ;;  %p4774_p11 = scmp.lt.s32.totalorder %s4772_s20, %s4765_s19 }
  0x10   : > { %p5132_p6 = pneg %p5124_p5  ;;  %p4775_p12 = por %p4774_p11, %p4773_p10 }
  0x12   : > { %p4768_p8 = pnand %p4766_p7, %p5132_p6 }
  0x14   : > { %p4769_p9 = pneg %p4768_p8 }
  0x16   : > { %p4776_p13 = pnand %p4775_p12, %p4769_p9 }
  0x18   : > { %4779 = shalt.err (!%p4776_p13)
}
  0x19   : > { %4539 = dma.hbm_to_vmem [thread:$0]  (!%p5124_p5), %s5779_s3, 16, %s367_s27, [#allocation5]  }
  0x1a   : > { %s4791_s23 = scalar_lea.vmem %s389_s14, 16  ;;  %s4798_s24 = scalar_lea.vmem %s389_s14, 32 }
  0x1b   : > { %p4792_p0 = scmp.ne.s32.totalorder %s389_s14, %s4791_s23  ;;  %p4799_p7 = scmp.lt.s32.totalorder %s389_s14, %s389_s14 }
  0x1c   : > { %p4800_p8 = scmp.lt.s32.totalorder %s4798_s24, %s4791_s23 }
  0x1d   : > { %p4794_p1 = pnand %p4792_p0, %p5132_p6 }
  0x1e   : > { %p4801_p2 = por %p4800_p8, %p4799_p7 }
  0x1f   : > { %p4795_p4 = pneg %p4794_p1 }
  0x21   : > { %p4802_p3 = pnand %p4801_p2, %p4795_p4 }
  0x23   : > { %4805 = shalt.err (!%p4802_p3)
}
  0x24   : > { %4545 = dma.hbm_to_vmem [thread:$0]  (!%p5124_p5), %s5781_s5, 16, %s389_s14, [#allocation8]  }
  0x25   : > { %s4817_s27 = scalar_lea.vmem %s5128_s16, 32  ;;  %p4825_p12 = scmp.lt.s32.totalorder %s5128_s16, %s5128_s16 }
  0x26   : > { %p4818_p9 = scmp.ne.s32.totalorder %s5128_s16, %s4817_s27  ;;  %p4826_p13 = scmp.lt.s32.totalorder %s4817_s27, %s4817_s27 }
  0x28   : > { %p4820_p10 = pnand %p4818_p9, %p5132_p6  ;;  %p4827_p2 = por %p4826_p13, %p4825_p12 }
  0x2a   : > { %p4821_p11 = pneg %p4820_p10 }
  0x2c   : > { %p4828_p3 = pnand %p4827_p2, %p4821_p11 }
  0x2e   : > { %4831 = shalt.err (!%p4828_p3)
}
  0x2f   : > { %s5019_s15 = smov 16   ;;  %s5020_s19 = smov 1  }
  0x30   : > { %4551 = dma.hbm_to_vmem [thread:$0]  (!%p5124_p5), %s5784_s8, 32, %s5128_s16, [#allocation11], %s5019_s15, %s5019_s15, %s5020_s19  }
  0x31   : > { %s5021_s14 = smov [#allocation13]   ;;  %s5022_s23 = smov [#allocation2]  }
  0x32   : > { %s441_s22 = sshll.u32 %s5021_s14, 4  ;;  %s355_s24 = sshll.u32 %s5022_s23, 4  ;;  %s442_s22 = int_to_ptr.vmem [resolvable:$true] %s441_s22  ;;  %s356_s24 = int_to_ptr.vmem [resolvable:$true] %s355_s24 }
  0x33   : > { %s4843_s26 = scalar_lea.vmem %s442_s22, 512  ;;  %p4851_p7 = scmp.lt.s32.totalorder %s442_s22, %s442_s22 }
  0x34   : > { %p4844_p0 = scmp.ne.s32.totalorder %s442_s22, %s4843_s26  ;;  %p4852_p8 = scmp.lt.s32.totalorder %s4843_s26, %s4843_s26 }
  0x36   : > { %p4846_p1 = pnand %p4844_p0, %p5132_p6  ;;  %p4853_p9 = por %p4852_p8, %p4851_p7 }
  0x38   : > { %p4847_p4 = pneg %p4846_p1 }
  0x3a   : > { %p4854_p10 = pnand %p4853_p9, %p4847_p4 }
  0x3c   : > { %4857 = shalt.err (!%p4854_p10)
}
  0x3d   : > { %s5023_s30 = smov 128   ;;  %s5024_s16 = smov 8  }
  0x3e   : > { %4557 = dma.hbm_to_vmem [thread:$0]  (!%p5124_p5), %s5787_s11, 512, %s442_s22, [#allocation14], %s5023_s30, %s5023_s30, %s5024_s16  }
  0x3f   : > { %s4869_s19 = scalar_lea.vmem %s356_s24, 128  ;;  %p4877_p2 = scmp.lt.s32.totalorder %s356_s24, %s356_s24 }
  0x40   : > { %p4870_p11 = scmp.ne.s32.totalorder %s356_s24, %s4869_s19  ;;  %p4878_p3 = scmp.lt.s32.totalorder %s4869_s19, %s4869_s19 }
  0x42   : > { %p4872_p12 = pnand %p4870_p11, %p5132_p6  ;;  %p4879_p0 = por %p4878_p3, %p4877_p2 }
  0x44   : > { %p4873_p13 = pneg %p4872_p12 }
  0x46   : > { %p4880_p1 = pnand %p4879_p0, %p4873_p13 }
  0x48   : > { %4883 = shalt.err (!%p4880_p1)
}
  0x49   : > { %4536 = dma.hbm_to_vmem [thread:$0]  (!%p5124_p5), %s5778_s2, 128, %s356_s24, [#allocation3]  }
  0x4a   : > { %s5025_s14 = smov [#allocation6]   ;;  %s5026_s22 = smov [#allocation9]  }
  0x4b   : > { %s377_s23 = sshll.u32 %s5025_s14, 4  ;;  %s401_s26 = sshll.u32 %s5026_s22, 4  ;;  %s378_s23 = int_to_ptr.vmem [resolvable:$true] %s377_s23  ;;  %s402_s26 = int_to_ptr.vmem [resolvable:$true] %s401_s26 }
  0x4c   : > { %s4895_s27 = scalar_lea.vmem %s378_s23, 128  ;;  %p4903_p9 = scmp.lt.s32.totalorder %s378_s23, %s378_s23 }
  0x4d   : > { %p4896_p4 = scmp.ne.s32.totalorder %s378_s23, %s4895_s27  ;;  %p4904_p10 = scmp.lt.s32.totalorder %s4895_s27, %s4895_s27 }
  0x4f   : > { %p4898_p7 = pnand %p4896_p4, %p5132_p6  ;;  %p4905_p11 = por %p4904_p10, %p4903_p9 }
  0x51   : > { %p4899_p8 = pneg %p4898_p7 }
  0x53   : > { %p4906_p12 = pnand %p4905_p11, %p4899_p8 }
  0x55   : > { %4909 = shalt.err (!%p4906_p12)
}
  0x56   : > { %4542 = dma.hbm_to_vmem [thread:$0]  (!%p5124_p5), %s5780_s4, 128, %s378_s23, [#allocation5]  }
  0x57   : > { %s4921_s19 = scalar_lea.vmem %s402_s26, 1024  ;;  %p4929_p0 = scmp.lt.s32.totalorder %s402_s26, %s402_s26 }
  0x58   : > { %p4922_p13 = scmp.ne.s32.totalorder %s402_s26, %s4921_s19  ;;  %p4930_p1 = scmp.lt.s32.totalorder %s4921_s19, %s4921_s19 }
  0x5a   : > { %p4924_p2 = pnand %p4922_p13, %p5132_p6  ;;  %p4931_p4 = por %p4930_p1, %p4929_p0 }
  0x5c   : > { %p4925_p3 = pneg %p4924_p2 }
  0x5e   : > { %p4932_p7 = pnand %p4931_p4, %p4925_p3 }
  0x60   : > { %4935 = shalt.err (!%p4932_p7)
}
  0x61   : > { %4548 = dma.hbm_to_vmem [thread:$0]  (!%p5124_p5), %s5783_s7, 1024, %s402_s26, [#allocation8], %s5023_s30, %s5023_s30, %s5024_s16  }
  0x62   : > { %s5027_s14 = smov [#allocation12]   ;;  %s5028_s22 = smov [#allocation15]  }
  0x63   : > { %s431_s23 = sshll.u32 %s5027_s14, 4  ;;  %s455_s27 = sshll.u32 %s5028_s22, 4  ;;  %s432_s23 = int_to_ptr.vmem [resolvable:$true] %s431_s23  ;;  %s456_s27 = int_to_ptr.vmem [resolvable:$true] %s455_s27 }
  0x64   : > { %s4947_s15 = scalar_lea.vmem %s432_s23, 16  ;;  %s4954_s24 = scalar_lea.vmem %s432_s23, 32 }
  0x65   : > { %p4948_p8 = scmp.ne.s32.totalorder %s432_s23, %s4947_s15  ;;  %p4955_p11 = scmp.lt.s32.totalorder %s432_s23, %s432_s23 }
  0x66   : > { %p4956_p12 = scmp.lt.s32.totalorder %s4954_s24, %s4947_s15 }
  0x67   : > { %p4950_p9 = pnand %p4948_p8, %p5132_p6 }
  0x68   : > { %p4957_p13 = por %p4956_p12, %p4955_p11 }
  0x69   : > { %p4951_p10 = pneg %p4950_p9 }
  0x6b   : > { %p4958_p2 = pnand %p4957_p13, %p4951_p10 }
  0x6d   : > { %4961 = shalt.err (!%p4958_p2)
}
  0x6e   : > { %4554 = dma.hbm_to_vmem [thread:$0]  (!%p5124_p5), %s5786_s10, 16, %s432_s23, [#allocation11]  }
  0x6f   : > { %s4973_s26 = scalar_lea.vmem %s456_s27, 16  ;;  %s4980_s19 = scalar_lea.vmem %s456_s27, 32 }
  0x70   : > { %p4974_p3 = scmp.ne.s32.totalorder %s456_s27, %s4973_s26  ;;  %p4981_p4 = scmp.lt.s32.totalorder %s456_s27, %s456_s27 }
  0x71   : > { %p4982_p7 = scmp.lt.s32.totalorder %s4980_s19, %s4973_s26 }
  0x72   : > { %p4976_p0 = pnand %p4974_p3, %p5132_p6 }
  0x73   : > { %p4983_p8 = por %p4982_p7, %p4981_p4 }
  0x74   : > { %p4977_p1 = pneg %p4976_p0 }
  0x76   : > { %p4984_p9 = pnand %p4983_p8, %p4977_p1 }
  0x78   : > { %4987 = shalt.err (!%p4984_p9)
}
  0x79   : > { %4560 = dma.hbm_to_vmem [thread:$0]  (!%p5124_p5), %s5788_s12, 16, %s456_s27, [#allocation14]  }
  0x7a   : > { %p5795_p10 = scmp.ne.s32.totalorder %s5792_s29, 0 }
  0x7b   : > { %p5796_p11 = scmp.eq.s32.totalorder (!%p5795_p10), %s5111_s28, 0 }
  0x7c   : > { %481 = sbr.rel (%p5795_p10) target bundleno = 13311 (0x33ff), region = 72 }
  0x81   : > { %4993 = dma.done.wait (%p5796_p11), [#allocation3], 128   ;;  %p5797_p6 = pmov %p5796_p11 }
  0x83   : > { %4995 = vsyncadd (%p5797_p6), [#allocation3], 4294967168  ;;  %p5798_p12 = pmov %p5797_p6 }
  0x84   : > { %p5799_p13 = pmov %p5797_p6 }
  0x85   : > { %4997 = dma.done.wait (%p5798_p12), [#allocation5], 144  }
  0x86   : > { %4999 = vsyncadd (%p5799_p13), [#allocation5], 4294967152  ;;  %p5800_p2 = pmov %p5797_p6 }
  0x88   : > { %5001 = dma.done.wait (%p5800_p2), [#allocation8], 1040   ;;  %p5801_p5 = pmov %p5800_p2 }
  0x89   : > { %p5802_p3 = pmov %p5800_p2 }
  0x8a   : > { %5003 = vsyncadd (%p5801_p5), [#allocation8], 4294966256 }
  0x8b   : > { %5005 = dma.done.wait (%p5802_p3), [#allocation11], 48   ;;  %p5803_p0 = pmov %p5800_p2 }
  0x8d   : > { %5007 = vsyncadd (%p5803_p0), [#allocation11], 4294967248  ;;  %p5804_p1 = pmov %p5803_p0 }
  0x8e   : > { %p5805_p4 = pmov %p5803_p0 }
  0x8f   : > { %5009 = dma.done.wait (%p5804_p1), [#allocation14], 528  }
  0x90   : > { %5011 = vsyncadd (%p5805_p4), [#allocation14], 4294966768  ;;  %p558_p7 = scmp.lt.s32.totalorder %s5111_s28, 1  ;;  %v5029_v0 = vmov 0.0   ;;  %vm5030_vm0 = vmmov 0   ;;  %v571_v1 = vld [vmem:[#allocation2] sm:$0xff]  ;;  %v693_v47 = vlaneseq }
  0x91   : > { %4197 = vmatprep.subr.bf16.mxu0 %v5029_v0  ;;  %4199 = vmatprep.mubr.msk.bf16.mxu0 %vm5030_vm0, %v5029_v0  ;;  %vm585_vm1 = vcmask 1043456   ;;  %v573_v3 = vpack.c.bf16 %v571_v1, %v571_v1  ;;  %vm581_vm2 = vcmask 64512   ;;  %v630_v6 = vld [vmem:[#allocation6] sm:$0xff]  ;;  %v3998_v9 = vld [vmem:[#allocation4] ss:$0 sm:$0xff]  ;;  %v700_v18 = vld [vmem:[%s5782_s6 + $0x18] sm:$0xff] }
  0x92   : > { %s5807_s28 = smov (!%p558_p7, %s5111_s28), 1  ;;  %4203 = vmatprep.subr.bf16.mxu1 %v5029_v0  ;;  %4205 = vmatprep.mubr.msk.bf16.mxu1 %vm5030_vm0, %v5029_v0  ;;  %v632_v7 = vpack.c.bf16 %v630_v6, %v630_v6  ;;  %v699_v17 = vld [vmem:[%s5782_s6 + $0x10] sm:$0xff]  ;;  %v697_v20 = vld [vmem:[%s5782_s6] sm:$0xff]  ;;  %v698_v21 = vld [vmem:[%s5782_s6 + $0x8] sm:$0xff]  ;;  %v5031_v29 = vmov 0   ;;  %vm711_vm4 = vcmask 261120  }
  0x93   : > { %s3996_s29 = sshll.u32 %s5807_s28, 3  ;;  %v587_v4 = vsel %vm585_vm1, %v573_v3, 0  ;;  %v703_v19 = vpack.c.bf16 %v700_v18, %v699_v17  ;;  %v702_v22 = vpack.c.bf16 %v698_v21, %v697_v20  ;;  %v757_v23 = vld [vmem:[#allocation9 + $0x10] sm:$0xff]  ;;  %v758_v24 = vld [vmem:[#allocation9 + $0x18] sm:$0xff]  ;;  %v755_v25 = vld [vmem:[#allocation9] sm:$0xff]  ;;  %v5291_v48 = vand.u32 127, %v693_v47  ;;  %s564_s27 = scalar_lea.vmem %s5777_s1, %s5807_s28 }
  0x94   : > { %s561_s14 = scalar_lea.vmem %s5776_s0, %s3996_s29  ;;  %4198 = vmatpush3.bf16.msra.mxu0 %v587_v4  ;;  %v644_v8 = vsel %vm585_vm1, %v632_v7, 0  ;;  %v5272_v26 = vpack.c.bf16 %v758_v24, %v757_v23  ;;  %v756_v27 = vld [vmem:[#allocation9 + $0x8] sm:$0xff]  ;;  %v4000_v30 = vld [vmem:[#allocation7] ss:$0 sm:$0xff]  ;;  %v4003_v49 = vld [vmem:[#allocation10] ss:$0 sm:$0xff]  ;;  %s568_s24 = scalar_lea.vmem %s5789_s13, %s3996_s29 }
  0x95   : > { %v570_v2 = vld [vmem:[%s561_s14] sm:$0xff]  ;;  %4209 = vmatprep.subr.bf16.mxu0 %v5029_v0  ;;  %4204 = vmatpush3.bf16.msra.mxu1 %v644_v8  ;;  %v5275_v28 = vpack.c.bf16 %v756_v27, %v755_v25  ;;  %vm761_vm5 = vcmp.eq.s32.totalorder %v5291_v48, 0  ;;  %vm913_vm6 = vcmp.eq.s32.totalorder %v5291_v48, 1  ;;  %s5032_s19 = smov 64   ;;  %s5033_s20 = smov 32   ;;  %vm1069_vm7 = vcmp.eq.s32.totalorder %v5291_v48, 2 }
  0x96   : > { %v572_v5 = vpack.c.bf16 %v570_v2, %v570_v2  ;;  %4217 = vmatprep.subr.bf16.mxu1 %v5029_v0  ;;  %v5297_v52 = vsel %vm761_vm5, 1.0, %v5029_v0  ;;  %v5308_v55 = vsel %vm913_vm6, 1.0, %v5029_v0  ;;  %vm1225_vm10 = vcmp.eq.s32.totalorder %v5291_v48, 3  ;;  %s5034_s23 = smov 96  }
  0x97   : > { %vm1381_vm12 = vcmp.eq.s32.totalorder %v5291_v48, 4  ;;  %vm1537_vm14 = vcmp.eq.s32.totalorder %v5291_v48, 5  ;;  %vm1849_vm6 = vcmp.eq.s32.totalorder %v5291_v48, 7 }
  0x98   : > { %4200 = vmatmul.mubr.msk.bf16.vlgmr.msra.gmra.mxu0 %vm581_vm2, %v572_v5 }
  0x99   : > { %4213 = vmatprep.mubr.msk.bf16.mxu0 %vm5030_vm0, %v5029_v0  ;;  %4210 = vmatpush3.bf16.msra.mxu0 %v703_v19 }
  0x9a   : > { %4211 = vmatprep.subr.bf16.mxu0 %v5029_v0 }
  0x9d   : > { %4212 = vmatpush3.bf16.msra.mxu0 %v702_v22 }
  0x9e   : > { %4225 = vmatprep.subr.mxu0 %v5029_v0 }
 0x158   : > { %v623_v10 = vpop.f32.mrf.mxu0 }
 0x159   : > { %v624_v11 = vadd.f32 %v3998_v9, %v623_v10 }
 0x15a   : > { %v4201_v12 = vpop.f32.mrf.mxu0 }
 0x15b   : > { %v629_v13 = vmax.f32 %v624_v11, 0.0 }
 0x15c   : > { %v626_v14 = vpop.f32.mrf.mxu0 }
 0x15d   : > { %v631_v15 = vpack.c.bf16 %v629_v13, %v629_v13 }
 0x15e   : > { %v4202_v16 = vpop.f32.mrf.mxu0 }
 0x15f   : > { %4206 = vmatmul.mubr.msk.bf16.vlgmr.msra.gmra.mxu1 %vm581_vm2, %v631_v15 }
 0x160   : > { %4221 = vmatprep.mubr.msk.bf16.mxu1 %vm5030_vm0, %v5029_v0  ;;  %4218 = vmatpush3.bf16.msra.mxu1 %v5272_v26 }
 0x161   : > { %4219 = vmatprep.subr.bf16.mxu1 %v5029_v0 }
 0x164   : > { %4220 = vmatpush3.bf16.msra.mxu1 %v5275_v28 }
 0x165   : > { %4230 = vmatprep.subr.bf16.mxu1 %v5029_v0 }
 0x167   : > { %4222 = vmatmul.mubr.bf16.vlgmr.msra.gmra.mxu1 %v5031_v29 }
 0x168   : > { %4231 = vmatpush3.bf16.msra.mxu1 %v5272_v26  ;;  %4234 = vmatprep.mubr.msk.bf16.mxu1 %vm5030_vm0, %v5029_v0 }
 0x169   : > { %4232 = vmatprep.subr.bf16.mxu1 %v5029_v0 }
 0x16c   : > { %4233 = vmatpush3.bf16.msra.mxu1 %v5275_v28 }
 0x16d   : > { %4243 = vmatprep.subr.bf16.mxu1 %v5029_v0 }
 0x21f   : > { %v680_v31 = vpop.f32.mrf.mxu1 }
 0x220   : > { %v681_v32 = vadd.f32 %v4000_v30, %v680_v31 }
 0x221   : > { %v4207_v33 = vpop.f32.mrf.mxu1 }
 0x222   : > { %v687_v34 = vmul.f32 1.442695, %v681_v32  ;;  %vm686_vm3 = vcmp.gt.f32.partialorder %v681_v32, 0.0 }
 0x223   : > { %v683_v35 = vpop.f32.mrf.mxu1 }
 0x224   : > { %4606 = vpow2.f32 %v687_v34  ;;  %v5344_v34 = vshrl.u32 %v693_v47, 7  ;;  %v5365_v47 = vsel %vm1225_vm10, 1.0, %v5029_v0 }
 0x225   : > { %v4208_v36 = vpop.f32.mrf.mxu1 }
 0x226   : > { %v5347_v35 = vsub.s32 0, %v5344_v34  ;;  %vm904_vm8 = vcmp.eq.s32.totalorder %v5344_v34, 0  ;;  %vm1060_vm9 = vcmp.eq.s32.totalorder %v5344_v34, 1  ;;  %vm1216_vm11 = vcmp.eq.s32.totalorder %v5344_v34, 2 }
 0x227   : > { %v801_v43 = vpop.f32.mrf.mxu1  ;;  %vm1372_vm13 = vcmp.eq.s32.totalorder %v5344_v34, 3  ;;  %vm1528_vm15 = vcmp.eq.s32.totalorder %v5344_v34, 4  ;;  %vm1684_vm5 = vcmp.eq.s32.totalorder %v5344_v34, 5  ;;  %vm1996_vm10 = vcmp.eq.s32.totalorder %v5344_v34, 7 }
 0x229   : > { %v4223_v44 = vpop.f32.mrf.mxu1 }
 0x22b   : > { %v804_v45 = vpop.f32.mrf.mxu1 }
 0x22d   : > { %v4224_v46 = vpop.f32.mrf.mxu1 }
 0x231   : > { %v4607_v37 = vpop.eup %4606 }
 0x232   : > { %v4002_v38 = vadd.f32 -1.0, %v4607_v37 }
 0x234   : > { %v690_v39 = vmul.f32 1.6732632, %v4002_v38 }
 0x236   : > { %v691_v40 = vsel %vm686_vm3, %v681_v32, %v690_v39  ;;  %v5332_v32 = vsel %vm1069_vm7, 1.0, %v5029_v0  ;;  %vm1693_vm3 = vcmp.eq.s32.totalorder %v5291_v48, 6  ;;  %vm1840_vm7 = vcmp.eq.s32.totalorder %v5344_v34, 6  ;;  %v4066_v34 = vld [vmem:[#allocation12] ss:$0 sm:$0xff] }
 0x237   : > { %v692_v41 = vmul.f32 1.050701, %v691_v40 }
 0x239   : > { %v701_v42 = vpack.c.bf16 %v692_v41, %v692_v41 }
 0x23b   : > { %4214 = vmatmul.mubr.msk.bf16.vlgmr.msra.gmra.mxu0 %vm711_vm4, %v701_v42 }
 0x23c   : > { %4227 = vmatprep.mubr.msk.f32.mxu0 %vm5030_vm0, %v5029_v0 }
 0x2fb   : > { %v749_v50 = vpop.f32.mrf.mxu0 }
 0x2fc   : > { %v5294_v51 = vadd.f32 %v4003_v49, %v749_v50 }
 0x2fd   : > { %v4215_v53 = vpop.f32.mrf.mxu0 }
 0x2fe   : > { %4226 = vmatpush3.msra.mxu0 %v5294_v51 }
 0x2ff   : > { %v752_v54 = vpop.f32.mrf.mxu0  ;;  %4228 = vmatmul.mubr.msk.f32.vlgmr.msra.gmra.mxu0 %vm581_vm2, %v5297_v52  ;;  %4238 = vmatprep.subr.mxu0 %v5029_v0 }
 0x300   : > { %4239 = vmatpush3.msra.mxu0 %v5294_v51  ;;  %4240 = vmatprep.mubr.msk.f32.mxu0 %vm5030_vm0, %v5029_v0 }
 0x301   : > { %v4216_v56 = vpop.f32.mrf.mxu0  ;;  %4251 = vmatprep.subr.mxu0 %v5029_v0 }
 0x303   : > { %4241 = vmatmul.mubr.msk.f32.vlgmr.msra.gmra.mxu0 %vm581_vm2, %v5308_v55 }
 0x304   : > { %4252 = vmatpush3.msra.mxu0 %v5294_v51  ;;  %4253 = vmatprep.mubr.msk.f32.mxu0 %vm5030_vm0, %v5029_v0 }
 0x305   : > { %4256 = vmatprep.subr.bf16.mxu0 %v5029_v0 }
 0x307   : > { %4254 = vmatmul.mubr.msk.f32.vlgmr.msra.gmra.mxu0 %vm581_vm2, %v5332_v32 }
 0x308   : > { %4257 = vmatpush3.bf16.msra.mxu0 %v5272_v26  ;;  %4260 = vmatprep.mubr.msk.bf16.mxu0 %vm5030_vm0, %v5029_v0 }
 0x309   : > { %4258 = vmatprep.subr.bf16.mxu0 %v5029_v0 }
 0x30c   : > { %4259 = vmatpush3.bf16.msra.mxu0 %v5275_v28 }
 0x30d   : > { %4269 = vmatprep.subr.bf16.mxu0 %v5029_v0 }
 0x3bf   : > { %v876_v57 = vpop.f32.mrf.mxu0 }
 0x3c0   : > { %v877_v58 = vadd.f32 %v876_v57, %v801_v43 }
 0x3c1   : > { %v4229_v59 = vpop.f32.mrf.mxu0 }
 0x3c2   : > { %4608 = vtanh.f32 %v877_v58  ;;  %v4007_v61 = vmul.f32 -1.442695, %v877_v58 }
 0x3c3   : > { %v1032_v8 = vpop.f32.mrf.mxu0 }
 0x3c4   : > { %4610 = vpow2.f32 %v4007_v61 }
 0x3c5   : > { %v4242_v9 = vpop.f32.mrf.mxu0 }
 0x3c7   : > { %v1188_v44 = vpop.f32.mrf.mxu0 }
 0x3c9   : > { %v4255_v45 = vpop.f32.mrf.mxu0 }
 0x3cf   : > { %v4609_v60 = vpop.eup %4608 }
 0x3d0   : > { %889 = vrot.lane.b32.xlu0 %v4609_v60, %s5032_s19 }
 0x3d1   : > { %v4611_v62 = vpop.eup %4610 }
 0x3d2   : > { %v883_v63 = vadd.f32 1.0, %v4611_v62 }
 0x3d4   : > { %4612 = vrcp.f32 %v883_v63 }
 0x3e1   : > { %v4613_v1 = vpop.eup %4612 }
 0x3e2   : > { %v887_v4 = vmul.f32 0.0, %v4613_v1 }
 0x442   : > { %v890_v2 = vpop.permute.xlu0 %889 }
 0x443   : > { %v892_v3 = vmul.f32 %v4613_v1, %v890_v2 }
 0x445   : > { %894 = vrot.lane.b32.xlu0 %v892_v3, %s5033_s20 }
 0x4b7   : > { %v895_v5 = vpop.permute.xlu0 %894 }
 0x4b8   : > { %v897_v6 = vadd.f32 %v895_v5, %v887_v4 }
 0x4ba   : > { %4614 = vtanh.f32 %v897_v6 }
 0x4c7   : > { %v4615_v7 = vpop.eup %4614 }
 0x4c8   : > { %900 = vrot.lane.b32.xlu1 %v4615_v7, %s5032_s19 }
 0x53a   : > { %v901_v10 = vpop.permute.xlu1 %900 }
 0x53b   : > { %v903_v11 = vmul.f32 %v4613_v1, %v901_v10 }
 0x53d   : > { %v916_v12 = vpack.c.bf16 %v903_v11, %v903_v11  ;;  %v910_v37 = vrot.slane %v903_v11, %v5347_v35 }
 0x53f   : > { %918 = vrot.lane.b32.xlu1 %v916_v12, %s5033_s20  ;;  %v911_v41 = vsel %vm904_vm8, %v910_v37, 0.0 }
 0x5b1   : > { %v919_v13 = vpop.permute.xlu1 %918 }
 0x5b2   : > { %4235 = vmatmul.mubr.msk.bf16.vlgmr.msra.gmra.mxu1 %vm711_vm4, %v919_v13 }
 0x5b3   : > { %4244 = vmatpush3.bf16.msra.mxu1 %v5272_v26  ;;  %4247 = vmatprep.mubr.msk.bf16.mxu1 %vm5030_vm0, %v5029_v0 }
 0x5b4   : > { %4245 = vmatprep.subr.bf16.mxu1 %v5029_v0 }
 0x5b7   : > { %4246 = vmatpush3.bf16.msra.mxu1 %v5275_v28 }
 0x5b8   : > { %4264 = vmatprep.subr.mxu1 %v5029_v0 }
 0x672   : > { %v957_v14 = vpop.f32.mrf.mxu1 }
 0x673   : > { %v1033_v15 = vadd.f32 %v1032_v8, %v957_v14 }
 0x674   : > { %v4236_v16 = vpop.f32.mrf.mxu1 }
 0x675   : > { %4616 = vtanh.f32 %v1033_v15  ;;  %v4011_v20 = vmul.f32 -1.442695, %v1033_v15 }
 0x676   : > { %v960_v17 = vpop.f32.mrf.mxu1 }
 0x677   : > { %4618 = vpow2.f32 %v4011_v20 }
 0x678   : > { %v4237_v18 = vpop.f32.mrf.mxu1 }
 0x682   : > { %v4617_v19 = vpop.eup %4616 }
 0x683   : > { %1045 = vrot.lane.b32.xlu0 %v4617_v19, %s5032_s19 }
 0x684   : > { %v4619_v21 = vpop.eup %4618 }
 0x685   : > { %v1039_v22 = vadd.f32 1.0, %v4619_v21 }
 0x687   : > { %4620 = vrcp.f32 %v1039_v22 }
 0x694   : > { %v4621_v23 = vpop.eup %4620 }
 0x695   : > { %v1043_v27 = vmul.f32 %v4621_v23, %v897_v6 }
 0x6f5   : > { %v1046_v24 = vpop.permute.xlu0 %1045 }
 0x6f6   : > { %v1048_v25 = vmul.f32 %v4621_v23, %v1046_v24 }
 0x6f8   : > { %1050 = vrot.lane.b32.xlu1 %v1048_v25, %s5033_s20 }
 0x76a   : > { %v1051_v30 = vpop.permute.xlu1 %1050 }
 0x76b   : > { %v1053_v31 = vadd.f32 %v1051_v30, %v1043_v27 }
 0x76d   : > { %4622 = vtanh.f32 %v1053_v31 }
 0x77a   : > { %v4623_v33 = vpop.eup %4622 }
 0x77b   : > { %1056 = vrot.lane.b32.xlu0 %v4623_v33, %s5032_s19  ;;  %v5392_v33 = vsel %vm1381_vm12, 1.0, %v5029_v0  ;;  %vm3444_vm12 = vcmp.lt.s32.totalorder %v5291_v48, 16 }
 0x7ed   : > { %v1057_v36 = vpop.permute.xlu0 %1056 }
 0x7ee   : > { %v1059_v38 = vmul.f32 %v4621_v23, %v1057_v36 }
 0x7f0   : > { %v1066_v39 = vrot.slane %v1059_v38, %v5347_v35  ;;  %v1072_v40 = vpack.c.bf16 %v1059_v38, %v1059_v38 }
 0x7f2   : > { %v1067_v42 = vsel %vm1060_vm9, %v1066_v39, 0.0  ;;  %1074 = vrot.lane.b32.xlu1 %v1072_v40, %s5033_s20 }
 0x7f3   : > { %v1068_v43 = vadd.f32 %v1067_v42, %v911_v41 }
 0x864   : > { %v1075_v46 = vpop.permute.xlu1 %1074 }
 0x865   : > { %4248 = vmatmul.mubr.msk.bf16.vlgmr.msra.gmra.mxu1 %vm711_vm4, %v1075_v46  ;;  %v5415_v46 = vsel %vm1537_vm14, 1.0, %v5029_v0  ;;  %vm3552_vm14 = vcmp.ge.s32.totalorder %v5291_v48, 16 }
 0x866   : > { %4265 = vmatpush3.msra.mxu1 %v5294_v51  ;;  %4266 = vmatprep.mubr.msk.f32.mxu1 %vm5030_vm0, %v5029_v0 }
 0x867   : > { %4277 = vmatprep.subr.mxu1 %v5029_v0 }
 0x86d   : > { %4267 = vmatmul.mubr.msk.f32.vlgmr.msra.gmra.mxu1 %vm581_vm2, %v5365_v47 }
 0x86e   : > { %4278 = vmatpush3.msra.mxu1 %v5294_v51  ;;  %4279 = vmatprep.mubr.msk.f32.mxu1 %vm5030_vm0, %v5029_v0 }
 0x86f   : > { %4282 = vmatprep.subr.bf16.mxu1 %v5029_v0 }
 0x871   : > { %4280 = vmatmul.mubr.msk.f32.vlgmr.msra.gmra.mxu1 %vm581_vm2, %v5392_v33 }
 0x872   : > { %4283 = vmatpush3.bf16.msra.mxu1 %v5272_v26  ;;  %4286 = vmatprep.mubr.msk.bf16.mxu1 %vm5030_vm0, %v5029_v0 }
 0x873   : > { %4284 = vmatprep.subr.bf16.mxu1 %v5029_v0 }
 0x876   : > { %4285 = vmatpush3.bf16.msra.mxu1 %v5275_v28 }
 0x877   : > { %4295 = vmatprep.subr.bf16.mxu1 %v5029_v0 }
 0x925   : > { %v1113_v49 = vpop.f32.mrf.mxu1 }
 0x926   : > { %v1189_v50 = vadd.f32 %v1188_v44, %v1113_v49 }
 0x927   : > { %v4249_v53 = vpop.f32.mrf.mxu1 }
 0x928   : > { %4624 = vtanh.f32 %v1189_v50  ;;  %v4015_v58 = vmul.f32 -1.442695, %v1189_v50 }
 0x929   : > { %v1116_v54 = vpop.f32.mrf.mxu1 }
 0x92a   : > { %4626 = vpow2.f32 %v4015_v58 }
 0x92b   : > { %v4250_v56 = vpop.f32.mrf.mxu1 }
 0x92d   : > { %v1344_v5 = vpop.f32.mrf.mxu1 }
 0x92f   : > { %v4268_v6 = vpop.f32.mrf.mxu1 }
 0x935   : > { %v4625_v57 = vpop.eup %4624 }
 0x936   : > { %1201 = vrot.lane.b32.xlu0 %v4625_v57, %s5032_s19 }
 0x937   : > { %v4627_v59 = vpop.eup %4626 }
 0x938   : > { %v1195_v60 = vadd.f32 1.0, %v4627_v59 }
 0x93a   : > { %4628 = vrcp.f32 %v1195_v60 }
 0x947   : > { %v4629_v61 = vpop.eup %4628 }
 0x948   : > { %v1199_v1 = vmul.f32 %v4629_v61, %v1053_v31 }
 0x9a8   : > { %v1202_v62 = vpop.permute.xlu0 %1201 }
 0x9a9   : > { %v1204_v63 = vmul.f32 %v4629_v61, %v1202_v62 }
 0x9ab   : > { %1206 = vrot.lane.b32.xlu1 %v1204_v63, %s5033_s20 }
 0xa1d   : > { %v1207_v2 = vpop.permute.xlu1 %1206 }
 0xa1e   : > { %v1209_v3 = vadd.f32 %v1207_v2, %v1199_v1 }
 0xa20   : > { %4630 = vtanh.f32 %v1209_v3 }
 0xa2d   : > { %v4631_v4 = vpop.eup %4630 }
 0xa2e   : > { %1212 = vrot.lane.b32.xlu0 %v4631_v4, %s5032_s19 }
 0xaa0   : > { %v1213_v7 = vpop.permute.xlu0 %1212 }
 0xaa1   : > { %v1215_v8 = vmul.f32 %v4629_v61, %v1213_v7 }
 0xaa3   : > { %v1222_v9 = vrot.slane %v1215_v8, %v5347_v35  ;;  %v1228_v10 = vpack.c.bf16 %v1215_v8, %v1215_v8 }
 0xaa5   : > { %v1223_v11 = vsel %vm1216_vm11, %v1222_v9, 0.0  ;;  %1230 = vrot.lane.b32.xlu1 %v1228_v10, %s5033_s20 }
 0xaa6   : > { %v1224_v12 = vadd.f32 %v1223_v11, %v1068_v43  ;;  %v1500_v43 = vpop.f32.mrf.mxu1 }
 0xaa8   : > { %v4281_v44 = vpop.f32.mrf.mxu1 }
 0xb17   : > { %v1231_v13 = vpop.permute.xlu1 %1230 }
 0xb18   : > { %4261 = vmatmul.mubr.msk.bf16.vlgmr.msra.gmra.mxu0 %vm711_vm4, %v1231_v13 }
 0xb19   : > { %4270 = vmatpush3.bf16.msra.mxu0 %v5272_v26  ;;  %4273 = vmatprep.mubr.msk.bf16.mxu0 %vm5030_vm0, %v5029_v0 }
 0xb1a   : > { %4271 = vmatprep.subr.bf16.mxu0 %v5029_v0 }
 0xb1d   : > { %4272 = vmatpush3.bf16.msra.mxu0 %v5275_v28 }
 0xb1e   : > { %4290 = vmatprep.subr.mxu0 %v5029_v0 }
 0xbd8   : > { %v1269_v14 = vpop.f32.mrf.mxu0 }
 0xbd9   : > { %v1345_v15 = vadd.f32 %v1344_v5, %v1269_v14 }
 0xbda   : > { %v4262_v16 = vpop.f32.mrf.mxu0 }
 0xbdb   : > { %4632 = vtanh.f32 %v1345_v15  ;;  %v4019_v20 = vmul.f32 -1.442695, %v1345_v15 }
 0xbdc   : > { %v1272_v17 = vpop.f32.mrf.mxu0 }
 0xbdd   : > { %4634 = vpow2.f32 %v4019_v20 }
 0xbde   : > { %v4263_v18 = vpop.f32.mrf.mxu0 }
 0xbe8   : > { %v4633_v19 = vpop.eup %4632 }
 0xbe9   : > { %1357 = vrot.lane.b32.xlu0 %v4633_v19, %s5032_s19 }
 0xbea   : > { %v4635_v21 = vpop.eup %4634 }
 0xbeb   : > { %v1351_v22 = vadd.f32 1.0, %v4635_v21 }
 0xbed   : > { %4636 = vrcp.f32 %v1351_v22 }
 0xbfa   : > { %v4637_v23 = vpop.eup %4636 }
 0xbfb   : > { %v1355_v27 = vmul.f32 %v4637_v23, %v1209_v3 }
 0xc5b   : > { %v1358_v24 = vpop.permute.xlu0 %1357 }
 0xc5c   : > { %v1360_v25 = vmul.f32 %v4637_v23, %v1358_v24 }
 0xc5e   : > { %1362 = vrot.lane.b32.xlu1 %v1360_v25, %s5033_s20 }
 0xcd0   : > { %v1363_v30 = vpop.permute.xlu1 %1362 }
 0xcd1   : > { %v1365_v31 = vadd.f32 %v1363_v30, %v1355_v27 }
 0xcd3   : > { %4638 = vtanh.f32 %v1365_v31 }
 0xce0   : > { %v4639_v36 = vpop.eup %4638 }
 0xce1   : > { %1368 = vrot.lane.b32.xlu0 %v4639_v36, %s5032_s19  ;;  %v5442_v36 = vsel %vm1693_vm3, 1.0, %v5029_v0 }
 0xd53   : > { %v1369_v37 = vpop.permute.xlu0 %1368 }
 0xd54   : > { %v1371_v38 = vmul.f32 %v4637_v23, %v1369_v37 }
 0xd56   : > { %v1378_v39 = vrot.slane %v1371_v38, %v5347_v35  ;;  %v1384_v40 = vpack.c.bf16 %v1371_v38, %v1371_v38 }
 0xd58   : > { %v1379_v41 = vsel %vm1372_vm13, %v1378_v39, 0.0  ;;  %1386 = vrot.lane.b32.xlu1 %v1384_v40, %s5033_s20 }
 0xd59   : > { %v1380_v42 = vadd.f32 %v1379_v41, %v1224_v12 }
 0xdca   : > { %v1387_v45 = vpop.permute.xlu1 %1386 }
 0xdcb   : > { %4274 = vmatmul.mubr.msk.bf16.vlgmr.msra.gmra.mxu0 %vm711_vm4, %v1387_v45 }
 0xdcc   : > { %4291 = vmatpush3.msra.mxu0 %v5294_v51  ;;  %4292 = vmatprep.mubr.msk.f32.mxu0 %vm5030_vm0, %v5029_v0 }
 0xdcd   : > { %4303 = vmatprep.subr.mxu0 %v5029_v0 }
 0xdd3   : > { %4293 = vmatmul.mubr.msk.f32.vlgmr.msra.gmra.mxu0 %vm581_vm2, %v5415_v46 }
 0xdd4   : > { %4304 = vmatpush3.msra.mxu0 %v5294_v51  ;;  %4305 = vmatprep.mubr.msk.f32.mxu0 %vm5030_vm0, %v5029_v0 }
 0xdd5   : > { %4308 = vmatprep.subr.bf16.mxu0 %v5029_v0 }
 0xdd7   : > { %4306 = vmatmul.mubr.msk.f32.vlgmr.msra.gmra.mxu0 %vm581_vm2, %v5442_v36 }
 0xdd8   : > { %4309 = vmatpush3.bf16.msra.mxu0 %v5272_v26  ;;  %4312 = vmatprep.mubr.msk.bf16.mxu0 %vm5030_vm0, %v5029_v0 }
 0xdd9   : > { %4310 = vmatprep.subr.bf16.mxu0 %v5029_v0 }
 0xddc   : > { %4311 = vmatpush3.bf16.msra.mxu0 %v5275_v28 }
 0xddd   : > { %4321 = vmatprep.subr.bf16.mxu0 %v5029_v0 }
 0xe8b   : > { %v1425_v49 = vpop.f32.mrf.mxu0 }
 0xe8c   : > { %v1501_v50 = vadd.f32 %v1500_v43, %v1425_v49 }
 0xe8d   : > { %v4275_v53 = vpop.f32.mrf.mxu0 }
 0xe8e   : > { %4640 = vtanh.f32 %v1501_v50  ;;  %v4023_v58 = vmul.f32 -1.442695, %v1501_v50 }
 0xe8f   : > { %v1428_v54 = vpop.f32.mrf.mxu0 }
 0xe90   : > { %4642 = vpow2.f32 %v4023_v58 }
 0xe91   : > { %v4276_v56 = vpop.f32.mrf.mxu0 }
 0xe93   : > { %v1656_v5 = vpop.f32.mrf.mxu0 }
 0xe95   : > { %v4294_v6 = vpop.f32.mrf.mxu0 }
 0xe97   : > { %v1812_v43 = vpop.f32.mrf.mxu0 }
 0xe99   : > { %v4307_v44 = vpop.f32.mrf.mxu0 }
 0xe9a   : > { %v2068_v44 = vld [vmem:[#allocation9 + $0x20] sm:$0xff] }
 0xe9b   : > { %v4641_v57 = vpop.eup %4640 }
 0xe9c   : > { %1513 = vrot.lane.b32.xlu0 %v4641_v57, %s5032_s19 }
 0xe9d   : > { %v4643_v59 = vpop.eup %4642 }
 0xe9e   : > { %v1507_v60 = vadd.f32 1.0, %v4643_v59 }
 0xea0   : > { %4644 = vrcp.f32 %v1507_v60 }
 0xead   : > { %v4645_v61 = vpop.eup %4644 }
 0xeae   : > { %v1511_v1 = vmul.f32 %v4645_v61, %v1365_v31 }
 0xf0e   : > { %v1514_v62 = vpop.permute.xlu0 %1513 }
 0xf0f   : > { %v1516_v63 = vmul.f32 %v4645_v61, %v1514_v62 }
 0xf11   : > { %1518 = vrot.lane.b32.xlu1 %v1516_v63, %s5033_s20 }
 0xf83   : > { %v1519_v2 = vpop.permute.xlu1 %1518 }
 0xf84   : > { %v1521_v3 = vadd.f32 %v1519_v2, %v1511_v1  ;;  %v5467_v2 = vsel %vm1849_vm6, 1.0, %v5029_v0  ;;  %vm3662_vm6 = vcmp.lt.s32.totalorder %v5291_v48, 32 }
 0xf86   : > { %4646 = vtanh.f32 %v1521_v3 }
 0xf93   : > { %v4647_v4 = vpop.eup %4646 }
 0xf94   : > { %1524 = vrot.lane.b32.xlu0 %v4647_v4, %s5032_s19 }
0x1006   : > { %v1525_v7 = vpop.permute.xlu0 %1524 }
0x1007   : > { %v1527_v8 = vmul.f32 %v4645_v61, %v1525_v7 }
0x1009   : > { %v1534_v9 = vrot.slane %v1527_v8, %v5347_v35  ;;  %v1540_v10 = vpack.c.bf16 %v1527_v8, %v1527_v8 }
0x100b   : > { %v1535_v11 = vsel %vm1528_vm15, %v1534_v9, 0.0  ;;  %1542 = vrot.lane.b32.xlu1 %v1540_v10, %s5033_s20 }
0x100c   : > { %v1536_v12 = vadd.f32 %v1535_v11, %v1380_v42 }
0x107d   : > { %v1543_v13 = vpop.permute.xlu1 %1542 }
0x107e   : > { %4287 = vmatmul.mubr.msk.bf16.vlgmr.msra.gmra.mxu1 %vm711_vm4, %v1543_v13 }
0x107f   : > { %4296 = vmatpush3.bf16.msra.mxu1 %v5272_v26  ;;  %4299 = vmatprep.mubr.msk.bf16.mxu1 %vm5030_vm0, %v5029_v0 }
0x1080   : > { %4297 = vmatprep.subr.bf16.mxu1 %v5029_v0 }
0x1083   : > { %4298 = vmatpush3.bf16.msra.mxu1 %v5275_v28 }
0x1084   : > { %4316 = vmatprep.subr.mxu1 %v5029_v0 }
0x113e   : > { %v1581_v14 = vpop.f32.mrf.mxu1 }
0x113f   : > { %v1657_v15 = vadd.f32 %v1656_v5, %v1581_v14 }
0x1140   : > { %v4288_v16 = vpop.f32.mrf.mxu1 }
0x1141   : > { %4648 = vtanh.f32 %v1657_v15  ;;  %v4027_v20 = vmul.f32 -1.442695, %v1657_v15 }
0x1142   : > { %v1584_v17 = vpop.f32.mrf.mxu1 }
0x1143   : > { %4650 = vpow2.f32 %v4027_v20 }
0x1144   : > { %v4289_v18 = vpop.f32.mrf.mxu1 }
0x114e   : > { %v4649_v19 = vpop.eup %4648 }
0x114f   : > { %1669 = vrot.lane.b32.xlu0 %v4649_v19, %s5032_s19 }
0x1150   : > { %v4651_v21 = vpop.eup %4650 }
0x1151   : > { %v1663_v22 = vadd.f32 1.0, %v4651_v21 }
0x1153   : > { %4652 = vrcp.f32 %v1663_v22 }
0x1160   : > { %v4653_v23 = vpop.eup %4652 }
0x1161   : > { %v1667_v27 = vmul.f32 %v4653_v23, %v1521_v3 }
0x11c1   : > { %v1670_v24 = vpop.permute.xlu0 %1669 }
0x11c2   : > { %v1672_v25 = vmul.f32 %v4653_v23, %v1670_v24 }
0x11c4   : > { %1674 = vrot.lane.b32.xlu1 %v1672_v25, %s5033_s20 }
0x1236   : > { %v1675_v30 = vpop.permute.xlu1 %1674 }
0x1237   : > { %v1677_v31 = vadd.f32 %v1675_v30, %v1667_v27 }
0x1239   : > { %4654 = vtanh.f32 %v1677_v31 }
0x1246   : > { %v4655_v37 = vpop.eup %4654 }
0x1247   : > { %1680 = vrot.lane.b32.xlu0 %v4655_v37, %s5032_s19  ;;  %v4039_v37 = vld [vmem:[%s5782_s6 + $0x38] sm:$0xff] }
0x12b9   : > { %v1681_v38 = vpop.permute.xlu0 %1680 }
0x12ba   : > { %v1683_v39 = vmul.f32 %v4653_v23, %v1681_v38  ;;  %v4036_v38 = vld [vmem:[%s5782_s6 + $0x20] sm:$0xff] }
0x12bc   : > { %v1690_v40 = vrot.slane %v1683_v39, %v5347_v35  ;;  %v1696_v41 = vpack.c.bf16 %v1683_v39, %v1683_v39 }
0x12be   : > { %v1691_v26 = vsel %vm1684_vm5, %v1690_v40, 0.0  ;;  %1698 = vrot.lane.b32.xlu1 %v1696_v41, %s5033_s20  ;;  %v4037_v40 = vld [vmem:[%s5782_s6 + $0x28] sm:$0xff] }
0x12bf   : > { %v1692_v42 = vadd.f32 %v1691_v26, %v1536_v12  ;;  %v2011_v26 = vpack.c.bf16 %v4037_v40, %v4036_v38 }
0x1330   : > { %v1699_v28 = vpop.permute.xlu1 %1698 }
0x1331   : > { %4300 = vmatmul.mubr.msk.bf16.vlgmr.msra.gmra.mxu1 %vm711_vm4, %v1699_v28 }
0x1332   : > { %4317 = vmatpush3.msra.mxu1 %v5294_v51  ;;  %4318 = vmatprep.mubr.msk.f32.mxu1 %vm5030_vm0, %v5029_v0 }
0x1333   : > { %4329 = vmatprep.subr.bf16.mxu1 %v5029_v0 }
0x1339   : > { %4319 = vmatmul.mubr.msk.f32.vlgmr.msra.gmra.mxu1 %vm581_vm2, %v5467_v2 }
0x133a   : > { %4333 = vmatprep.mubr.msk.bf16.mxu1 %vm5030_vm0, %v5029_v0 }
0x13f1   : > { %v1737_v45 = vpop.f32.mrf.mxu1 }
0x13f2   : > { %v1813_v49 = vadd.f32 %v1812_v43, %v1737_v45  ;;  %v2071_v43 = vld [vmem:[#allocation9 + $0x38] sm:$0xff]  ;;  %v2069_v45 = vld [vmem:[#allocation9 + $0x28] sm:$0xff] }
0x13f3   : > { %v4301_v50 = vpop.f32.mrf.mxu1 }
0x13f4   : > { %4656 = vtanh.f32 %v1813_v49  ;;  %v4031_v57 = vmul.f32 -1.442695, %v1813_v49  ;;  %v5502_v50 = vpack.c.bf16 %v2069_v45, %v2068_v44 }
0x13f5   : > { %v1740_v53 = vpop.f32.mrf.mxu1 }
0x13f6   : > { %4658 = vpow2.f32 %v4031_v57 }
0x13f7   : > { %v4302_v54 = vpop.f32.mrf.mxu1 }
0x13f9   : > { %v1968_v10 = vpop.f32.mrf.mxu1 }
0x13fb   : > { %v4320_v11 = vpop.f32.mrf.mxu1 }
0x1401   : > { %v4657_v56 = vpop.eup %4656 }
0x1402   : > { %1825 = vrot.lane.b32.xlu0 %v4657_v56, %s5032_s19 }
0x1403   : > { %v4659_v58 = vpop.eup %4658 }
0x1404   : > { %v1819_v59 = vadd.f32 1.0, %v4659_v58 }
0x1406   : > { %4660 = vrcp.f32 %v1819_v59 }
0x1413   : > { %v4661_v51 = vpop.eup %4660 }
0x1414   : > { %v1823_v62 = vmul.f32 %v4661_v51, %v1677_v31  ;;  %v4038_v31 = vld [vmem:[%s5782_s6 + $0x30] sm:$0xff] }
0x1415   : > { %v2012_v39 = vpack.c.bf16 %v4039_v37, %v4038_v31 }
0x1474   : > { %v1826_v60 = vpop.permute.xlu0 %1825 }
0x1475   : > { %v1828_v61 = vmul.f32 %v4661_v51, %v1826_v60 }
0x1477   : > { %1830 = vrot.lane.b32.xlu1 %v1828_v61, %s5033_s20 }
0x14e9   : > { %v1831_v63 = vpop.permute.xlu1 %1830 }
0x14ea   : > { %v1833_v1 = vadd.f32 %v1831_v63, %v1823_v62  ;;  %v4040_v62 = vld [vmem:[#allocation10 + $0x1] ss:$0 sm:$0xff] }
0x14ec   : > { %4662 = vtanh.f32 %v1833_v1 }
0x14f9   : > { %v4663_v3 = vpop.eup %4662 }
0x14fa   : > { %1836 = vrot.lane.b32.xlu0 %v4663_v3, %s5032_s19 }
0x156c   : > { %v1837_v4 = vpop.permute.xlu0 %1836 }
0x156d   : > { %v1839_v5 = vmul.f32 %v4661_v51, %v1837_v4 }
0x156f   : > { %v1846_v6 = vrot.slane %v1839_v5, %v5347_v35  ;;  %v1852_v7 = vpack.c.bf16 %v1839_v5, %v1839_v5 }
0x1571   : > { %v1847_v8 = vsel %vm1840_vm7, %v1846_v6, 0.0  ;;  %1854 = vrot.lane.b32.xlu1 %v1852_v7, %s5033_s20 }
0x1572   : > { %v1848_v9 = vadd.f32 %v1847_v8, %v1692_v42  ;;  %v2070_v42 = vld [vmem:[#allocation9 + $0x30] sm:$0xff] }
0x1573   : > { %v5499_v28 = vpack.c.bf16 %v2071_v43, %v2070_v42 }
0x1575   : > { %4330 = vmatpush3.bf16.msra.mxu1 %v5499_v28 }
0x1576   : > { %4331 = vmatprep.subr.bf16.mxu1 %v5029_v0 }
0x1579   : > { %4332 = vmatpush3.bf16.msra.mxu1 %v5502_v50 }
0x157a   : > { %4342 = vmatprep.subr.bf16.mxu1 %v5029_v0 }
0x157c   : > { %4334 = vmatmul.mubr.bf16.vlgmr.msra.gmra.mxu1 %v5031_v29 }
0x157d   : > { %4343 = vmatpush3.bf16.msra.mxu1 %v5499_v28  ;;  %4346 = vmatprep.mubr.msk.bf16.mxu1 %vm5030_vm0, %v5029_v0 }
0x157e   : > { %4344 = vmatprep.subr.bf16.mxu1 %v5029_v0 }
0x1581   : > { %4345 = vmatpush3.bf16.msra.mxu1 %v5502_v50 }
0x1582   : > { %4355 = vmatprep.subr.bf16.mxu1 %v5029_v0 }
0x15e3   : > { %v1855_v12 = vpop.permute.xlu1 %1854 }
0x15e4   : > { %4313 = vmatmul.mubr.msk.bf16.vlgmr.msra.gmra.mxu0 %vm711_vm4, %v1855_v12 }
0x15e5   : > { %4325 = vmatprep.mubr.msk.bf16.mxu0 %vm5030_vm0, %v5029_v0  ;;  %4322 = vmatpush3.bf16.msra.mxu0 %v2012_v39 }
0x15e6   : > { %4323 = vmatprep.subr.bf16.mxu0 %v5029_v0 }
0x15e9   : > { %4324 = vmatpush3.bf16.msra.mxu0 %v2011_v26 }
0x15ea   : > { %4337 = vmatprep.subr.mxu0 %v5029_v0 }
0x163c   : > { %v2108_v29 = vpop.f32.mrf.mxu1 }
0x163e   : > { %v4335_v51 = vpop.f32.mrf.mxu1 }
0x1640   : > { %v2111_v60 = vpop.f32.mrf.mxu1 }
0x1642   : > { %v4336_v61 = vpop.f32.mrf.mxu1 }
0x16a4   : > { %v1893_v13 = vpop.f32.mrf.mxu0 }
0x16a5   : > { %v1969_v14 = vadd.f32 %v1968_v10, %v1893_v13 }
0x16a6   : > { %v4314_v15 = vpop.f32.mrf.mxu0 }
0x16a7   : > { %4664 = vtanh.f32 %v1969_v14  ;;  %v4035_v19 = vmul.f32 -1.442695, %v1969_v14 }
0x16a8   : > { %v1896_v16 = vpop.f32.mrf.mxu0 }
0x16a9   : > { %4666 = vpow2.f32 %v4035_v19 }
0x16aa   : > { %v4315_v17 = vpop.f32.mrf.mxu0 }
0x16b4   : > { %v4665_v18 = vpop.eup %4664 }
0x16b5   : > { %1981 = vrot.lane.b32.xlu0 %v4665_v18, %s5032_s19 }
0x16b6   : > { %v4667_v20 = vpop.eup %4666 }
0x16b7   : > { %v1975_v21 = vadd.f32 1.0, %v4667_v20 }
0x16b9   : > { %4668 = vrcp.f32 %v1975_v21 }
0x16c6   : > { %v4669_v22 = vpop.eup %4668 }
0x16c7   : > { %v1979_v25 = vmul.f32 %v4669_v22, %v1833_v1 }
0x1727   : > { %v1982_v23 = vpop.permute.xlu0 %1981 }
0x1728   : > { %v1984_v24 = vmul.f32 %v4669_v22, %v1982_v23 }
0x172a   : > { %1986 = vrot.lane.b32.xlu1 %v1984_v24, %s5033_s20 }
0x179c   : > { %v1987_v27 = vpop.permute.xlu1 %1986 }
0x179d   : > { %v1989_v30 = vadd.f32 %v1987_v27, %v1979_v25 }
0x179f   : > { %4670 = vtanh.f32 %v1989_v30 }
0x17ac   : > { %v4671_v41 = vpop.eup %4670 }
0x17ad   : > { %1992 = vrot.lane.b32.xlu0 %v4671_v41, %s5032_s19 }
0x181f   : > { %v1993_v49 = vpop.permute.xlu0 %1992 }
0x1820   : > { %v1995_v53 = vmul.f32 %v4669_v22, %v1993_v49 }
0x1822   : > { %v2002_v54 = vrot.slane %v1995_v53, %v5347_v35 }
0x1824   : > { %v2003_v56 = vsel %vm1996_vm10, %v2002_v54, 0.0 }
0x1825   : > { %v2004_v57 = vadd.f32 %v2003_v56, %v1848_v9 }
0x1827   : > { %v2010_v58 = vpack.c.bf16 %v2004_v57, %v2004_v57 }
0x1829   : > { %2022 = vrot.lane.b32.xlu1 %v2010_v58, %s5033_s20 }
0x189b   : > { %v2023_v59 = vpop.permute.xlu1 %2022 }
0x189c   : > { %4326 = vmatmul.mubr.msk.bf16.vlgmr.msra.gmra.mxu0 %vm711_vm4, %v2023_v59 }
0x189d   : > { %4339 = vmatprep.mubr.msk.f32.mxu0 %vm5030_vm0, %v5029_v0 }
0x195c   : > { %v2061_v63 = vpop.f32.mrf.mxu0 }
0x195d   : > { %v5522_v1 = vadd.f32 %v4040_v62, %v2061_v63 }
0x195e   : > { %v4327_v3 = vpop.f32.mrf.mxu0 }
0x195f   : > { %4338 = vmatpush3.msra.mxu0 %v5522_v1 }
0x1960   : > { %v2064_v4 = vpop.f32.mrf.mxu0  ;;  %4340 = vmatmul.mubr.msk.f32.vlgmr.msra.gmra.mxu0 %vm581_vm2, %v5297_v52  ;;  %4350 = vmatprep.subr.mxu0 %v5029_v0 }
0x1961   : > { %4351 = vmatpush3.msra.mxu0 %v5522_v1  ;;  %4352 = vmatprep.mubr.msk.f32.mxu0 %vm5030_vm0, %v5029_v0 }
0x1962   : > { %v4328_v5 = vpop.f32.mrf.mxu0  ;;  %4363 = vmatprep.subr.mxu0 %v5029_v0 }
0x1964   : > { %4353 = vmatmul.mubr.msk.f32.vlgmr.msra.gmra.mxu0 %vm581_vm2, %v5308_v55 }
0x1965   : > { %4364 = vmatpush3.msra.mxu0 %v5522_v1  ;;  %4365 = vmatprep.mubr.msk.f32.mxu0 %vm5030_vm0, %v5029_v0 }
0x1966   : > { %4368 = vmatprep.subr.bf16.mxu0 %v5029_v0 }
0x1968   : > { %4366 = vmatmul.mubr.msk.f32.vlgmr.msra.gmra.mxu0 %vm581_vm2, %v5332_v32 }
0x1969   : > { %4369 = vmatpush3.bf16.msra.mxu0 %v5499_v28  ;;  %4372 = vmatprep.mubr.msk.bf16.mxu0 %vm5030_vm0, %v5029_v0 }
0x196a   : > { %4370 = vmatprep.subr.bf16.mxu0 %v5029_v0 }
0x196d   : > { %4371 = vmatpush3.bf16.msra.mxu0 %v5502_v50 }
0x196e   : > { %4381 = vmatprep.subr.bf16.mxu0 %v5029_v0 }
0x1a20   : > { %v2180_v52 = vpop.f32.mrf.mxu0 }
0x1a21   : > { %v2181_v55 = vadd.f32 %v2180_v52, %v2108_v29 }
0x1a22   : > { %v4341_v6 = vpop.f32.mrf.mxu0 }
0x1a23   : > { %4672 = vtanh.f32 %v2181_v55  ;;  %v4043_v8 = vmul.f32 -1.442695, %v2181_v55 }
0x1a24   : > { %v2327_v21 = vpop.f32.mrf.mxu0 }
0x1a25   : > { %4674 = vpow2.f32 %v4043_v8 }
0x1a26   : > { %v4354_v22 = vpop.f32.mrf.mxu0 }
0x1a30   : > { %v4673_v7 = vpop.eup %4672 }
0x1a31   : > { %2193 = vrot.lane.b32.xlu0 %v4673_v7, %s5032_s19 }
0x1a32   : > { %v4675_v32 = vpop.eup %4674 }
0x1a33   : > { %v2187_v9 = vadd.f32 1.0, %v4675_v32 }
0x1a35   : > { %4676 = vrcp.f32 %v2187_v9 }
0x1a42   : > { %v4677_v10 = vpop.eup %4676 }
0x1a43   : > { %v2191_v13 = vmul.f32 0.0, %v4677_v10 }
0x1aa3   : > { %v2194_v11 = vpop.permute.xlu0 %2193 }
0x1aa4   : > { %v2196_v12 = vmul.f32 %v4677_v10, %v2194_v11 }
0x1aa6   : > { %2198 = vrot.lane.b32.xlu1 %v2196_v12, %s5033_s20 }
0x1b18   : > { %v2199_v14 = vpop.permute.xlu1 %2198 }
0x1b19   : > { %v2201_v15 = vadd.f32 %v2199_v14, %v2191_v13 }
0x1b1b   : > { %4678 = vtanh.f32 %v2201_v15 }
0x1b28   : > { %v4679_v16 = vpop.eup %4678 }
0x1b29   : > { %2204 = vrot.lane.b32.xlu0 %v4679_v16, %s5032_s19 }
0x1b9b   : > { %v2205_v17 = vpop.permute.xlu0 %2204 }
0x1b9c   : > { %v2207_v18 = vmul.f32 %v4677_v10, %v2205_v17 }
0x1b9e   : > { %v2214_v19 = vpack.c.bf16 %v2207_v18, %v2207_v18  ;;  %v2211_v53 = vrot.slane %v2207_v18, %v5347_v35 }
0x1ba0   : > { %2216 = vrot.lane.b32.xlu1 %v2214_v19, %s5033_s20  ;;  %v2212_v58 = vsel %vm904_vm8, %v2211_v53, 0.0 }
0x1c12   : > { %v2217_v20 = vpop.permute.xlu1 %2216 }
0x1c13   : > { %4347 = vmatmul.mubr.msk.bf16.vlgmr.msra.gmra.mxu1 %vm711_vm4, %v2217_v20 }
0x1c14   : > { %4356 = vmatpush3.bf16.msra.mxu1 %v5499_v28  ;;  %4359 = vmatprep.mubr.msk.bf16.mxu1 %vm5030_vm0, %v5029_v0 }
0x1c15   : > { %4357 = vmatprep.subr.bf16.mxu1 %v5029_v0 }
0x1c18   : > { %4358 = vmatpush3.bf16.msra.mxu1 %v5502_v50 }
0x1c19   : > { %4376 = vmatprep.subr.mxu1 %v5029_v0 }
0x1cd3   : > { %v2255_v23 = vpop.f32.mrf.mxu1 }
0x1cd4   : > { %v2328_v24 = vadd.f32 %v2327_v21, %v2255_v23 }
0x1cd5   : > { %v4348_v25 = vpop.f32.mrf.mxu1 }
0x1cd6   : > { %4680 = vtanh.f32 %v2328_v24  ;;  %v4046_v37 = vmul.f32 -1.442695, %v2328_v24 }
0x1cd7   : > { %v2258_v27 = vpop.f32.mrf.mxu1 }
0x1cd8   : > { %4682 = vpow2.f32 %v4046_v37 }
0x1cd9   : > { %v4349_v30 = vpop.f32.mrf.mxu1 }
0x1ce3   : > { %v4681_v31 = vpop.eup %4680 }
0x1ce4   : > { %2340 = vrot.lane.b32.xlu0 %v4681_v31, %s5032_s19 }
0x1ce5   : > { %v4683_v38 = vpop.eup %4682 }
0x1ce6   : > { %v2334_v39 = vadd.f32 1.0, %v4683_v38 }
0x1ce8   : > { %4684 = vrcp.f32 %v2334_v39 }
0x1cf5   : > { %v4685_v40 = vpop.eup %4684 }
0x1cf6   : > { %v2338_v42 = vmul.f32 %v4685_v40, %v2201_v15 }
0x1d56   : > { %v2341_v41 = vpop.permute.xlu0 %2340 }
0x1d57   : > { %v2343_v26 = vmul.f32 %v4685_v40, %v2341_v41 }
0x1d59   : > { %2345 = vrot.lane.b32.xlu1 %v2343_v26, %s5033_s20 }
0x1dcb   : > { %v2346_v43 = vpop.permute.xlu1 %2345 }
0x1dcc   : > { %v2348_v44 = vadd.f32 %v2346_v43, %v2338_v42 }
0x1dce   : > { %4686 = vtanh.f32 %v2348_v44 }
0x1ddb   : > { %v4687_v45 = vpop.eup %4686 }
0x1ddc   : > { %2351 = vrot.lane.b32.xlu0 %v4687_v45, %s5032_s19 }
0x1e4e   : > { %v2352_v49 = vpop.permute.xlu0 %2351 }
0x1e4f   : > { %v2354_v54 = vmul.f32 %v4685_v40, %v2352_v49 }
0x1e51   : > { %v2358_v56 = vrot.slane %v2354_v54, %v5347_v35  ;;  %v2361_v57 = vpack.c.bf16 %v2354_v54, %v2354_v54 }
0x1e53   : > { %v2359_v59 = vsel %vm1060_vm9, %v2358_v56, 0.0  ;;  %2363 = vrot.lane.b32.xlu1 %v2361_v57, %s5033_s20  ;;  %vm3317_vm9 = vcmp.lt.s32.totalorder %v5291_v48, 8 }
0x1e54   : > { %v2360_v29 = vadd.f32 %v2359_v59, %v2212_v58 }
0x1ec5   : > { %v2364_v51 = vpop.permute.xlu1 %2363 }
0x1ec6   : > { %4360 = vmatmul.mubr.msk.bf16.vlgmr.msra.gmra.mxu1 %vm711_vm4, %v2364_v51 }
0x1ec7   : > { %4377 = vmatpush3.msra.mxu1 %v5522_v1  ;;  %4378 = vmatprep.mubr.msk.f32.mxu1 %vm5030_vm0, %v5029_v0 }
0x1ec8   : > { %4389 = vmatprep.subr.mxu1 %v5029_v0 }
0x1ece   : > { %4379 = vmatmul.mubr.msk.f32.vlgmr.msra.gmra.mxu1 %vm581_vm2, %v5365_v47  ;;  %v2474_v47 = vpop.f32.mrf.mxu0 }
0x1ecf   : > { %4390 = vmatpush3.msra.mxu1 %v5522_v1  ;;  %4391 = vmatprep.mubr.msk.f32.mxu1 %vm5030_vm0, %v5029_v0 }
0x1ed0   : > { %4394 = vmatprep.subr.bf16.mxu1 %v5029_v0  ;;  %v4367_v60 = vpop.f32.mrf.mxu0 }
0x1ed2   : > { %4392 = vmatmul.mubr.msk.f32.vlgmr.msra.gmra.mxu1 %vm581_vm2, %v5392_v33 }
0x1ed3   : > { %4395 = vmatpush3.bf16.msra.mxu1 %v5499_v28  ;;  %4398 = vmatprep.mubr.msk.bf16.mxu1 %vm5030_vm0, %v5029_v0 }
0x1ed4   : > { %4396 = vmatprep.subr.bf16.mxu1 %v5029_v0 }
0x1ed7   : > { %4397 = vmatpush3.bf16.msra.mxu1 %v5502_v50 }
0x1ed8   : > { %4407 = vmatprep.subr.bf16.mxu1 %v5029_v0 }
0x1f86   : > { %v2402_v61 = vpop.f32.mrf.mxu1 }
0x1f87   : > { %v2475_v62 = vadd.f32 %v2474_v47, %v2402_v61 }
0x1f88   : > { %v4361_v63 = vpop.f32.mrf.mxu1 }
0x1f89   : > { %4688 = vtanh.f32 %v2475_v62  ;;  %v4049_v5 = vmul.f32 -1.442695, %v2475_v62 }
0x1f8a   : > { %v2405_v3 = vpop.f32.mrf.mxu1 }
0x1f8b   : > { %4690 = vpow2.f32 %v4049_v5 }
0x1f8c   : > { %v4362_v4 = vpop.f32.mrf.mxu1 }
0x1f8e   : > { %v2621_v19 = vpop.f32.mrf.mxu1 }
0x1f90   : > { %v4380_v20 = vpop.f32.mrf.mxu1 }
0x1f96   : > { %v4689_v33 = vpop.eup %4688 }
0x1f97   : > { %2487 = vrot.lane.b32.xlu0 %v4689_v33, %s5032_s19 }
0x1f98   : > { %v4691_v52 = vpop.eup %4690 }
0x1f99   : > { %v2481_v55 = vadd.f32 1.0, %v4691_v52 }
0x1f9b   : > { %4692 = vrcp.f32 %v2481_v55 }
0x1fa8   : > { %v4693_v6 = vpop.eup %4692 }
0x1fa9   : > { %v2485_v32 = vmul.f32 %v4693_v6, %v2348_v44 }
0x2009   : > { %v2488_v7 = vpop.permute.xlu0 %2487 }
0x200a   : > { %v2490_v8 = vmul.f32 %v4693_v6, %v2488_v7 }
0x200c   : > { %2492 = vrot.lane.b32.xlu1 %v2490_v8, %s5033_s20 }
0x207e   : > { %v2493_v9 = vpop.permute.xlu1 %2492 }
0x207f   : > { %v2495_v10 = vadd.f32 %v2493_v9, %v2485_v32 }
0x2081   : > { %4694 = vtanh.f32 %v2495_v10 }
0x208e   : > { %v4695_v11 = vpop.eup %4694 }
0x208f   : > { %2498 = vrot.lane.b32.xlu0 %v4695_v11, %s5032_s19 }
0x2101   : > { %v2499_v12 = vpop.permute.xlu0 %2498 }
0x2102   : > { %v2501_v13 = vmul.f32 %v4693_v6, %v2499_v12 }
0x2104   : > { %v2505_v14 = vrot.slane %v2501_v13, %v5347_v35  ;;  %v2508_v15 = vpack.c.bf16 %v2501_v13, %v2501_v13 }
0x2106   : > { %v2506_v16 = vsel %vm1216_vm11, %v2505_v14, 0.0  ;;  %2510 = vrot.lane.b32.xlu1 %v2508_v15, %s5033_s20  ;;  %vm3443_vm11 = vcmp.ge.s32.totalorder %v5291_v48, 8 }
0x2107   : > { %v2507_v17 = vadd.f32 %v2506_v16, %v2360_v29 }
0x2178   : > { %v2511_v18 = vpop.permute.xlu1 %2510 }
0x2179   : > { %4373 = vmatmul.mubr.msk.bf16.vlgmr.msra.gmra.mxu0 %vm711_vm4, %v2511_v18 }
0x217a   : > { %4382 = vmatpush3.bf16.msra.mxu0 %v5499_v28  ;;  %4385 = vmatprep.mubr.msk.bf16.mxu0 %vm5030_vm0, %v5029_v0 }
0x217b   : > { %4383 = vmatprep.subr.bf16.mxu0 %v5029_v0 }
0x217e   : > { %4384 = vmatpush3.bf16.msra.mxu0 %v5502_v50 }
0x217f   : > { %4402 = vmatprep.subr.mxu0 %v5029_v0 }
0x2239   : > { %v2549_v21 = vpop.f32.mrf.mxu0 }
0x223a   : > { %v2622_v22 = vadd.f32 %v2621_v19, %v2549_v21 }
0x223b   : > { %v4374_v23 = vpop.f32.mrf.mxu0 }
0x223c   : > { %4696 = vtanh.f32 %v2622_v22  ;;  %v4052_v30 = vmul.f32 -1.442695, %v2622_v22 }
0x223d   : > { %v2552_v24 = vpop.f32.mrf.mxu0 }
0x223e   : > { %4698 = vpow2.f32 %v4052_v30 }
0x223f   : > { %v4375_v25 = vpop.f32.mrf.mxu0 }
0x2249   : > { %v4697_v27 = vpop.eup %4696 }
0x224a   : > { %2634 = vrot.lane.b32.xlu0 %v4697_v27, %s5032_s19 }
0x224b   : > { %v4699_v31 = vpop.eup %4698 }
0x224c   : > { %v2628_v37 = vadd.f32 1.0, %v4699_v31 }
0x224e   : > { %4700 = vrcp.f32 %v2628_v37 }
0x225b   : > { %v4701_v38 = vpop.eup %4700 }
0x225c   : > { %v2632_v41 = vmul.f32 %v4701_v38, %v2495_v10 }
0x22bc   : > { %v2635_v39 = vpop.permute.xlu0 %2634 }
0x22bd   : > { %v2637_v40 = vmul.f32 %v4701_v38, %v2635_v39 }
0x22bf   : > { %2639 = vrot.lane.b32.xlu1 %v2637_v40, %s5033_s20 }
0x2331   : > { %v2640_v26 = vpop.permute.xlu1 %2639 }
0x2332   : > { %v2642_v42 = vadd.f32 %v2640_v26, %v2632_v41 }
0x2334   : > { %4702 = vtanh.f32 %v2642_v42 }
0x2341   : > { %v4703_v43 = vpop.eup %4702 }
0x2342   : > { %2645 = vrot.lane.b32.xlu0 %v4703_v43, %s5032_s19 }
0x23b4   : > { %v2646_v44 = vpop.permute.xlu0 %2645 }
0x23b5   : > { %v2648_v45 = vmul.f32 %v4701_v38, %v2646_v44 }
0x23b7   : > { %v2652_v49 = vrot.slane %v2648_v45, %v5347_v35  ;;  %v2655_v53 = vpack.c.bf16 %v2648_v45, %v2648_v45 }
0x23b9   : > { %v2653_v54 = vsel %vm1372_vm13, %v2652_v49, 0.0  ;;  %2657 = vrot.lane.b32.xlu1 %v2655_v53, %s5033_s20  ;;  %vm3445_vm13 = vmand %vm3443_vm11, %vm3444_vm12 }
0x23ba   : > { %v2654_v56 = vadd.f32 %v2653_v54, %v2507_v17 }
0x242b   : > { %v2658_v57 = vpop.permute.xlu1 %2657 }
0x242c   : > { %4386 = vmatmul.mubr.msk.bf16.vlgmr.msra.gmra.mxu0 %vm711_vm4, %v2658_v57 }
0x242d   : > { %4403 = vmatpush3.msra.mxu0 %v5522_v1  ;;  %4404 = vmatprep.mubr.msk.f32.mxu0 %vm5030_vm0, %v5029_v0 }
0x242e   : > { %4415 = vmatprep.subr.mxu0 %v5029_v0 }
0x2434   : > { %4405 = vmatmul.mubr.msk.f32.vlgmr.msra.gmra.mxu0 %vm581_vm2, %v5415_v46  ;;  %v2768_v46 = vpop.f32.mrf.mxu1 }
0x2435   : > { %4416 = vmatpush3.msra.mxu0 %v5522_v1  ;;  %4417 = vmatprep.mubr.msk.f32.mxu0 %vm5030_vm0, %v5029_v0 }
0x2436   : > { %4420 = vmatprep.subr.bf16.mxu0 %v5029_v0  ;;  %v4393_v58 = vpop.f32.mrf.mxu1 }
0x2438   : > { %4418 = vmatmul.mubr.msk.f32.vlgmr.msra.gmra.mxu0 %vm581_vm2, %v5442_v36 }
0x2439   : > { %4421 = vmatpush3.bf16.msra.mxu0 %v5499_v28  ;;  %4424 = vmatprep.mubr.msk.bf16.mxu0 %vm5030_vm0, %v5029_v0 }
0x243a   : > { %4422 = vmatprep.subr.bf16.mxu0 %v5029_v0 }
0x243d   : > { %4423 = vmatpush3.bf16.msra.mxu0 %v5502_v50 }
0x243e   : > { %4433 = vmatprep.subr.bf16.mxu0 %v5029_v0 }
0x24ec   : > { %v2696_v59 = vpop.f32.mrf.mxu0 }
0x24ed   : > { %v2769_v29 = vadd.f32 %v2768_v46, %v2696_v59 }
0x24ee   : > { %v4387_v51 = vpop.f32.mrf.mxu0 }
0x24ef   : > { %4704 = vtanh.f32 %v2769_v29  ;;  %v4055_v61 = vmul.f32 -1.442695, %v2769_v29 }
0x24f0   : > { %v2699_v47 = vpop.f32.mrf.mxu0 }
0x24f1   : > { %4706 = vpow2.f32 %v4055_v61 }
0x24f2   : > { %v4388_v60 = vpop.f32.mrf.mxu0 }
0x24f4   : > { %v2915_v13 = vpop.f32.mrf.mxu0 }
0x24f6   : > { %v4406_v14 = vpop.f32.mrf.mxu0 }
0x24f8   : > { %v3062_v43 = vpop.f32.mrf.mxu0 }
0x24fa   : > { %v4419_v44 = vpop.f32.mrf.mxu0 }
0x24fc   : > { %v4705_v36 = vpop.eup %4704 }
0x24fd   : > { %2781 = vrot.lane.b32.xlu0 %v4705_v36, %s5032_s19 }
0x24fe   : > { %v4707_v62 = vpop.eup %4706 }
0x24ff   : > { %v2775_v63 = vadd.f32 1.0, %v4707_v62 }
0x2501   : > { %4708 = vrcp.f32 %v2775_v63 }
0x250e   : > { %v4709_v3 = vpop.eup %4708 }
0x250f   : > { %v2779_v5 = vmul.f32 %v4709_v3, %v2642_v42 }
0x256f   : > { %v2782_v4 = vpop.permute.xlu0 %2781 }
0x2570   : > { %v2784_v33 = vmul.f32 %v4709_v3, %v2782_v4 }
0x2572   : > { %2786 = vrot.lane.b32.xlu1 %v2784_v33, %s5033_s20 }
0x25e4   : > { %v2787_v52 = vpop.permute.xlu1 %2786 }
0x25e5   : > { %v2789_v55 = vadd.f32 %v2787_v52, %v2779_v5 }
0x25e7   : > { %4710 = vtanh.f32 %v2789_v55 }
0x25f4   : > { %v4711_v6 = vpop.eup %4710 }
0x25f5   : > { %2792 = vrot.lane.b32.xlu0 %v4711_v6, %s5032_s19 }
0x2667   : > { %v2793_v7 = vpop.permute.xlu0 %2792 }
0x2668   : > { %v2795_v8 = vmul.f32 %v4709_v3, %v2793_v7 }
0x266a   : > { %v2799_v32 = vrot.slane %v2795_v8, %v5347_v35  ;;  %v2802_v9 = vpack.c.bf16 %v2795_v8, %v2795_v8 }
0x266c   : > { %v2800_v10 = vsel %vm1528_vm15, %v2799_v32, 0.0  ;;  %2804 = vrot.lane.b32.xlu1 %v2802_v9, %s5033_s20  ;;  %vm3553_vm15 = vcmp.lt.s32.totalorder %v5291_v48, 24 }
0x266d   : > { %v2801_v11 = vadd.f32 %v2800_v10, %v2654_v56  ;;  %vm3554_vm3 = vmand %vm3552_vm14, %vm3553_vm15 }
0x26de   : > { %v2805_v12 = vpop.permute.xlu1 %2804 }
0x26df   : > { %4399 = vmatmul.mubr.msk.bf16.vlgmr.msra.gmra.mxu1 %vm711_vm4, %v2805_v12 }
0x26e0   : > { %4408 = vmatpush3.bf16.msra.mxu1 %v5499_v28  ;;  %4411 = vmatprep.mubr.msk.bf16.mxu1 %vm5030_vm0, %v5029_v0 }
0x26e1   : > { %4409 = vmatprep.subr.bf16.mxu1 %v5029_v0 }
0x26e4   : > { %4410 = vmatpush3.bf16.msra.mxu1 %v5502_v50 }
0x26e5   : > { %4428 = vmatprep.subr.mxu1 %v5029_v0 }
0x279f   : > { %v2843_v15 = vpop.f32.mrf.mxu1 }
0x27a0   : > { %v2916_v16 = vadd.f32 %v2915_v13, %v2843_v15 }
0x27a1   : > { %v4400_v17 = vpop.f32.mrf.mxu1 }
0x27a2   : > { %4712 = vtanh.f32 %v2916_v16  ;;  %v4058_v28 = vmul.f32 -1.442695, %v2916_v16 }
0x27a3   : > { %v2846_v18 = vpop.f32.mrf.mxu1 }
0x27a4   : > { %4714 = vpow2.f32 %v4058_v28  ;;  %v3252_v28 = vld [vmem:[%s5785_s9 + $0x10] sm:$0xff] }
0x27a5   : > { %v4401_v19 = vpop.f32.mrf.mxu1 }
0x27af   : > { %v4713_v20 = vpop.eup %4712 }
0x27b0   : > { %2928 = vrot.lane.b32.xlu0 %v4713_v20, %s5032_s19 }
0x27b1   : > { %v4715_v21 = vpop.eup %4714 }
0x27b2   : > { %v2922_v22 = vadd.f32 1.0, %v4715_v21  ;;  %v3253_v21 = vld [vmem:[%s5785_s9 + $0x18] sm:$0xff] }
0x27b4   : > { %4716 = vrcp.f32 %v2922_v22  ;;  %v3250_v22 = vld [vmem:[%s5785_s9] sm:$0xff] }
0x27c1   : > { %v4717_v23 = vpop.eup %4716 }
0x27c2   : > { %v2926_v25 = vmul.f32 %v4717_v23, %v2789_v55 }
0x2822   : > { %v2929_v50 = vpop.permute.xlu0 %2928 }
0x2823   : > { %v2931_v24 = vmul.f32 %v4717_v23, %v2929_v50  ;;  %v3251_v50 = vld [vmem:[%s5785_s9 + $0x8] sm:$0xff] }
0x2825   : > { %2933 = vrot.lane.b32.xlu1 %v2931_v24, %s5033_s20  ;;  %v3255_v24 = vpack.c.bf16 %v3251_v50, %v3250_v22 }
0x2897   : > { %v2934_v27 = vpop.permute.xlu1 %2933 }
0x2898   : > { %v2936_v30 = vadd.f32 %v2934_v27, %v2926_v25 }
0x289a   : > { %4718 = vtanh.f32 %v2936_v30 }
0x28a7   : > { %v4719_v31 = vpop.eup %4718 }
0x28a8   : > { %2939 = vrot.lane.b32.xlu0 %v4719_v31, %s5032_s19 }
0x291a   : > { %v2940_v37 = vpop.permute.xlu0 %2939 }
0x291b   : > { %v2942_v38 = vmul.f32 %v4717_v23, %v2940_v37  ;;  %v3256_v23 = vpack.c.bf16 %v3253_v21, %v3252_v28 }
0x291d   : > { %v2946_v39 = vrot.slane %v2942_v38, %v5347_v35  ;;  %v2949_v40 = vpack.c.bf16 %v2942_v38, %v2942_v38 }
0x291f   : > { %v2947_v41 = vsel %vm1684_vm5, %v2946_v39, 0.0  ;;  %2951 = vrot.lane.b32.xlu1 %v2949_v40, %s5033_s20  ;;  %vm3661_vm5 = vcmp.ge.s32.totalorder %v5291_v48, 24 }
0x2920   : > { %v2948_v26 = vadd.f32 %v2947_v41, %v2801_v11 }
0x2991   : > { %v2952_v42 = vpop.permute.xlu1 %2951 }
0x2992   : > { %4412 = vmatmul.mubr.msk.bf16.vlgmr.msra.gmra.mxu1 %vm711_vm4, %v2952_v42 }
0x2993   : > { %4429 = vmatpush3.msra.mxu1 %v5522_v1  ;;  %4430 = vmatprep.mubr.msk.f32.mxu1 %vm5030_vm0, %v5029_v0 }
0x2994   : > { %4441 = vmatprep.subr.bf16.mxu1 %v5029_v0 }
0x299a   : > { %4431 = vmatmul.mubr.msk.f32.vlgmr.msra.gmra.mxu1 %vm581_vm2, %v5467_v2 }
0x299b   : > { %4443 = vmatprep.mubr.msk.bf16.mxu1 %vm5030_vm0, %v5029_v0 }
0x2a52   : > { %v2990_v45 = vpop.f32.mrf.mxu1 }
0x2a53   : > { %v3063_v49 = vadd.f32 %v3062_v43, %v2990_v45 }
0x2a54   : > { %v4413_v53 = vpop.f32.mrf.mxu1 }
0x2a55   : > { %4720 = vtanh.f32 %v3063_v49  ;;  %v4061_v57 = vmul.f32 -1.442695, %v3063_v49 }
0x2a56   : > { %v2993_v54 = vpop.f32.mrf.mxu1 }
0x2a57   : > { %4722 = vpow2.f32 %v4061_v57  ;;  %v5695_v57 = vsel %vm3317_vm9, 1.0, %v5029_v0 }
0x2a58   : > { %v4414_v56 = vpop.f32.mrf.mxu1 }
0x2a5a   : > { %v3209_v52 = vpop.f32.mrf.mxu1 }
0x2a5c   : > { %v4432_v55 = vpop.f32.mrf.mxu1 }
0x2a62   : > { %v4721_v1 = vpop.eup %4720 }
0x2a63   : > { %3075 = vrot.lane.b32.xlu0 %v4721_v1, %s5032_s19 }
0x2a64   : > { %v4723_v46 = vpop.eup %4722 }
0x2a65   : > { %v3069_v58 = vadd.f32 1.0, %v4723_v46 }
0x2a67   : > { %4724 = vrcp.f32 %v3069_v58 }
0x2a74   : > { %v4725_v2 = vpop.eup %4724 }
0x2a75   : > { %v3073_v51 = vmul.f32 %v4725_v2, %v2936_v30 }
0x2ad5   : > { %v3076_v59 = vpop.permute.xlu0 %3075 }
0x2ad6   : > { %v3078_v29 = vmul.f32 %v4725_v2, %v3076_v59  ;;  %v5703_v59 = vsel %vm3445_vm13, 1.0, %v5029_v0 }
0x2ad8   : > { %3080 = vrot.lane.b32.xlu1 %v3078_v29, %s5033_s20 }
0x2b4a   : > { %v3081_v47 = vpop.permute.xlu1 %3080 }
0x2b4b   : > { %v3083_v60 = vadd.f32 %v3081_v47, %v3073_v51  ;;  %v5713_v47 = vsel %vm3554_vm3, 1.0, %v5029_v0 }
0x2b4d   : > { %4726 = vtanh.f32 %v3083_v60 }
0x2b5a   : > { %v4727_v36 = vpop.eup %4726 }
0x2b5b   : > { %3086 = vrot.lane.b32.xlu0 %v4727_v36, %s5032_s19 }
0x2bcd   : > { %v3087_v61 = vpop.permute.xlu0 %3086 }
0x2bce   : > { %v3089_v62 = vmul.f32 %v4725_v2, %v3087_v61 }
0x2bd0   : > { %v3093_v63 = vrot.slane %v3089_v62, %v5347_v35  ;;  %v3096_v3 = vpack.c.bf16 %v3089_v62, %v3089_v62 }
0x2bd2   : > { %v3094_v4 = vsel %vm1840_vm7, %v3093_v63, 0.0  ;;  %3098 = vrot.lane.b32.xlu1 %v3096_v3, %s5033_s20  ;;  %vm3663_vm7 = vmand %vm3661_vm5, %vm3662_vm6  ;;  %v4070_v3 = vld [vmem:[%s564_s27] ss:$0 sm:$0xff] }
0x2bd3   : > { %v3095_v33 = vadd.f32 %v3094_v4, %v2948_v26  ;;  %v5723_v61 = vsel %vm3663_vm7, 1.0, %v5029_v0 }
0x2c44   : > { %v3099_v5 = vpop.permute.xlu1 %3098 }
0x2c45   : > { %4425 = vmatmul.mubr.msk.bf16.vlgmr.msra.gmra.mxu0 %vm711_vm4, %v3099_v5 }
0x2c46   : > { %4437 = vmatprep.mubr.msk.bf16.mxu0 %vm5030_vm0, %v5029_v0  ;;  %4434 = vmatpush3.bf16.msra.mxu0 %v3256_v23 }
0x2c47   : > { %4435 = vmatprep.subr.bf16.mxu0 %v5029_v0 }
0x2c4a   : > { %4436 = vmatpush3.bf16.msra.mxu0 %v3255_v24 }
0x2c4b   : > { %4447 = vmatprep.subr.bf16.mxu0 %v5029_v0 }
0x2d05   : > { %v3137_v6 = vpop.f32.mrf.mxu0 }
0x2d06   : > { %v3210_v7 = vadd.f32 %v3209_v52, %v3137_v6 }
0x2d07   : > { %v4426_v8 = vpop.f32.mrf.mxu0 }
0x2d08   : > { %4728 = vtanh.f32 %v3210_v7  ;;  %v4064_v11 = vmul.f32 -1.442695, %v3210_v7 }
0x2d09   : > { %v3140_v32 = vpop.f32.mrf.mxu0 }
0x2d0a   : > { %4730 = vpow2.f32 %v4064_v11 }
0x2d0b   : > { %v4427_v9 = vpop.f32.mrf.mxu0 }
0x2d15   : > { %v4729_v10 = vpop.eup %4728 }
0x2d16   : > { %3222 = vrot.lane.b32.xlu0 %v4729_v10, %s5032_s19 }
0x2d17   : > { %v4731_v12 = vpop.eup %4730 }
0x2d18   : > { %v3216_v13 = vadd.f32 1.0, %v4731_v12 }
0x2d1a   : > { %4732 = vrcp.f32 %v3216_v13 }
0x2d27   : > { %v4733_v14 = vpop.eup %4732 }
0x2d28   : > { %v3220_v17 = vmul.f32 %v4733_v14, %v3083_v60 }
0x2d88   : > { %v3223_v15 = vpop.permute.xlu0 %3222 }
0x2d89   : > { %v3225_v16 = vmul.f32 %v4733_v14, %v3223_v15 }
0x2d8b   : > { %3227 = vrot.lane.b32.xlu1 %v3225_v16, %s5033_s20 }
0x2dfd   : > { %v3228_v18 = vpop.permute.xlu1 %3227 }
0x2dfe   : > { %v3230_v19 = vadd.f32 %v3228_v18, %v3220_v17 }
0x2e00   : > { %4734 = vtanh.f32 %v3230_v19 }
0x2e0d   : > { %v4735_v20 = vpop.eup %4734 }
0x2e0e   : > { %3233 = vrot.lane.b32.xlu0 %v4735_v20, %s5032_s19 }
0x2e80   : > { %v3234_v25 = vpop.permute.xlu0 %3233 }
0x2e81   : > { %v3236_v27 = vmul.f32 %v4733_v14, %v3234_v25 }
0x2e83   : > { %v3240_v30 = vrot.slane %v3236_v27, %v5347_v35 }
0x2e85   : > { %v3241_v31 = vsel %vm1996_vm10, %v3240_v30, 0.0 }
0x2e86   : > { %v3242_v37 = vadd.f32 %v3241_v31, %v3095_v33 }
0x2e88   : > { %v3244_v38 = vmul.f32 1.442695, %v3242_v37  ;;  %vm3243_vm8 = vcmp.gt.f32.partialorder %v3242_v37, 0.0 }
0x2e8a   : > { %4736 = vpow2.f32 %v3244_v38 }
0x2e97   : > { %v4737_v39 = vpop.eup %4736 }
0x2e98   : > { %v4065_v40 = vadd.f32 -1.0, %v4737_v39 }
0x2e9a   : > { %v3247_v41 = vmul.f32 1.6732632, %v4065_v40 }
0x2e9c   : > { %v3248_v26 = vsel %vm3243_vm8, %v3242_v37, %v3247_v41 }
0x2e9d   : > { %v3249_v42 = vmul.f32 1.050701, %v3248_v26 }
0x2e9f   : > { %v3254_v43 = vpack.c.bf16 %v3249_v42, %v3249_v42 }
0x2ea1   : > { %3265 = vrot.lane.b32.xlu1 %v3254_v43, %s5033_s20 }
0x2f13   : > { %v3266_v44 = vpop.permute.xlu1 %3265 }
0x2f14   : > { %4438 = vmatmul.mubr.msk.bf16.vlgmr.msra.gmra.mxu0 %vm711_vm4, %v3266_v44 }
0x2f15   : > { %4449 = vmatprep.mubr.msk.bf16.mxu0 %vm5030_vm0, %v5029_v0 }
0x2fd4   : > { %v3304_v35 = vpop.f32.mrf.mxu0 }
0x2fd5   : > { %v3305_v45 = vadd.f32 %v4066_v34, %v3304_v35 }
0x2fd6   : > { %v4439_v49 = vpop.f32.mrf.mxu0 }
0x2fd7   : > { %v5690_v53 = vpack.c.bf16 %v3305_v45, %v3305_v45  ;;  %v3321_v58 = vmul.f32 %v5695_v57, %v3305_v45  ;;  %v3448_v29 = vmul.f32 %v5703_v59, %v3305_v45  ;;  %v3557_v60 = vmul.f32 %v5713_v47, %v3305_v45 }
0x2fd8   : > { %v3307_v54 = vpop.f32.mrf.mxu0  ;;  %v3666_v62 = vmul.f32 %v5723_v61, %v3305_v45 }
0x2fd9   : > { %3325 = vrot.lane.b32.xlu0 %v5690_v53, %s5034_s23  ;;  %v3322_v2 = vpack.c.bf16 %v3321_v58, %v3321_v58  ;;  %v3449_v51 = vpack.c.bf16 %v3448_v29, %v3448_v29  ;;  %v3558_v36 = vpack.c.bf16 %v3557_v60, %v3557_v60 }
0x2fda   : > { %v4440_v56 = vpop.f32.mrf.mxu0  ;;  %v3667_v48 = vpack.c.bf16 %v3666_v62, %v3666_v62 }
0x304b   : > { %v3326_v1 = vpop.permute.xlu0 %3325 }
0x304c   : > { %v3331_v46 = vsel %vm711_vm4, %v3326_v1, 0 }
0x304d   : > { %4442 = vmatpush3.bf16.xpose.msra.mxu1 %v3331_v46 }
0x304e   : > { %4453 = vmatprep.subr.bf16.mxu1 %v5029_v0 }
0x3054   : > { %4444 = vmatmul.mubr.msk.bf16.vlgmr.msra.gmra.mxu1 %vm711_vm4, %v3322_v2 }
0x3055   : > { %4454 = vmatpush3.bf16.xpose.msra.mxu1 %v3331_v46  ;;  %4455 = vmatprep.mubr.msk.bf16.mxu1 %vm5030_vm0, %v5029_v0 }
0x3056   : > { %4465 = vmatprep.subr.bf16.mxu1 %v5029_v0 }
0x305c   : > { %4456 = vmatmul.mubr.msk.bf16.vlgmr.msra.gmra.mxu1 %vm711_vm4, %v3449_v51 }
0x305d   : > { %4466 = vmatpush3.bf16.xpose.msra.mxu1 %v3331_v46  ;;  %4467 = vmatprep.mubr.msk.bf16.mxu1 %vm5030_vm0, %v5029_v0 }
0x305e   : > { %4477 = vmatprep.subr.bf16.mxu1 %v5029_v0 }
0x3064   : > { %4468 = vmatmul.mubr.msk.bf16.vlgmr.msra.gmra.mxu1 %vm711_vm4, %v3558_v36 }
0x3065   : > { %4478 = vmatpush3.bf16.xpose.msra.mxu1 %v3331_v46  ;;  %4479 = vmatprep.mubr.msk.bf16.mxu1 %vm5030_vm0, %v5029_v0 }
0x3066   : > { %4489 = vmatprep.subr.bf16.mxu1 %v5029_v0 }
0x306c   : > { %4480 = vmatmul.mubr.msk.bf16.vlgmr.msra.gmra.mxu1 %vm711_vm4, %v3667_v48 }
0x306d   : > { %4493 = vmatprep.mubr.msk.bf16.mxu1 %vm5030_vm0, %v5029_v0 }
0x3114   : > { %v3367_v63 = vpop.f32.mrf.mxu1 }
0x3115   : > { %v3373_v4 = vmul.f32 0.35355338, %v3367_v63 }
0x3116   : > { %v4445_v33 = vpop.f32.mrf.mxu1 }
0x3117   : > { %v3380_v5 = vadd.f32 %v4070_v3, %v3373_v4 }
0x3118   : > { %v3370_v52 = vpop.f32.mrf.mxu1 }
0x3119   : > { %v3381_v55 = vsel %vm581_vm2, %v3380_v5, -inf }
0x311a   : > { %3382 = vmax.xlane.f32.xlu1 %v3381_v55  ;;  %v4446_v6 = vpop.f32.mrf.mxu1 }
0x311c   : > { %v3487_v7 = vpop.f32.mrf.mxu1 }
0x311d   : > { %v3493_v8 = vmul.f32 0.35355338, %v3487_v7  ;;  %v3313_v7 = vld [vmem:[#allocation13 + $0x10] sm:$0xff] }
0x311e   : > { %v4457_v32 = vpop.f32.mrf.mxu1 }
0x311f   : > { %v3494_v9 = vadd.f32 %v4070_v3, %v3493_v8  ;;  %v3314_v8 = vld [vmem:[#allocation13 + $0x18] sm:$0xff] }
0x3120   : > { %v3490_v10 = vpop.f32.mrf.mxu1  ;;  %v3772_v32 = vpack.c.bf16 %v3314_v8, %v3313_v7 }
0x3121   : > { %v3495_v11 = vsel %vm581_vm2, %v3494_v9, -inf  ;;  %v3312_v10 = vld [vmem:[#allocation13 + $0x8] sm:$0xff] }
0x3122   : > { %3496 = vmax.xlane.f32.xlu0 %v3495_v11  ;;  %v4458_v12 = vpop.f32.mrf.mxu1  ;;  %4490 = vmatpush3.bf16.msra.mxu1 %v3772_v32 }
0x3123   : > { %4491 = vmatprep.subr.bf16.mxu1 %v5029_v0 }
0x3124   : > { %v3596_v13 = vpop.f32.mrf.mxu1 }
0x3125   : > { %v3602_v14 = vmul.f32 0.35355338, %v3596_v13 }
0x3126   : > { %v4469_v15 = vpop.f32.mrf.mxu1 }
0x3127   : > { %v3603_v16 = vadd.f32 %v4070_v3, %v3602_v14 }
0x3128   : > { %v3599_v17 = vpop.f32.mrf.mxu1 }
0x3129   : > { %v3604_v18 = vsel %vm581_vm2, %v3603_v16, -inf }
0x312a   : > { %3605 = vmax.xlane.f32.xlu0 %v3604_v18  ;;  %v4470_v19 = vpop.f32.mrf.mxu1 }
0x312c   : > { %v3705_v20 = vpop.f32.mrf.mxu1 }
0x312d   : > { %v3711_v28 = vmul.f32 0.35355338, %v3705_v20 }
0x312e   : > { %v4481_v21 = vpop.f32.mrf.mxu1 }
0x312f   : > { %v3712_v22 = vadd.f32 %v4070_v3, %v3711_v28 }
0x3130   : > { %v3708_v23 = vpop.f32.mrf.mxu1 }
0x3131   : > { %v3713_v50 = vsel %vm581_vm2, %v3712_v22, -inf }
0x3132   : > { %3714 = vmax.xlane.f32.xlu1 %v3713_v50  ;;  %v4482_v24 = vpop.f32.mrf.mxu1 }
0x31a3   : > { %v3383_v25 = vpop.xlane.xlu1 %3382 }
0x31a4   : > { %v3384_v27 = vsub.f32 %v3380_v5, %v3383_v25 }
0x31a6   : > { %v3385_v30 = vmul.f32 1.442695, %v3384_v27 }
0x31a8   : > { %4738 = vpow2.f32 %v3385_v30 }
0x31ab   : > { %v3497_v31 = vpop.xlane.xlu0 %3496 }
0x31ac   : > { %v3498_v37 = vsub.f32 %v3494_v9, %v3497_v31  ;;  %v3311_v9 = vld [vmem:[#allocation13] sm:$0xff] }
0x31ad   : > { %v3771_v11 = vpack.c.bf16 %v3312_v10, %v3311_v9 }
0x31ae   : > { %v3499_v38 = vmul.f32 1.442695, %v3498_v37 }
0x31af   : > { %4492 = vmatpush3.bf16.msra.mxu1 %v3771_v11 }
0x31b0   : > { %4740 = vpow2.f32 %v3499_v38 }
0x31b3   : > { %v3606_v39 = vpop.xlane.xlu0 %3605 }
0x31b4   : > { %v3607_v40 = vsub.f32 %v3603_v16, %v3606_v39 }
0x31b5   : > { %v4739_v41 = vpop.eup %4738 }
0x31b6   : > { %v3608_v26 = vmul.f32 1.442695, %v3607_v40  ;;  %v3387_v42 = vsel %vm581_vm2, %v4739_v41, 0.0 }
0x31b7   : > { %3388 = vadd.xlane.f32.xlu0 %v3387_v42 }
0x31b8   : > { %4742 = vpow2.f32 %v3608_v26 }
0x31bb   : > { %v3715_v43 = vpop.xlane.xlu1 %3714 }
0x31bc   : > { %v3716_v44 = vsub.f32 %v3712_v22, %v3715_v43 }
0x31bd   : > { %v4741_v34 = vpop.eup %4740 }
0x31be   : > { %v3717_v35 = vmul.f32 1.442695, %v3716_v44  ;;  %v3501_v45 = vsel %vm581_vm2, %v4741_v34, 0.0 }
0x31bf   : > { %3502 = vadd.xlane.f32.xlu1 %v3501_v45 }
0x31c0   : > { %4744 = vpow2.f32 %v3717_v35 }
0x31c5   : > { %v4743_v49 = vpop.eup %4742 }
0x31c6   : > { %v3610_v54 = vsel %vm581_vm2, %v4743_v49, 0.0 }
0x31c7   : > { %3611 = vadd.xlane.f32.xlu0 %v3610_v54 }
0x31cd   : > { %v4745_v56 = vpop.eup %4744 }
0x31ce   : > { %v3719_v1 = vsel %vm581_vm2, %v4745_v56, 0.0 }
0x31cf   : > { %3720 = vadd.xlane.f32.xlu1 %v3719_v1 }
0x31dd   : > { %3393 = vrot.lane.b32.xlu0 %v5690_v53, %s5032_s19 }
0x3240   : > { %v3389_v46 = vpop.xlane.xlu0 %3388 }
0x3241   : > { %4746 = vrcp.f32 %v3389_v46 }
0x3248   : > { %v3503_v58 = vpop.xlane.xlu1 %3502 }
0x3249   : > { %4748 = vrcp.f32 %v3503_v58 }
0x324e   : > { %v4747_v2 = vpop.eup %4746 }
0x324f   : > { %v3391_v51 = vmul.f32 %v4747_v2, %v4739_v41 }
0x3250   : > { %v3612_v29 = vpop.xlane.xlu0 %3611 }
0x3251   : > { %4750 = vrcp.f32 %v3612_v29  ;;  %v3392_v62 = vpack.c.bf16 %v3391_v51, %v3391_v51 }
0x3254   : > { %v3394_v60 = vpop.permute.xlu0 %3393 }
0x3255   : > { %v3399_v36 = vsel %vm585_vm1, %v3394_v60, 0 }
0x3256   : > { %4448 = vmatpush3.bf16.msra.mxu0 %v3399_v36  ;;  %v4749_v48 = vpop.eup %4748 }
0x3257   : > { %4459 = vmatprep.subr.bf16.mxu0 %v5029_v0  ;;  %v3505_v53 = vmul.f32 %v4749_v48, %v4741_v34 }
0x3258   : > { %v3721_v63 = vpop.xlane.xlu1 %3720 }
0x3259   : > { %4450 = vmatmul.mubr.msk.bf16.vlgmr.msra.gmra.mxu0 %vm581_vm2, %v3392_v62  ;;  %4752 = vrcp.f32 %v3721_v63  ;;  %v3506_v3 = vpack.c.bf16 %v3505_v53, %v3505_v53 }
0x325a   : > { %4460 = vmatpush3.bf16.msra.mxu0 %v3399_v36  ;;  %4461 = vmatprep.mubr.msk.bf16.mxu0 %vm5030_vm0, %v5029_v0 }
0x325b   : > { %4471 = vmatprep.subr.bf16.mxu0 %v5029_v0 }
0x325e   : > { %v4751_v4 = vpop.eup %4750 }
0x325f   : > { %v3614_v33 = vmul.f32 %v4751_v4, %v4743_v49 }
0x3261   : > { %4462 = vmatmul.mubr.msk.bf16.vlgmr.msra.gmra.mxu0 %vm581_vm2, %v3506_v3  ;;  %v3615_v5 = vpack.c.bf16 %v3614_v33, %v3614_v33 }
0x3262   : > { %4472 = vmatpush3.bf16.msra.mxu0 %v3399_v36  ;;  %4473 = vmatprep.mubr.msk.bf16.mxu0 %vm5030_vm0, %v5029_v0 }
0x3263   : > { %4483 = vmatprep.subr.bf16.mxu0 %v5029_v0 }
0x3266   : > { %v4753_v52 = vpop.eup %4752 }
0x3267   : > { %v3723_v55 = vmul.f32 %v4753_v52, %v4745_v56 }
0x3269   : > { %4474 = vmatmul.mubr.msk.bf16.vlgmr.msra.gmra.mxu0 %vm581_vm2, %v3615_v5  ;;  %v3724_v6 = vpack.c.bf16 %v3723_v55, %v3723_v55 }
0x326a   : > { %4484 = vmatpush3.bf16.msra.mxu0 %v3399_v36  ;;  %4485 = vmatprep.mubr.msk.bf16.mxu0 %vm5030_vm0, %v5029_v0 }
0x3271   : > { %4486 = vmatmul.mubr.msk.bf16.vlgmr.msra.gmra.mxu0 %vm581_vm2, %v3724_v6 }
0x3319   : > { %v3435_v12 = vpop.f32.mrf.mxu0 }
0x331a   : > { %v3441_v0 = vmul.f32 %v5695_v57, %v3435_v12 }
0x331b   : > { %v4451_v13 = vpop.f32.mrf.mxu0 }
0x331d   : > { %v3438_v14 = vpop.f32.mrf.mxu0 }
0x331f   : > { %v4452_v15 = vpop.f32.mrf.mxu0 }
0x3321   : > { %v3544_v16 = vpop.f32.mrf.mxu0 }
0x3322   : > { %v3550_v21 = vmul.f32 %v5703_v59, %v3544_v16  ;;  %v4081_v59 = vld [vmem:[#allocation15] ss:$0 sm:$0xff] }
0x3323   : > { %v4463_v17 = vpop.f32.mrf.mxu0 }
0x3324   : > { %v3551_v24 = vadd.f32 %v3550_v21, %v3441_v0 }
0x3325   : > { %v3547_v18 = vpop.f32.mrf.mxu0 }
0x3327   : > { %v4464_v19 = vpop.f32.mrf.mxu0 }
0x3329   : > { %v3653_v20 = vpop.f32.mrf.mxu0 }
0x332a   : > { %v3659_v23 = vmul.f32 %v5713_v47, %v3653_v20 }
0x332b   : > { %v4475_v28 = vpop.f32.mrf.mxu0 }
0x332c   : > { %v3660_v27 = vadd.f32 %v3659_v23, %v3551_v24 }
0x332d   : > { %v3656_v22 = vpop.f32.mrf.mxu0 }
0x332f   : > { %v4476_v50 = vpop.f32.mrf.mxu0 }
0x3331   : > { %v3762_v25 = vpop.f32.mrf.mxu0 }
0x3332   : > { %v3768_v30 = vmul.f32 %v5723_v61, %v3762_v25 }
0x3333   : > { %v4487_v31 = vpop.f32.mrf.mxu0 }
0x3334   : > { %v3769_v37 = vadd.f32 %v3768_v30, %v3660_v27 }
0x3335   : > { %v3765_v38 = vpop.f32.mrf.mxu0 }
0x3336   : > { %v3770_v39 = vpack.c.bf16 %v3769_v37, %v3769_v37 }
0x3337   : > { %v4488_v40 = vpop.f32.mrf.mxu0 }
0x3338   : > { %4494 = vmatmul.mubr.msk.bf16.vlgmr.msra.gmra.mxu1 %vm711_vm4, %v3770_v39 }
0x33f8   : > { %v3816_v57 = vpop.f32.mrf.mxu1 }
0x33f9   : > { %v3817_v47 = vadd.f32 %v4081_v59, %v3816_v57 }
0x33fa   : > { %v4495_v41 = vpop.f32.mrf.mxu1 }
0x33fb   : > { %3822 = vst.msk [vmem:[%s568_s24] sm:$0xff] %vm711_vm4, %v3817_v47 }
0x33fc   : > { %v3819_v26 = vpop.f32.mrf.mxu1 }
0x33fe   : > { %v4496_v61 = vpop.f32.mrf.mxu1 }
0x33ff PF: > { %s28_s25 = sadd.s32 1, %s5014_s25  }
0x3400   : > { %p25_p8 = scmp.ge.s32.totalorder %s28_s25, 4  }
0x3402   :  { %27 = sbr.rel (!%p25_p8) target bundleno = 5 (0x5), region = 145 }
0x3407   :  { %3842 = vsyncpa [#allocation3], 1 }
0x3408   :  { %3844 = vsyncpa [#allocation3 + $0x1], 1 }
0x3409   :  { %3845 = vsyncpa [#allocation5], 1 }
0x340a   :  { %3846 = vsyncpa [#allocation8], 1 }
0x340b   :  { %3847 = vsyncpa [#allocation11], 1 }
0x340c   :  { %3848 = vsyncpa [#allocation14], 1 }

</bundles_post_ra>
